<compile_context>
chip_gen: v6e
topology: v6e:2x2x1
jax: 0.10.0
libtpu: 0.0.40
codegen_flags: <defaults>
</compile_context>

<pallas_src>
import jax
import jax.numpy as jnp
from jax.experimental import pallas as pl
from jax.experimental.pallas import tpu as pltpu

D = 200          # embedding dim == TextCNN "dim"
DP = 256         # lane-padded embedding dim (multiple of 128)
K = 5            # conv kernel height, kernel_size = (5, 1)
POOL = 2         # MaxPool2d((2, 1))
BN_EPS = 1e-5
LT_OUT = 64      # linear_transform: 200 -> 64
HID = 128        # MLP input size (64 + 64)

VMEM_LIMIT = 48 * 1024 * 1024    # explicit scoped-VMEM limit (fits v5e/v6e/v7x)
VMEM_BUDGET = 40 * 1024 * 1024   # tile-sizing budget, headroom under VMEM_LIMIT


# ----------------------------------------------------------------------------
# Fused 5-tap conv along dim 1 of a VMEM ref.
#   out = sum_k taps[k] * src_ref[:, k*stride : k*stride + n_out, :] + bias
# Ref slices are cheap offset loads; the whole thing is one fused VALU chain,
# so each output element is stored exactly once.
# ----------------------------------------------------------------------------
def _conv5(src_ref, taps, bias, n_out, stride):
    acc = taps[0] * src_ref[:, 0:n_out, :]
    for k in range(1, K):
        off = k * stride
        acc = acc + taps[k] * src_ref[:, off:off + n_out, :]
    return acc + bias


# ----------------------------------------------------------------------------
# TextCNN tower on a (TB, L, DP) bf16 input block (ref).
#   Conv2d(1,1,(5,1)) -> BN(eval, folded) -> ReLU -> MaxPool2d((2,1)) ->
#   Conv2d(1,1,(5,1)) -> BN(eval, folded) -> ReLU -> AdaptiveMaxPool2d((1,D))
# The trailing channel pool (max for geek / mean for job) is the identity
# because channels == 1.
#
# cnn_ref is an SMEM (2, 12) array; row = tower index.  Per tower:
#   [0:5]  conv1 taps * bn1_scale      [5]  conv1_bias/BN folded shift
#   [6:11] conv2 taps * bn2_scale      [11] conv2_bias/BN folded shift
#
# MaxPool + conv2 rewrite: m[i] = max(y1[i], y1[i+1]) is staged in a VMEM
# scratch; the pooled value z[h] == m[2h], so conv2 is evaluated at every
# offset with contiguous slices m[2k : 2k+nu] and odd output rows are zeroed
# before the final max (safe: ReLU output is non-negative, nu >= 1).
# ----------------------------------------------------------------------------
def _textcnn_block(x_ref, cnn_ref, row, m_ref):
    _, L, _ = x_ref.shape
    L1 = L - (K - 1)                      # rows after conv1

    # Conv1 (+ folded BN) + ReLU.  bf16 ref slices promote to f32 via the f32 taps.
    taps1 = [cnn_ref[row, k] for k in range(K)]
    y1 = jnp.maximum(_conv5(x_ref, taps1, cnn_ref[row, K], L1, 1), 0.0)

    # Pairwise max (MaxPool precursor) staged in VMEM scratch.
    lm = L1 - 1
    m_ref[...] = jnp.maximum(y1[:, :lm, :], y1[:, 1:, :])      # (tb, lm, DP)

    # Conv2 (+ folded BN) + ReLU on the scratch ref (stride-2 tap offsets).
    nu = L1 - 2 * (K - 1) - 1                                   # = L1 - 9
    taps2 = [cnn_ref[row, K + 1 + k] for k in range(K)]
    y2 = jnp.maximum(_conv5(m_ref, taps2, cnn_ref[row, 2 * K + 1], nu, 2), 0.0)

    # Keep only even rows (real pooled positions); tiny (1, nu, DP) mask broadcast.
    parity = jax.lax.broadcasted_iota(jnp.int32, (1, nu, DP), 1)
    y2 = jnp.where((parity & 1) == 0, y2, 0.0)

    # AdaptiveMaxPool2d((1, D)) over the remaining sequence axis.
    return jnp.max(y2, axis=1)                                  # (tb, DP)


def _col_to_row(col):
    """(N, 1) -> (1, N) via iota mask + cross-sublane reduce.

    Keeps the per-step output store lane-dense without relying on a Mosaic 2-D
    transpose of a 1-lane value.  N*N <= 256*256 elements -> negligible cost.
    """
    n = col.shape[0]
    r = jax.lax.broadcasted_iota(jnp.int32, (n, n), 0)
    c = jax.lax.broadcasted_iota(jnp.int32, (n, n), 1)
    return jnp.sum(jnp.where(r == c, col, 0.0), axis=0, keepdims=True)


# ----------------------------------------------------------------------------
# Fused kernel: both towers + linear_transform + MLP head + sigmoid.
# ----------------------------------------------------------------------------
def _pjfnn_kernel(cnn_ref, job_ref, user_ref, wlt_ref, blt_ref,
                  w1_ref, b1_ref, w2_ref, b2_ref, o_ref, mj_ref, mu_ref):
    job_feat = _textcnn_block(job_ref, cnn_ref, 0, mj_ref)     # (tb, DP), 'mean' pool == id
    user_feat = _textcnn_block(user_ref, cnn_ref, 1, mu_ref)   # (tb, DP), 'max'  pool == id
    tb = job_feat.shape[0]

    # linear_transform on both towers in one MXU pass; padded lanes hit the
    # zero rows appended to w_lt.
    feats = jnp.concatenate([user_feat, job_feat], axis=0)     # (2*tb, DP)
    uj = jnp.dot(feats, wlt_ref[...],
                 preferred_element_type=jnp.float32) + blt_ref[...]       # (2*tb, 64)

    # MLP head on x = cat([user, job], dim=1); Dropout is identity at inference.
    x = jnp.concatenate([uj[:tb, :], uj[tb:, :]], axis=1)      # (tb, 128)
    h = jnp.maximum(jnp.dot(x, w1_ref[...],
                            preferred_element_type=jnp.float32) + b1_ref[...], 0.0)
    logits = jnp.dot(h, w2_ref[...],
                     preferred_element_type=jnp.float32) + b2_ref[...]    # (tb, 1)

    # Lane-dense (1, tb) output row.
    o_ref[0] = _col_to_row(jax.nn.sigmoid(logits))


def _pick_block_b(batch, l_job, l_user, block_b):
    """Cap the batch block so double-buffered bf16 inputs + f32 temporaries fit
    the VMEM budget (re-derived for v7x's 64 MiB; v6e/v5e have more headroom)."""
    per_seq = (2 * 2 * (l_job + l_user) * DP * 2      # 2 inputs x 2 buffers, bf16
               + 3 * (l_job + l_user) * DP * 4)       # y1 / m-scratch / y2 temps, f32
    cap = max(8, (VMEM_BUDGET // per_seq) // 8 * 8)
    b_rounded = pl.cdiv(batch, 8) * 8
    tb = min(block_b, cap, b_rounded)
    return max(8, (tb // 8) * 8)


def pjfnn_forward(job_ids, user_ids, packed, *, block_b=128):
    """job_ids: (B, Lj) int32, user_ids: (B, Lu) int32, packed = pack_params(...).

    block_b=128 is a good default for short sequences; v6e (128 MiB VMEM) can use
    256, while _pick_block_b shrinks the block automatically for long L / v7x.
    """
    B, l_job = job_ids.shape
    _, l_user = user_ids.shape
    assert l_job >= 3 * K - 1 and l_user >= 3 * K - 1, "need L >= 14 (conv/pool shrink)"

    tb = _pick_block_b(B, l_job, l_user, block_b)
    bp = pl.cdiv(B, tb) * tb
    if bp != B:
        # Pad the cheap int32 ids (index 0 is a valid row); padded outputs are sliced off.
        job_ids = jnp.pad(job_ids, ((0, bp - B), (0, 0)))
        user_ids = jnp.pad(user_ids, ((0, bp - B), (0, 0)))
    grid_b = bp // tb

    # Embedding gather (left to XLA, see TODO at top of file); bf16 streams.
    job = jnp.take(packed["emb1"], job_ids, axis=0)      # (bp, Lj, DP) bf16
    user = jnp.take(packed["emb2"], user_ids, axis=0)    # (bp, Lu, DP) bf16

    out = pl.pallas_call(
        _pjfnn_kernel,
        out_shape=jax.ShapeDtypeStruct((grid_b, 1, tb), jnp.float32),
        grid_spec=pltpu.PrefetchScalarGridSpec(
            num_scalar_prefetch=0,
            grid=(grid_b,),
            in_specs=[
                pl.BlockSpec(memory_space=pltpu.MemorySpace.SMEM),     # folded CNN params
                pl.BlockSpec((tb, l_job, DP), lambda b: (b, 0, 0)),    # job embeddings (bf16)
                pl.BlockSpec((tb, l_user, DP), lambda b: (b, 0, 0)),   # user embeddings (bf16)
                pl.BlockSpec((DP, LT_OUT), lambda b: (0, 0)),          # w_lt (zero-row padded)
                pl.BlockSpec((1, LT_OUT), lambda b: (0, 0)),           # b_lt
                pl.BlockSpec((HID, HID), lambda b: (0, 0)),            # w1
                pl.BlockSpec((1, HID), lambda b: (0, 0)),              # b1
                pl.BlockSpec((HID, 1), lambda b: (0, 0)),              # w2
                pl.BlockSpec((1, 1), lambda b: (0, 0)),                # b2
            ],
            out_specs=pl.BlockSpec((1, 1, tb), lambda b: (b, 0, 0)),   # lane-dense rows
            scratch_shapes=[
                pltpu.VMEM((tb, l_job - K, DP), jnp.float32),          # m scratch, job tower
                pltpu.VMEM((tb, l_user - K, DP), jnp.float32),         # m scratch, user tower
            ],
        ),
        compiler_params=pltpu.CompilerParams(
            dimension_semantics=("parallel",),
            vmem_limit_bytes=VMEM_LIMIT,
        ),
    )(packed["cnn"], job, user, packed["w_lt"], packed["b_lt"],
      packed["w1"], packed["b1"], packed["w2"], packed["b2"])
    return out.reshape(bp)[:B]


# ----------------------------------------------------------------------------
# Parameter construction (PyTorch-faithful raw params) and host-side packing
# (BN folding, lane padding, bf16 embedding storage).
# ----------------------------------------------------------------------------
def init_params(key, vocab1, vocab2):
    ks = jax.random.split(key, 12)

    def conv_bn(k):
        kk = jax.random.split(k, 6)
        return {
            "w": jax.random.normal(kk[0], (K,), jnp.float32) * 0.2,    # Conv2d weight (5,1)
            "b": jax.random.normal(kk[1], (), jnp.float32) * 0.05,     # Conv2d bias
            "gamma": 1.0 + 0.1 * jax.random.normal(kk[2], (), jnp.float32),
            "beta": 0.1 * jax.random.normal(kk[3], (), jnp.float32),
            "rm": 0.05 * jax.random.normal(kk[4], (), jnp.float32),    # running mean
            "rv": 0.75 + 0.5 * jax.random.uniform(kk[5], (), jnp.float32),  # running var
        }

    return {
        "emb1": jax.random.normal(ks[0], (vocab1, D), jnp.float32) * 0.1,
        "emb2": jax.random.normal(ks[1], (vocab2, D), jnp.float32) * 0.1,
        "job_cnn": {"l1": conv_bn(ks[2]), "l2": conv_bn(ks[3])},       # method='mean'
        "geek_cnn": {"l1": conv_bn(ks[4]), "l2": conv_bn(ks[5])},      # method='max'
        # nn.Linear weights stored as (in, out); forward uses x @ W + b.
        "w_lt": jax.random.normal(ks[6], (D, LT_OUT), jnp.float32) * 0.05,
        "b_lt": jax.random.normal(ks[7], (1, LT_OUT), jnp.float32) * 0.05,
        "w1": jax.random.normal(ks[8], (HID, HID), jnp.float32) * 0.05,
        "b1": jax.random.normal(ks[9], (1, HID), jnp.float32) * 0.05,
        "w2": jax.random.normal(ks[10], (HID, 1), jnp.float32) * 0.05,
        "b2": jax.random.normal(ks[11], (1, 1), jnp.float32) * 0.05,
    }


def _fold_conv_bn(cb):
    # conv(x)+b then eval-BN  ==  conv(x) * s + ((b - rm) * s + beta)
    s = cb["gamma"] / jnp.sqrt(cb["rv"] + BN_EPS)
    taps = cb["w"] * s
    shift = (cb["b"] - cb["rm"]) * s + cb["beta"]
    return jnp.concatenate([taps, shift[None]])            # (6,)


def pack_params(p):
    pad = DP - D
    fold = lambda t: jnp.concatenate([_fold_conv_bn(t["l1"]), _fold_conv_bn(t["l2"])])
    return {
        # bf16 embedding storage: halves HBM traffic of the dominant stream;
        # the kernel promotes to f32 before any arithmetic.
        "emb1": jnp.pad(p["emb1"], ((0, 0), (0, pad))).astype(jnp.bfloat16),
        "emb2": jnp.pad(p["emb2"], ((0, 0), (0, pad))).astype(jnp.bfloat16),
        "cnn": jnp.stack([fold(p["job_cnn"]), fold(p["geek_cnn"])]),  # (2, 12)
        "w_lt": jnp.pad(p["w_lt"], ((0, pad), (0, 0))),            # zero rows drop pad lanes
        "b_lt": p["b_lt"],
        "w1": p["w1"], "b1": p["b1"], "w2": p["w2"], "b2": p["b2"],
    }


# ----------------------------------------------------------------------------
# Pure-JAX reference (unfolded BN, unpadded D) for a correctness check.
# Embeddings are rounded through bf16 to match the kernel's storage dtype;
# every arithmetic op stays in f32 in both paths.
# ----------------------------------------------------------------------------
def _conv_bn_relu_ref(x, cb, l_out):
    y = sum(cb["w"][k] * x[:, k:k + l_out, :] for k in range(K)) + cb["b"]
    y = (y - cb["rm"]) / jnp.sqrt(cb["rv"] + BN_EPS) * cb["gamma"] + cb["beta"]
    return jnp.maximum(y, 0.0)


def _textcnn_ref(x, tower):
    b, L, d = x.shape
    L1 = L - (K - 1)
    y1 = _conv_bn_relu_ref(x, tower["l1"], L1)
    H1 = L1 // POOL
    z = jnp.max(y1[:, :H1 * POOL, :].reshape(b, H1, POOL, d), axis=2)
    L2 = H1 - (K - 1)
    y2 = _conv_bn_relu_ref(z, tower["l2"], L2)
    return jnp.max(y2, axis=1)


def _pjfnn_ref(job_ids, user_ids, p):
    emb1 = p["emb1"].astype(jnp.bfloat16).astype(jnp.float32)
    emb2 = p["emb2"].astype(jnp.bfloat16).astype(jnp.float32)
    job = jnp.take(emb1, job_ids, axis=0)
    user = jnp.take(emb2, user_ids, axis=0)
    jf = _textcnn_ref(job, p["job_cnn"])
    uf = _textcnn_ref(user, p["geek_cnn"])
    u = uf @ p["w_lt"] + p["b_lt"]
    j = jf @ p["w_lt"] + p["b_lt"]
    x = jnp.concatenate([u, j], axis=1)
    h = jnp.maximum(x @ p["w1"] + p["b1"], 0.0)
    return jax.nn.sigmoid(h @ p["w2"] + p["b2"])[:, 0]


if __name__ == "__main__":
    key = jax.random.PRNGKey(0)
    kp, kj, ku = jax.random.split(key, 3)

    vocab1, vocab2 = 50, 60
    raw_params = init_params(kp, vocab1, vocab2)
    packed = pack_params(raw_params)

    B, L_job, L_user = 8, 16, 20
    job_ids = jax.random.randint(kj, (B, L_job), 0, vocab1, dtype=jnp.int32)
    user_ids = jax.random.randint(ku, (B, L_user), 0, vocab2, dtype=jnp.int32)

    out = jax.block_until_ready(pjfnn_forward(job_ids, user_ids, packed))
    ref = jax.block_until_ready(_pjfnn_ref(job_ids, user_ids, raw_params))

    assert out.shape == (B,), out.shape
    assert jnp.allclose(out, ref, atol=2e-4, rtol=2e-4), (out, ref)

    print("KERNEL_OK")
</pallas_src>

<mosaic_0001>
module attributes {stable_mosaic.version = 11 : i64} {
  func.func @_pjfnn_kernel(%arg0: i32, %arg1: memref<2x12xf32, #tpu.memory_space<smem>>, %arg2: memref<8x16x256xbf16, #tpu.memory_space<vmem>>, %arg3: memref<8x20x256xbf16, #tpu.memory_space<vmem>>, %arg4: memref<256x64xf32, #tpu.memory_space<vmem>>, %arg5: memref<1x64xf32, #tpu.memory_space<vmem>>, %arg6: memref<128x128xf32, #tpu.memory_space<vmem>>, %arg7: memref<1x128xf32, #tpu.memory_space<vmem>>, %arg8: memref<128x1xf32, #tpu.memory_space<vmem>>, %arg9: memref<1x1xf32, #tpu.memory_space<vmem>>, %arg10: memref<1x1x8xf32, #tpu.memory_space<vmem>>, %arg11: memref<8x11x256xf32, #tpu.memory_space<vmem>>, %arg12: memref<8x15x256xf32, #tpu.memory_space<vmem>>) attributes {dimension_semantics = [#tpu.dimension_semantics<parallel>], iteration_bounds = array<i64: 1>, scalar_prefetch = 0 : i64, scratch_operands = 2 : i64, tpu.core_type = #tpu.core_type<tc>, window_params = [{transform_indices = @transform_0, window_bounds = array<i64: 2, 12>}, {transform_indices = @transform_1, window_bounds = array<i64: 8, 16, 256>}, {transform_indices = @transform_2, window_bounds = array<i64: 8, 20, 256>}, {pipeline_mode = #tpu.pipeline_mode<synchronous>, transform_indices = @transform_3, window_bounds = array<i64: 256, 64>}, {pipeline_mode = #tpu.pipeline_mode<synchronous>, transform_indices = @transform_4, window_bounds = array<i64: 1, 64>}, {pipeline_mode = #tpu.pipeline_mode<synchronous>, transform_indices = @transform_5, window_bounds = array<i64: 128, 128>}, {pipeline_mode = #tpu.pipeline_mode<synchronous>, transform_indices = @transform_6, window_bounds = array<i64: 1, 128>}, {pipeline_mode = #tpu.pipeline_mode<synchronous>, transform_indices = @transform_7, window_bounds = array<i64: 128, 1>}, {pipeline_mode = #tpu.pipeline_mode<synchronous>, transform_indices = @transform_8, window_bounds = array<i64: 1, 1>}, {transform_indices = @transform_9, window_bounds = array<i64: 1, 1, 8>}]} {
    %c0 = arith.constant 0 : index
    %c0_0 = arith.constant 0 : index
    %0 = memref.load %arg1[%c0, %c0_0] : memref<2x12xf32, #tpu.memory_space<smem>>
    %c0_1 = arith.constant 0 : index
    %c1 = arith.constant 1 : index
    %1 = memref.load %arg1[%c0_1, %c1] : memref<2x12xf32, #tpu.memory_space<smem>>
    %c0_2 = arith.constant 0 : index
    %c2 = arith.constant 2 : index
    %2 = memref.load %arg1[%c0_2, %c2] : memref<2x12xf32, #tpu.memory_space<smem>>
    %c0_3 = arith.constant 0 : index
    %c3 = arith.constant 3 : index
    %3 = memref.load %arg1[%c0_3, %c3] : memref<2x12xf32, #tpu.memory_space<smem>>
    %c0_4 = arith.constant 0 : index
    %c4 = arith.constant 4 : index
    %4 = memref.load %arg1[%c0_4, %c4] : memref<2x12xf32, #tpu.memory_space<smem>>
    %c0_5 = arith.constant 0 : index
    %c5 = arith.constant 5 : index
    %5 = memref.load %arg1[%c0_5, %c5] : memref<2x12xf32, #tpu.memory_space<smem>>
    %c0_6 = arith.constant 0 : index
    %c0_7 = arith.constant 0 : index
    %c0_8 = arith.constant 0 : index
    %6 = vector.load %arg2[%c0_6, %c0_7, %c0_8] : memref<8x16x256xbf16, #tpu.memory_space<vmem>>, vector<8x12x256xbf16>
    %7 = arith.extf %6 : vector<8x12x256xbf16> to vector<8x12x256xf32>
    %8 = vector.broadcast %0 : f32 to vector<8x12x256xf32>
    %9 = arith.mulf %8, %7 : vector<8x12x256xf32>
    %c0_9 = arith.constant 0 : index
    %c1_10 = arith.constant 1 : index
    %c0_11 = arith.constant 0 : index
    %10 = vector.load %arg2[%c0_9, %c1_10, %c0_11] : memref<8x16x256xbf16, #tpu.memory_space<vmem>>, vector<8x12x256xbf16>
    %11 = arith.extf %10 : vector<8x12x256xbf16> to vector<8x12x256xf32>
    %12 = vector.broadcast %1 : f32 to vector<8x12x256xf32>
    %13 = arith.mulf %12, %11 : vector<8x12x256xf32>
    %14 = arith.addf %9, %13 : vector<8x12x256xf32>
    %c0_12 = arith.constant 0 : index
    %c2_13 = arith.constant 2 : index
    %c0_14 = arith.constant 0 : index
    %15 = vector.load %arg2[%c0_12, %c2_13, %c0_14] : memref<8x16x256xbf16, #tpu.memory_space<vmem>>, vector<8x12x256xbf16>
    %16 = arith.extf %15 : vector<8x12x256xbf16> to vector<8x12x256xf32>
    %17 = vector.broadcast %2 : f32 to vector<8x12x256xf32>
    %18 = arith.mulf %17, %16 : vector<8x12x256xf32>
    %19 = arith.addf %14, %18 : vector<8x12x256xf32>
    %c0_15 = arith.constant 0 : index
    %c3_16 = arith.constant 3 : index
    %c0_17 = arith.constant 0 : index
    %20 = vector.load %arg2[%c0_15, %c3_16, %c0_17] : memref<8x16x256xbf16, #tpu.memory_space<vmem>>, vector<8x12x256xbf16>
    %21 = arith.extf %20 : vector<8x12x256xbf16> to vector<8x12x256xf32>
    %22 = vector.broadcast %3 : f32 to vector<8x12x256xf32>
    %23 = arith.mulf %22, %21 : vector<8x12x256xf32>
    %24 = arith.addf %19, %23 : vector<8x12x256xf32>
    %c0_18 = arith.constant 0 : index
    %c4_19 = arith.constant 4 : index
    %c0_20 = arith.constant 0 : index
    %25 = vector.load %arg2[%c0_18, %c4_19, %c0_20] : memref<8x16x256xbf16, #tpu.memory_space<vmem>>, vector<8x12x256xbf16>
    %26 = arith.extf %25 : vector<8x12x256xbf16> to vector<8x12x256xf32>
    %27 = vector.broadcast %4 : f32 to vector<8x12x256xf32>
    %28 = arith.mulf %27, %26 : vector<8x12x256xf32>
    %29 = arith.addf %24, %28 : vector<8x12x256xf32>
    %30 = vector.broadcast %5 : f32 to vector<8x12x256xf32>
    %31 = arith.addf %29, %30 : vector<8x12x256xf32>
    %cst = arith.constant 0.000000e+00 : f32
    %32 = vector.broadcast %cst : f32 to vector<8x12x256xf32>
    %33 = arith.maximumf %31, %32 : vector<8x12x256xf32>
    %34 = vector.extract_strided_slice %33 {offsets = [0, 0, 0], sizes = [8, 11, 256], strides = [1, 1, 1]} : vector<8x12x256xf32> to vector<8x11x256xf32>
    %35 = vector.extract_strided_slice %33 {offsets = [0, 1, 0], sizes = [8, 11, 256], strides = [1, 1, 1]} : vector<8x12x256xf32> to vector<8x11x256xf32>
    %36 = arith.maximumf %34, %35 : vector<8x11x256xf32>
    %c0_21 = arith.constant 0 : index
    %c0_22 = arith.constant 0 : index
    %c0_23 = arith.constant 0 : index
    %37 = vector.load %arg11[%c0_21, %c0_22, %c0_23] : memref<8x11x256xf32, #tpu.memory_space<vmem>>, vector<8x11x256xf32>
    tpu.vector_store %arg11[%c0_21, %c0_22, %c0_23], %36 {strides = array<i32>} : memref<8x11x256xf32, #tpu.memory_space<vmem>>, vector<8x11x256xf32>,
    %c0_24 = arith.constant 0 : index
    %c6 = arith.constant 6 : index
    %38 = memref.load %arg1[%c0_24, %c6] : memref<2x12xf32, #tpu.memory_space<smem>>
    %c0_25 = arith.constant 0 : index
    %c7 = arith.constant 7 : index
    %39 = memref.load %arg1[%c0_25, %c7] : memref<2x12xf32, #tpu.memory_space<smem>>
    %c0_26 = arith.constant 0 : index
    %c8 = arith.constant 8 : index
    %40 = memref.load %arg1[%c0_26, %c8] : memref<2x12xf32, #tpu.memory_space<smem>>
    %c0_27 = arith.constant 0 : index
    %c9 = arith.constant 9 : index
    %41 = memref.load %arg1[%c0_27, %c9] : memref<2x12xf32, #tpu.memory_space<smem>>
    %c0_28 = arith.constant 0 : index
    %c10 = arith.constant 10 : index
    %42 = memref.load %arg1[%c0_28, %c10] : memref<2x12xf32, #tpu.memory_space<smem>>
    %c0_29 = arith.constant 0 : index
    %c11 = arith.constant 11 : index
    %43 = memref.load %arg1[%c0_29, %c11] : memref<2x12xf32, #tpu.memory_space<smem>>
    %c0_30 = arith.constant 0 : index
    %c0_31 = arith.constant 0 : index
    %c0_32 = arith.constant 0 : index
    %44 = vector.load %arg11[%c0_30, %c0_31, %c0_32] : memref<8x11x256xf32, #tpu.memory_space<vmem>>, vector<8x3x256xf32>
    %45 = vector.broadcast %38 : f32 to vector<8x3x256xf32>
    %46 = arith.mulf %45, %44 : vector<8x3x256xf32>
    %c0_33 = arith.constant 0 : index
    %c2_34 = arith.constant 2 : index
    %c0_35 = arith.constant 0 : index
    %47 = vector.load %arg11[%c0_33, %c2_34, %c0_35] : memref<8x11x256xf32, #tpu.memory_space<vmem>>, vector<8x3x256xf32>
    %48 = vector.broadcast %39 : f32 to vector<8x3x256xf32>
    %49 = arith.mulf %48, %47 : vector<8x3x256xf32>
    %50 = arith.addf %46, %49 : vector<8x3x256xf32>
    %c0_36 = arith.constant 0 : index
    %c4_37 = arith.constant 4 : index
    %c0_38 = arith.constant 0 : index
    %51 = vector.load %arg11[%c0_36, %c4_37, %c0_38] : memref<8x11x256xf32, #tpu.memory_space<vmem>>, vector<8x3x256xf32>
    %52 = vector.broadcast %40 : f32 to vector<8x3x256xf32>
    %53 = arith.mulf %52, %51 : vector<8x3x256xf32>
    %54 = arith.addf %50, %53 : vector<8x3x256xf32>
    %c0_39 = arith.constant 0 : index
    %c6_40 = arith.constant 6 : index
    %c0_41 = arith.constant 0 : index
    %55 = vector.load %arg11[%c0_39, %c6_40, %c0_41] : memref<8x11x256xf32, #tpu.memory_space<vmem>>, vector<8x3x256xf32>
    %56 = vector.broadcast %41 : f32 to vector<8x3x256xf32>
    %57 = arith.mulf %56, %55 : vector<8x3x256xf32>
    %58 = arith.addf %54, %57 : vector<8x3x256xf32>
    %c0_42 = arith.constant 0 : index
    %c8_43 = arith.constant 8 : index
    %c0_44 = arith.constant 0 : index
    %59 = vector.load %arg11[%c0_42, %c8_43, %c0_44] : memref<8x11x256xf32, #tpu.memory_space<vmem>>, vector<8x3x256xf32>
    %60 = vector.broadcast %42 : f32 to vector<8x3x256xf32>
    %61 = arith.mulf %60, %59 : vector<8x3x256xf32>
    %62 = arith.addf %58, %61 : vector<8x3x256xf32>
    %63 = vector.broadcast %43 : f32 to vector<8x3x256xf32>
    %64 = arith.addf %62, %63 : vector<8x3x256xf32>
    %cst_45 = arith.constant 0.000000e+00 : f32
    %65 = vector.broadcast %cst_45 : f32 to vector<8x3x256xf32>
    %66 = arith.maximumf %64, %65 : vector<8x3x256xf32>
    %67 = tpu.iota {dimensions = array<i32: 1>} : vector<1x3x256xi32>
    %c1_i32 = arith.constant 1 : i32
    %68 = vector.broadcast %c1_i32 : i32 to vector<1x3x256xi32>
    %69 = arith.andi %67, %68 : vector<1x3x256xi32>
    %c0_i32 = arith.constant 0 : i32
    %70 = vector.broadcast %c0_i32 : i32 to vector<1x3x256xi32>
    %71 = arith.cmpi eq, %69, %70 : vector<1x3x256xi32>
    %cst_46 = arith.constant 0.000000e+00 : f32
    %72 = vector.shape_cast %71 : vector<1x3x256xi1> to vector<1x3x256xi1>
    %73 = vector.broadcast %72 : vector<1x3x256xi1> to vector<8x3x256xi1>
    %74 = vector.broadcast %cst_46 : f32 to vector<8x3x256xf32>
    %75 = arith.select %73, %66, %74 : vector<8x3x256xi1>, vector<8x3x256xf32>
    %cst_47 = arith.constant dense<0xFF800000> : vector<8x256xf32>
    %76 = vector.multi_reduction <maximumf>, %75, %cst_47 [1] : vector<8x3x256xf32> to vector<8x256xf32>
    %c1_48 = arith.constant 1 : index
    %c0_49 = arith.constant 0 : index
    %77 = memref.load %arg1[%c1_48, %c0_49] : memref<2x12xf32, #tpu.memory_space<smem>>
    %c1_50 = arith.constant 1 : index
    %c1_51 = arith.constant 1 : index
    %78 = memref.load %arg1[%c1_50, %c1_51] : memref<2x12xf32, #tpu.memory_space<smem>>
    %c1_52 = arith.constant 1 : index
    %c2_53 = arith.constant 2 : index
    %79 = memref.load %arg1[%c1_52, %c2_53] : memref<2x12xf32, #tpu.memory_space<smem>>
    %c1_54 = arith.constant 1 : index
    %c3_55 = arith.constant 3 : index
    %80 = memref.load %arg1[%c1_54, %c3_55] : memref<2x12xf32, #tpu.memory_space<smem>>
    %c1_56 = arith.constant 1 : index
    %c4_57 = arith.constant 4 : index
    %81 = memref.load %arg1[%c1_56, %c4_57] : memref<2x12xf32, #tpu.memory_space<smem>>
    %c1_58 = arith.constant 1 : index
    %c5_59 = arith.constant 5 : index
    %82 = memref.load %arg1[%c1_58, %c5_59] : memref<2x12xf32, #tpu.memory_space<smem>>
    %c0_60 = arith.constant 0 : index
    %c0_61 = arith.constant 0 : index
    %c0_62 = arith.constant 0 : index
    %83 = vector.load %arg3[%c0_60, %c0_61, %c0_62] : memref<8x20x256xbf16, #tpu.memory_space<vmem>>, vector<8x16x256xbf16>
    %84 = arith.extf %83 : vector<8x16x256xbf16> to vector<8x16x256xf32>
    %85 = vector.broadcast %77 : f32 to vector<8x16x256xf32>
    %86 = arith.mulf %85, %84 : vector<8x16x256xf32>
    %c0_63 = arith.constant 0 : index
    %c1_64 = arith.constant 1 : index
    %c0_65 = arith.constant 0 : index
    %87 = vector.load %arg3[%c0_63, %c1_64, %c0_65] : memref<8x20x256xbf16, #tpu.memory_space<vmem>>, vector<8x16x256xbf16>
    %88 = arith.extf %87 : vector<8x16x256xbf16> to vector<8x16x256xf32>
    %89 = vector.broadcast %78 : f32 to vector<8x16x256xf32>
    %90 = arith.mulf %89, %88 : vector<8x16x256xf32>
    %91 = arith.addf %86, %90 : vector<8x16x256xf32>
    %c0_66 = arith.constant 0 : index
    %c2_67 = arith.constant 2 : index
    %c0_68 = arith.constant 0 : index
    %92 = vector.load %arg3[%c0_66, %c2_67, %c0_68] : memref<8x20x256xbf16, #tpu.memory_space<vmem>>, vector<8x16x256xbf16>
    %93 = arith.extf %92 : vector<8x16x256xbf16> to vector<8x16x256xf32>
    %94 = vector.broadcast %79 : f32 to vector<8x16x256xf32>
    %95 = arith.mulf %94, %93 : vector<8x16x256xf32>
    %96 = arith.addf %91, %95 : vector<8x16x256xf32>
    %c0_69 = arith.constant 0 : index
    %c3_70 = arith.constant 3 : index
    %c0_71 = arith.constant 0 : index
    %97 = vector.load %arg3[%c0_69, %c3_70, %c0_71] : memref<8x20x256xbf16, #tpu.memory_space<vmem>>, vector<8x16x256xbf16>
    %98 = arith.extf %97 : vector<8x16x256xbf16> to vector<8x16x256xf32>
    %99 = vector.broadcast %80 : f32 to vector<8x16x256xf32>
    %100 = arith.mulf %99, %98 : vector<8x16x256xf32>
    %101 = arith.addf %96, %100 : vector<8x16x256xf32>
    %c0_72 = arith.constant 0 : index
    %c4_73 = arith.constant 4 : index
    %c0_74 = arith.constant 0 : index
    %102 = vector.load %arg3[%c0_72, %c4_73, %c0_74] : memref<8x20x256xbf16, #tpu.memory_space<vmem>>, vector<8x16x256xbf16>
    %103 = arith.extf %102 : vector<8x16x256xbf16> to vector<8x16x256xf32>
    %104 = vector.broadcast %81 : f32 to vector<8x16x256xf32>
    %105 = arith.mulf %104, %103 : vector<8x16x256xf32>
    %106 = arith.addf %101, %105 : vector<8x16x256xf32>
    %107 = vector.broadcast %82 : f32 to vector<8x16x256xf32>
    %108 = arith.addf %106, %107 : vector<8x16x256xf32>
    %cst_75 = arith.constant 0.000000e+00 : f32
    %109 = vector.broadcast %cst_75 : f32 to vector<8x16x256xf32>
    %110 = arith.maximumf %108, %109 : vector<8x16x256xf32>
    %111 = vector.extract_strided_slice %110 {offsets = [0, 0, 0], sizes = [8, 15, 256], strides = [1, 1, 1]} : vector<8x16x256xf32> to vector<8x15x256xf32>
    %112 = vector.extract_strided_slice %110 {offsets = [0, 1, 0], sizes = [8, 15, 256], strides = [1, 1, 1]} : vector<8x16x256xf32> to vector<8x15x256xf32>
    %113 = arith.maximumf %111, %112 : vector<8x15x256xf32>
    %c0_76 = arith.constant 0 : index
    %c0_77 = arith.constant 0 : index
    %c0_78 = arith.constant 0 : index
    %114 = vector.load %arg12[%c0_76, %c0_77, %c0_78] : memref<8x15x256xf32, #tpu.memory_space<vmem>>, vector<8x15x256xf32>
    tpu.vector_store %arg12[%c0_76, %c0_77, %c0_78], %113 {strides = array<i32>} : memref<8x15x256xf32, #tpu.memory_space<vmem>>, vector<8x15x256xf32>,
    %c1_79 = arith.constant 1 : index
    %c6_80 = arith.constant 6 : index
    %115 = memref.load %arg1[%c1_79, %c6_80] : memref<2x12xf32, #tpu.memory_space<smem>>
    %c1_81 = arith.constant 1 : index
    %c7_82 = arith.constant 7 : index
    %116 = memref.load %arg1[%c1_81, %c7_82] : memref<2x12xf32, #tpu.memory_space<smem>>
    %c1_83 = arith.constant 1 : index
    %c8_84 = arith.constant 8 : index
    %117 = memref.load %arg1[%c1_83, %c8_84] : memref<2x12xf32, #tpu.memory_space<smem>>
    %c1_85 = arith.constant 1 : index
    %c9_86 = arith.constant 9 : index
    %118 = memref.load %arg1[%c1_85, %c9_86] : memref<2x12xf32, #tpu.memory_space<smem>>
    %c1_87 = arith.constant 1 : index
    %c10_88 = arith.constant 10 : index
    %119 = memref.load %arg1[%c1_87, %c10_88] : memref<2x12xf32, #tpu.memory_space<smem>>
    %c1_89 = arith.constant 1 : index
    %c11_90 = arith.constant 11 : index
    %120 = memref.load %arg1[%c1_89, %c11_90] : memref<2x12xf32, #tpu.memory_space<smem>>
    %c0_91 = arith.constant 0 : index
    %c0_92 = arith.constant 0 : index
    %c0_93 = arith.constant 0 : index
    %121 = vector.load %arg12[%c0_91, %c0_92, %c0_93] : memref<8x15x256xf32, #tpu.memory_space<vmem>>, vector<8x7x256xf32>
    %122 = vector.broadcast %115 : f32 to vector<8x7x256xf32>
    %123 = arith.mulf %122, %121 : vector<8x7x256xf32>
    %c0_94 = arith.constant 0 : index
    %c2_95 = arith.constant 2 : index
    %c0_96 = arith.constant 0 : index
    %124 = vector.load %arg12[%c0_94, %c2_95, %c0_96] : memref<8x15x256xf32, #tpu.memory_space<vmem>>, vector<8x7x256xf32>
    %125 = vector.broadcast %116 : f32 to vector<8x7x256xf32>
    %126 = arith.mulf %125, %124 : vector<8x7x256xf32>
    %127 = arith.addf %123, %126 : vector<8x7x256xf32>
    %c0_97 = arith.constant 0 : index
    %c4_98 = arith.constant 4 : index
    %c0_99 = arith.constant 0 : index
    %128 = vector.load %arg12[%c0_97, %c4_98, %c0_99] : memref<8x15x256xf32, #tpu.memory_space<vmem>>, vector<8x7x256xf32>
    %129 = vector.broadcast %117 : f32 to vector<8x7x256xf32>
    %130 = arith.mulf %129, %128 : vector<8x7x256xf32>
    %131 = arith.addf %127, %130 : vector<8x7x256xf32>
    %c0_100 = arith.constant 0 : index
    %c6_101 = arith.constant 6 : index
    %c0_102 = arith.constant 0 : index
    %132 = vector.load %arg12[%c0_100, %c6_101, %c0_102] : memref<8x15x256xf32, #tpu.memory_space<vmem>>, vector<8x7x256xf32>
    %133 = vector.broadcast %118 : f32 to vector<8x7x256xf32>
    %134 = arith.mulf %133, %132 : vector<8x7x256xf32>
    %135 = arith.addf %131, %134 : vector<8x7x256xf32>
    %c0_103 = arith.constant 0 : index
    %c8_104 = arith.constant 8 : index
    %c0_105 = arith.constant 0 : index
    %136 = vector.load %arg12[%c0_103, %c8_104, %c0_105] : memref<8x15x256xf32, #tpu.memory_space<vmem>>, vector<8x7x256xf32>
    %137 = vector.broadcast %119 : f32 to vector<8x7x256xf32>
    %138 = arith.mulf %137, %136 : vector<8x7x256xf32>
    %139 = arith.addf %135, %138 : vector<8x7x256xf32>
    %140 = vector.broadcast %120 : f32 to vector<8x7x256xf32>
    %141 = arith.addf %139, %140 : vector<8x7x256xf32>
    %cst_106 = arith.constant 0.000000e+00 : f32
    %142 = vector.broadcast %cst_106 : f32 to vector<8x7x256xf32>
    %143 = arith.maximumf %141, %142 : vector<8x7x256xf32>
    %144 = tpu.iota {dimensions = array<i32: 1>} : vector<1x7x256xi32>
    %c1_i32_107 = arith.constant 1 : i32
    %145 = vector.broadcast %c1_i32_107 : i32 to vector<1x7x256xi32>
    %146 = arith.andi %144, %145 : vector<1x7x256xi32>
    %c0_i32_108 = arith.constant 0 : i32
    %147 = vector.broadcast %c0_i32_108 : i32 to vector<1x7x256xi32>
    %148 = arith.cmpi eq, %146, %147 : vector<1x7x256xi32>
    %cst_109 = arith.constant 0.000000e+00 : f32
    %149 = vector.shape_cast %148 : vector<1x7x256xi1> to vector<1x7x256xi1>
    %150 = vector.broadcast %149 : vector<1x7x256xi1> to vector<8x7x256xi1>
    %151 = vector.broadcast %cst_109 : f32 to vector<8x7x256xf32>
    %152 = arith.select %150, %143, %151 : vector<8x7x256xi1>, vector<8x7x256xf32>
    %cst_110 = arith.constant dense<0xFF800000> : vector<8x256xf32>
    %153 = vector.multi_reduction <maximumf>, %152, %cst_110 [1] : vector<8x7x256xf32> to vector<8x256xf32>
    %154 = tpu.concatenate %153, %76 in 0 : vector<8x256xf32>, vector<8x256xf32> -> vector<16x256xf32>
    %c0_111 = arith.constant 0 : index
    %c0_112 = arith.constant 0 : index
    %155 = vector.load %arg4[%c0_111, %c0_112] : memref<256x64xf32, #tpu.memory_space<vmem>>, vector<256x64xf32>
    %cst_113 = arith.constant dense<0.000000e+00> : vector<16x64xf32>
    %156 = tpu.matmul %154, %155, %cst_113 {dimension_numbers = #tpu.dot_dimension_numbers<[1], [0], [0], [1], [0, 0, 1, 1], [], []>} : vector<16x256xf32>, vector<256x64xf32>, vector<16x64xf32> -> vector<16x64xf32>
    %c0_114 = arith.constant 0 : index
    %c0_115 = arith.constant 0 : index
    %157 = vector.load %arg5[%c0_114, %c0_115] : memref<1x64xf32, #tpu.memory_space<vmem>>, vector<1x64xf32>
    %158 = vector.broadcast %157 : vector<1x64xf32> to vector<16x64xf32>
    %159 = arith.addf %156, %158 : vector<16x64xf32>
    %160 = vector.extract_strided_slice %159 {offsets = [0, 0], sizes = [8, 64], strides = [1, 1]} : vector<16x64xf32> to vector<8x64xf32>
    %161 = vector.extract_strided_slice %159 {offsets = [8, 0], sizes = [8, 64], strides = [1, 1]} : vector<16x64xf32> to vector<8x64xf32>
    %162 = tpu.concatenate %160, %161 in 1 : vector<8x64xf32>, vector<8x64xf32> -> vector<8x128xf32>
    %c0_116 = arith.constant 0 : index
    %c0_117 = arith.constant 0 : index
    %163 = vector.load %arg6[%c0_116, %c0_117] : memref<128x128xf32, #tpu.memory_space<vmem>>, vector<128x128xf32>
    %cst_118 = arith.constant dense<0.000000e+00> : vector<8x128xf32>
    %164 = tpu.matmul %162, %163, %cst_118 {dimension_numbers = #tpu.dot_dimension_numbers<[1], [0], [0], [1], [0, 0, 1, 1], [], []>} : vector<8x128xf32>, vector<128x128xf32>, vector<8x128xf32> -> vector<8x128xf32>
    %c0_119 = arith.constant 0 : index
    %c0_120 = arith.constant 0 : index
    %165 = vector.load %arg7[%c0_119, %c0_120] : memref<1x128xf32, #tpu.memory_space<vmem>>, vector<1x128xf32>
    %166 = vector.broadcast %165 : vector<1x128xf32> to vector<8x128xf32>
    %167 = arith.addf %164, %166 : vector<8x128xf32>
    %cst_121 = arith.constant 0.000000e+00 : f32
    %168 = vector.broadcast %cst_121 : f32 to vector<8x128xf32>
    %169 = arith.maximumf %167, %168 : vector<8x128xf32>
    %c0_122 = arith.constant 0 : index
    %c0_123 = arith.constant 0 : index
    %170 = vector.load %arg8[%c0_122, %c0_123] : memref<128x1xf32, #tpu.memory_space<vmem>>, vector<128x1xf32>
    %cst_124 = arith.constant dense<0.000000e+00> : vector<8x1xf32>
    %171 = tpu.matmul %169, %170, %cst_124 {dimension_numbers = #tpu.dot_dimension_numbers<[1], [0], [0], [1], [0, 0, 1, 1], [], []>} : vector<8x128xf32>, vector<128x1xf32>, vector<8x1xf32> -> vector<8x1xf32>
    %c0_125 = arith.constant 0 : index
    %c0_126 = arith.constant 0 : index
    %172 = vector.load %arg9[%c0_125, %c0_126] : memref<1x1xf32, #tpu.memory_space<vmem>>, vector<1x1xf32>
    %173 = vector.broadcast %172 : vector<1x1xf32> to vector<8x1xf32>
    %174 = arith.addf %171, %173 : vector<8x1xf32>
    %175 = arith.negf %174 : vector<8x1xf32>
    %176 = math.exp %175 : vector<8x1xf32>
    %cst_127 = arith.constant 1.000000e+00 : f32
    %177 = vector.broadcast %cst_127 : f32 to vector<8x1xf32>
    %178 = arith.addf %177, %176 : vector<8x1xf32>
    %179 = arith.divf %177, %178 : vector<8x1xf32>
    %180 = tpu.iota {dimensions = array<i32: 0>} : vector<8x8xi32>
    %181 = tpu.iota {dimensions = array<i32: 1>} : vector<8x8xi32>
    %182 = arith.cmpi eq, %180, %181 : vector<8x8xi32>
    %cst_128 = arith.constant 0.000000e+00 : f32
    %183 = vector.shape_cast %179 : vector<8x1xf32> to vector<8x1xf32>
    %184 = vector.broadcast %183 : vector<8x1xf32> to vector<8x8xf32>
    %185 = vector.broadcast %cst_128 : f32 to vector<8x8xf32>
    %186 = arith.select %182, %184, %185 : vector<8x8xi1>, vector<8x8xf32>
    %cst_129 = arith.constant dense<0.000000e+00> : vector<8xf32>
    %187 = vector.multi_reduction <add>, %186, %cst_129 [0] : vector<8x8xf32> to vector<8xf32>
    %188 = vector.shape_cast %187 : vector<8xf32> to vector<1x8xf32>
    %c0_130 = arith.constant 0 : index
    %c0_131 = arith.constant 0 : index
    %c0_132 = arith.constant 0 : index
    %189 = vector.load %arg10[%c0_130, %c0_131, %c0_132] : memref<1x1x8xf32, #tpu.memory_space<vmem>>, vector<1x1x8xf32>
    %190 = vector.shape_cast %189 : vector<1x1x8xf32> to vector<1x8xf32>
    %191 = vector.shape_cast %188 : vector<1x8xf32> to vector<1x1x8xf32>
    tpu.vector_store %arg10[%c0_130, %c0_131, %c0_132], %191 {strides = array<i32>} : memref<1x1x8xf32, #tpu.memory_space<vmem>>, vector<1x1x8xf32>,
    return
  }
  func.func @transform_0(%arg0: i32) -> (i32, i32) {
    %c0_i32 = arith.constant 0 : i32
    %c0_i32_0 = arith.constant 0 : i32
    %c0_i32_1 = arith.constant 0 : i32
    return %c0_i32, %c0_i32_0 : i32, i32
  }
  func.func @transform_1(%arg0: i32) -> (i32, i32, i32) {
    %c0_i32 = arith.constant 0 : i32
    %c0_i32_0 = arith.constant 0 : i32
    %c0_i32_1 = arith.constant 0 : i32
    return %arg0, %c0_i32, %c0_i32_0 : i32, i32, i32
  }
  func.func @transform_2(%arg0: i32) -> (i32, i32, i32) {
    %c0_i32 = arith.constant 0 : i32
    %c0_i32_0 = arith.constant 0 : i32
    %c0_i32_1 = arith.constant 0 : i32
    return %arg0, %c0_i32, %c0_i32_0 : i32, i32, i32
  }
  func.func @transform_3(%arg0: i32) -> (i32, i32) {
    %c0_i32 = arith.constant 0 : i32
    %c0_i32_0 = arith.constant 0 : i32
    %c0_i32_1 = arith.constant 0 : i32
    return %c0_i32, %c0_i32_0 : i32, i32
  }
  func.func @transform_4(%arg0: i32) -> (i32, i32) {
    %c0_i32 = arith.constant 0 : i32
    %c0_i32_0 = arith.constant 0 : i32
    %c0_i32_1 = arith.constant 0 : i32
    return %c0_i32, %c0_i32_0 : i32, i32
  }
  func.func @transform_5(%arg0: i32) -> (i32, i32) {
    %c0_i32 = arith.constant 0 : i32
    %c0_i32_0 = arith.constant 0 : i32
    %c0_i32_1 = arith.constant 0 : i32
    return %c0_i32, %c0_i32_0 : i32, i32
  }
  func.func @transform_6(%arg0: i32) -> (i32, i32) {
    %c0_i32 = arith.constant 0 : i32
    %c0_i32_0 = arith.constant 0 : i32
    %c0_i32_1 = arith.constant 0 : i32
    return %c0_i32, %c0_i32_0 : i32, i32
  }
  func.func @transform_7(%arg0: i32) -> (i32, i32) {
    %c0_i32 = arith.constant 0 : i32
    %c0_i32_0 = arith.constant 0 : i32
    %c0_i32_1 = arith.constant 0 : i32
    return %c0_i32, %c0_i32_0 : i32, i32
  }
  func.func @transform_8(%arg0: i32) -> (i32, i32) {
    %c0_i32 = arith.constant 0 : i32
    %c0_i32_0 = arith.constant 0 : i32
    %c0_i32_1 = arith.constant 0 : i32
    return %c0_i32, %c0_i32_0 : i32, i32
  }
  func.func @transform_9(%arg0: i32) -> (i32, i32, i32) {
    %c0_i32 = arith.constant 0 : i32
    %c0_i32_0 = arith.constant 0 : i32
    %c0_i32_1 = arith.constant 0 : i32
    return %arg0, %c0_i32, %c0_i32_0 : i32, i32, i32
  }
}

</mosaic_0001>

<bundles_post_ra>
// kernel: tpu_custom_call.1
= control target key start
LH: loop header
LB: loop body
LE: loop exit
PB: predicated region body
PF: predicated region fallthrough
CT: control target
= control target key end

     0   :  { %s8889_s0 = inlined_call_operand.vmem [shape: f32[2,12], index: 0, kind: input, shape index: {}]   ;;  %s8890_s1 = inlined_call_operand.vmem [shape: bf16[8,16,256], index: 1, kind: input, shape index: {}]   ;;  %s8891_s2 = inlined_call_operand.vmem [shape: bf16[8,20,256], index: 2, kind: input, shape index: {}]   ;;  %s8892_s3 = inlined_call_operand.vmem [shape: f32[256,64], index: 3, kind: input, shape index: {}]   ;;  %s8893_s4 = inlined_call_operand.vmem [shape: f32[1,64], index: 4, kind: input, shape index: {}]   ;;  %s8894_s5 = inlined_call_operand.vmem [shape: f32[128,128], index: 5, kind: input, shape index: {}]   ;;  %s8895_s6 = inlined_call_operand.vmem [shape: f32[1,128], index: 6, kind: input, shape index: {}]   ;;  %s8896_s7 = inlined_call_operand.vmem [shape: f32[128,1], index: 7, kind: input, shape index: {}]   ;;  %s8897_s8 = inlined_call_operand.<no memory space> [shape: f32[1,1], index: 8, kind: input, shape index: {}]   ;;  %s8898_s9 = inlined_call_operand.hbm [shape: f32[1,1,8], index: 9, kind: output, shape index: {}]  }
   0x1   :  { %v14_v0 = vstv %s8897_s8 }
   0x2   :  { %15 = vst [vmem:[#allocation4] sm:$0x1] %v14_v0 }
   0x3   :  { %16 = vsyncpa [#allocation7], 0 }
   0x4   :  { %17 = vsyncpa [#allocation6], 0  ;;  %s24_s13 = sshll.u32 %s8889_s0, 4  ;;  %s25_s13 = int_to_ptr.vmem [resolvable:$true] %s24_s13 }
   0x5   :  { %s4674_s14 = scalar_lea.vmem %s25_s13, 32  ;;  %p4679_p1 = scmp.lt.s32.totalorder %s25_s13, %s25_s13 }
   0x6   :  { %p4675_p0 = scmp.ne.s32.totalorder %s25_s13, %s4674_s14  ;;  %p4680_p2 = scmp.lt.s32.totalorder %s4674_s14, %s4674_s14 }
   0x8   :  { %p4681_p3 = por %p4680_p2, %p4679_p1 }
   0xa   :  { %p4682_p4 = pnand %p4681_p3, %p4675_p0 }
   0xc   :  { %4685 = shalt.err (!%p4682_p4)
}
   0xd   :  { %s4710_s15 = smov [#allocation5]  }
   0xe   :  { %27 = dma.vmem_to_smem %s25_s13, 32, %s4710_s15, [#allocation7]  }
   0xf   :  { %4706 = dma.done.wait [#allocation7], 32  }
  0x10   :  { %4707 = vsyncadd [#allocation7], 4294967264 }
  0x11   :  { %47 = sfence }
  0x12   :  { %v4082_v1 = vld [vmem:[%s8892_s3 + $0xf8] sm:$0xff]  ;;  %v4081_v3 = vld [vmem:[%s8892_s3 + $0xf0] sm:$0xff]  ;;  %v4080_v5 = vld [vmem:[%s8892_s3 + $0xe8] sm:$0xff]  ;;  %s4409_s24 = sld [smem:[#allocation5 + $0x80]]  ;;  %v8899_v12 = vlaneseq  ;;  %vm224_vm0 = vcmask 1046528   ;;  %vm426_vm1 = vcmask 1045504  }
  0x13   :  { %v4066_v2 = vld [vmem:[%s8892_s3 + $0x78] sm:$0xff]  ;;  %4425 = vmatprep.subr.mxu0 %v4082_v1  ;;  %v4065_v4 = vld [vmem:[%s8892_s3 + $0x70] sm:$0xff]  ;;  %v4064_v6 = vld [vmem:[%s8892_s3 + $0x68] sm:$0xff]  ;;  %s4410_s27 = sld [smem:[#allocation5 + $0x81]]  ;;  %vm628_vm2 = vcmask 1044480   ;;  %vm830_vm3 = vcmask 1043456  }
  0x14   :  { %4426 = vmatpush3.msra.mxu0 %v4066_v2  ;;  %v4079_v7 = vld [vmem:[%s8892_s3 + $0xe0] sm:$0xff]  ;;  %s4411_s30 = sld [smem:[#allocation5 + $0x82]]  ;;  %v4078_v9 = vld [vmem:[%s8892_s3 + $0xd8] sm:$0xff]  ;;  %v4077_v11 = vld [vmem:[%s8892_s3 + $0xd0] sm:$0xff]  ;;  %v4850_v26 = vshrl.u32 %v8899_v12, 7  ;;  %vm1514_vm4 = vcmask 1041408  }
  0x15   :  { %4427 = vmatprep.subr.mxu0 %v4081_v3  ;;  %v4063_v8 = vld [vmem:[%s8892_s3 + $0x60] sm:$0xff]  ;;  %s4796_s12 = sld [smem:[#allocation5 + $0x83]]  ;;  %v4062_v10 = vld [vmem:[%s8892_s3 + $0x58] sm:$0xff]  ;;  %v4061_v13 = vld [vmem:[%s8892_s3 + $0x50] sm:$0xff]  ;;  %vm3996_vm6 = vcmask 1041409   ;;  %vm3998_vm7 = vcmask 1042434  }
  0x16   :  { %4428 = vmatpush3.msra.mxu0 %v4065_v4  ;;  %s4801_s15 = sld [smem:[#allocation5 + $0x84]]  ;;  %v4076_v14 = vld [vmem:[%s8892_s3 + $0xc8] sm:$0xff]  ;;  %v4075_v16 = vld [vmem:[%s8892_s3 + $0xc0] sm:$0xff]  ;;  %v4839_v22 = vld [vmem:[%s8891_s2 + $0x18] sm:$0xff]  ;;  %9060 = vst [vmem:[#allocation14_spill] sm:$0xff] %v4850_v26  ;;  %vm4000_vm8 = vcmask 1043459  }
  0x17   :  { %4429 = vmatprep.subr.mxu0 %v4080_v5  ;;  %v4060_v15 = vld [vmem:[%s8892_s3 + $0x48] sm:$0xff]  ;;  %v4824_v17 = vld [vmem:[%s8891_s2] sm:$0xff]  ;;  %v4074_v25 = vld [vmem:[%s8892_s3 + $0xb8] sm:$0xff]  ;;  %v1839_v37 = vunpack.c.h.bf16 %v4839_v22  ;;  %s5733_s19 = sld [smem:[#allocation5 + $0x86]]  ;;  %vm4002_vm9 = vcmask 1044484   ;;  %vm4004_vm10 = vcmask 1045509  }
  0x18   :  { %4430 = vmatpush3.msra.mxu0 %v4064_v6  ;;  %v4826_v18 = vstv %s4409_s24  ;;  %v4059_v20 = vld [vmem:[%s8892_s3 + $0x40] sm:$0xff]  ;;  %v1819_v21 = vld [vmem:[%s8891_s2 + $0x8] sm:$0xff]  ;;  %v4855_v27 = vld [vmem:[%s8891_s2 + $0x30] sm:$0xff]  ;;  %v1835_v30 = vunpack.c.h.bf16 %v4824_v17  ;;  %s5735_s20 = sld [smem:[#allocation5 + $0x87]]  ;;  %vm4006_vm11 = vcmask 1046534   ;;  %vm4008_vm12 = vcmask 1047559  }
  0x19   :  { %4431 = vmatprep.subr.mxu0 %v4079_v7  ;;  %9057 = vst [vmem:[#allocation11_spill] sm:$0xff] %v4826_v18  ;;  %v4828_v19 = vstv %s4410_s27  ;;  %v1821_v23 = vld [vmem:[%s8891_s2 + $0x20] sm:$0xff]  ;;  %v1823_v28 = vld [vmem:[%s8891_s2 + $0x38] sm:$0xff]  ;;  %v4863_v29 = vld [vmem:[%s8891_s2 + $0x48] sm:$0xff]  ;;  %v4866_v31 = vunpack.c.h.bf16 %v1819_v21  ;;  %v1843_v39 = vunpack.c.h.bf16 %v4855_v27  ;;  %v4951_v61 = vmul.f32 %v4826_v18, %v1839_v37  ;;  %s5737_s21 = sld [smem:[#allocation5 + $0x88]] }
  0x1a   :  { %4432 = vmatpush3.msra.mxu0 %v4063_v8  ;;  %9058 = vst [vmem:[#allocation12_spill] sm:$0xff] %v4828_v19  ;;  %v4844_v24 = vstv %s4411_s30  ;;  %v4058_v33 = vld [vmem:[%s8892_s3 + $0x38] sm:$0xff]  ;;  %v1825_v34 = vld [vmem:[%s8891_s2 + $0x50] sm:$0xff]  ;;  %v4880_v35 = vld [vmem:[%s8891_s2 + $0x60] sm:$0xff]  ;;  %v4886_v38 = vunpack.c.h.bf16 %v1821_v23  ;;  %v4905_v44 = vunpack.c.h.bf16 %v1823_v28  ;;  %v1847_v45 = vunpack.c.h.bf16 %v4863_v29  ;;  %s5741_s30 = sld [smem:[#allocation5 + $0x89]] }
  0x1b   :  { %4433 = vmatprep.subr.mxu0 %v4078_v9  ;;  %9059 = vst [vmem:[#allocation13_spill] sm:$0xff] %v4844_v24  ;;  %v4869_v32 = vstv %s4796_s12  ;;  %v1827_v36 = vld [vmem:[%s8891_s2 + $0x68] sm:$0xff]  ;;  %v4895_v41 = vld [vmem:[%s8891_s2 + $0x78] sm:$0xff]  ;;  %v1829_v42 = vld [vmem:[%s8891_s2 + $0x80] sm:$0xff]  ;;  %v4908_v46 = vunpack.c.h.bf16 %v1825_v34  ;;  %v4913_v47 = vmul.f32 %v4826_v18, %v1835_v30  ;;  %v1851_v51 = vunpack.c.h.bf16 %v4880_v35  ;;  %s5745_s22 = sld [smem:[#allocation5 + $0x8a]] }
  0x1c   :  { %4434 = vmatpush3.msra.mxu0 %v4062_v10  ;;  %9061 = vst [vmem:[#allocation15_spill] sm:$0xff] %v4869_v32  ;;  %v4890_v40 = vstv %s4801_s15  ;;  %v4903_v43 = vld [vmem:[%s8891_s2 + $0x90] sm:$0xff]  ;;  %v1831_v48 = vld [vmem:[%s8891_s2 + $0x98] sm:$0xff]  ;;  %v4921_v49 = vld [vmem:[%s8891_s2 + $0xa8] sm:$0xff]  ;;  %v4927_v52 = vunpack.c.h.bf16 %v1827_v36  ;;  %v8902_v53 = vunpack.c.h.bf16 %v4895_v41  ;;  %v4932_v54 = vmul.f32 %v4826_v18, %v4866_v31  ;;  %s5748_s23 = sld [smem:[#allocation5 + $0x8b]] }
  0x1d   :  { %4435 = vmatprep.subr.mxu0 %v4077_v11  ;;  %9062 = vst [vmem:[#allocation16_spill] sm:$0xff] %v4890_v40  ;;  %9063 = vst [vmem:[#allocation17_spill] sm:$0xff] %v4908_v46  ;;  %v1833_v50 = vld [vmem:[%s8891_s2 + $0xb0] sm:$0xff]  ;;  %v4072_v57 = vld [vmem:[%s8892_s3 + $0xa8] sm:$0xff]  ;;  %v4943_v58 = vunpack.c.h.bf16 %v1829_v42  ;;  %v8900_v59 = vunpack.c.h.bf16 %v4903_v43  ;;  %v4946_v60 = vunpack.c.h.bf16 %v1831_v48  ;;  %v8901_v62 = vunpack.c.h.bf16 %v4921_v49  ;;  %s7282_s25 = sld [smem:[#allocation5 + $0x2]] }
  0x1e   :  { %4436 = vmatpush3.msra.mxu0 %v4061_v13  ;;  %9064 = vst [vmem:[#allocation18_spill] sm:$0xff] %v4927_v52  ;;  %v4073_v55 = vld [vmem:[%s8892_s3 + $0xb0] sm:$0xff]  ;;  %v4954_v63 = vunpack.c.h.bf16 %v1833_v50  ;;  %v4958_v0 = vmul.f32 %v4826_v18, %v4886_v38  ;;  %v4963_v1 = vmul.f32 %v4826_v18, %v1843_v39  ;;  %v4973_v3 = vld [vmem:[%s8891_s2 + $0x28] sm:$0x11]  ;;  %v4978_v4 = vld [vmem:[%s8891_s2 + $0x40] sm:$0x11]  ;;  %v4985_v6 = vmul.f32 %v4826_v18, %v4905_v44 }
  0x1f   :  { %4437 = vmatprep.subr.mxu0 %v4076_v14  ;;  %v4057_v56 = vld [vmem:[%s8892_s3 + $0x30] sm:$0xff]  ;;  %9065 = vst [vmem:[#allocation19_spill] sm:$0xff] %v4943_v58  ;;  %9066 = vst [vmem:[#allocation20_spill] sm:$0xff] %v4946_v60  ;;  %v4056_v5 = vld [vmem:[%s8892_s3 + $0x28] sm:$0xff]  ;;  %v4990_v7 = vmul.f32 %v4826_v18, %v1847_v45  ;;  %v4994_v8 = vmul.f32 %v4826_v18, %v4908_v46  ;;  %v4999_v9 = vmul.f32 %v4826_v18, %v1851_v51  ;;  %s7599_s17 = sld [smem:[#allocation5 + $0x4]]  ;;  %vm1699_vm13 = vcmask 1042432  }
  0x20   :  { %4438 = vmatpush3.msra.mxu0 %v4060_v15  ;;  %9067 = vst [vmem:[#allocation21_spill] sm:$0xff] %v4954_v63  ;;  %v4968_v2 = vld [vmem:[%s8891_s2 + $0x10] sm:$0x11]  ;;  %v5004_v10 = vld [vmem:[%s8891_s2 + $0x58] sm:$0x11]  ;;  %v5013_v13 = vmul.f32 %v4826_v18, %v4927_v52  ;;  %v5018_v14 = vmul.f32 %v4826_v18, %v8902_v53  ;;  %v5022_v15 = vmul.f32 %v4826_v18, %v4943_v58  ;;  %v8904_v34 = vunpack.c.h.bf16 %v4973_v3  ;;  %v4055_v42 = vld [vmem:[%s8892_s3 + $0x20] sm:$0xff] }
  0x21   :  { %4439 = vmatprep.subr.mxu0 %v4075_v16  ;;  %9068 = vst [vmem:[#allocation22_spill] sm:$0xff] %v5004_v10  ;;  %v5009_v11 = vld [vmem:[%s8891_s2 + $0x70] sm:$0x11]  ;;  %v5027_v16 = vmul.f32 %v4826_v18, %v8900_v59  ;;  %v5037_v21 = vld [vmem:[%s8891_s2 + $0xa0] sm:$0x11]  ;;  %v5049_v28 = vmul.f32 %v4826_v18, %v4946_v60  ;;  %v8905_v36 = vunpack.c.h.bf16 %v4978_v4  ;;  %v5060_v48 = vmul.f32 %v4826_v18, %v8901_v62  ;;  %s7710_s26 = sld [smem:[#allocation5 + $0x5]] }
  0x22   :  { %4440 = vmatpush3.msra.mxu0 %v4059_v20  ;;  %9069 = vst [vmem:[#allocation23_spill] sm:$0xff] %v5009_v11  ;;  %v5032_v20 = vld [vmem:[%s8891_s2 + $0x88] sm:$0x11]  ;;  %9071 = vst [vmem:[#allocation25_spill] sm:$0xff] %v5037_v21  ;;  %v5042_v23 = vld [vmem:[%s8891_s2 + $0xb8] sm:$0x11]  ;;  %v5064_v50 = vmul.f32 %v4826_v18, %v4954_v63  ;;  %v1925_v53 = vmul.f32 %v4828_v19, %v1835_v30  ;;  %v1931_v62 = vmul.f32 %v4828_v19, %v1839_v37 }
  0x23   :  { %4441 = vmatprep.subr.mxu0 %v4074_v25  ;;  %9070 = vst [vmem:[#allocation24_spill] sm:$0xff] %v5032_v20  ;;  %9072 = vst [vmem:[#allocation26_spill] sm:$0xff] %v5042_v23  ;;  %v4071_v25 = vld [vmem:[%s8892_s3 + $0xa0] sm:$0xff]  ;;  %v1933_v17 = vmul.f32 %v4828_v19, %v4886_v38  ;;  %v4069_v30 = vld [vmem:[%s8892_s3 + $0x90] sm:$0xff]  ;;  %v1939_v22 = vmul.f32 %v4828_v19, %v4905_v44  ;;  %v1941_v37 = vmul.f32 %v4828_v19, %v8905_v36  ;;  %s7712_s28 = sld [smem:[#allocation5 + $0x6]]  ;;  %vm4712_vm14 = vmmov 0  }
  0x24   :  { %4442 = vmatpush3.msra.mxu0 %v4058_v33  ;;  %v8903_v33 = vunpack.c.h.bf16 %v4968_v2  ;;  %v1945_v27 = vmul.f32 %v4828_v19, %v4908_v46  ;;  %v1949_v36 = vmul.f32 %v4828_v19, %v1851_v51  ;;  %v1951_v29 = vmul.f32 %v4828_v19, %v4927_v52  ;;  %v4052_v51 = vld [vmem:[%s8892_s3 + $0x8] sm:$0xff]  ;;  %s7716_s29 = sld [smem:[#allocation5 + $0x7]] }
  0x25   :  { %4443 = vmatprep.subr.mxu0 %v4073_v55  ;;  %v8908_v55 = vunpack.c.h.bf16 %v5004_v10  ;;  %v9074_v18 = vunpack.c.h.bf16 %v4895_v41  ;;  %v1957_v35 = vmul.f32 %v4828_v19, %v4943_v58  ;;  %v9076_v40 = vunpack.c.h.bf16 %v4903_v43  ;;  %s7789_s10 = sld [smem:[#allocation5 + $0x8]] }
  0x26   :  { %4444 = vmatpush3.msra.mxu0 %v4057_v56  ;;  %v4054_v56 = vld [vmem:[%s8892_s3 + $0x18] sm:$0xff]  ;;  %v1929_v12 = vmul.f32 %v4828_v19, %v8903_v33  ;;  %v1937_v33 = vmul.f32 %v4828_v19, %v1843_v39  ;;  %v1963_v41 = vmul.f32 %v4828_v19, %v4946_v60  ;;  %v2023_v58 = vrot.slane %v1925_v53, 1  ;;  %s7791_s11 = sld [smem:[#allocation5 + $0x9]] }
  0x27   :  { %4445 = vmatprep.subr.mxu0 %v4072_v57  ;;  %v4070_v57 = vld [vmem:[%s8892_s3 + $0x98] sm:$0xff]  ;;  %v1947_v39 = vmul.f32 %v4828_v19, %v8908_v55  ;;  %v1955_v55 = vmul.f32 %v4828_v19, %v9074_v18  ;;  %v9077_v18 = vunpack.c.h.bf16 %v5037_v21  ;;  %v9078_v43 = vunpack.c.h.bf16 %v4921_v49  ;;  %s7793_s13 = sld [smem:[#allocation5 + $0xa]] }
  0x28   :  { %4446 = vmatpush3.msra.mxu0 %v4056_v5  ;;  %v1927_v5 = vmul.f32 %v4828_v19, %v4866_v31  ;;  %v9079_v53 = vunpack.c.h.bf16 %v5042_v23  ;;  %s7797_s12 = sld [smem:[#allocation5 + $0xb]]  ;;  %vm4169_vm15 = vcmask 523264  }
  0x29   :  { %4447 = vmatprep.subr.mxu0 %v4071_v25  ;;  %v1935_v25 = vmul.f32 %v4828_v19, %v8904_v34  ;;  %v1943_v34 = vmul.f32 %v4828_v19, %v1847_v45  ;;  %v9073_v45 = vunpack.c.h.bf16 %v5009_v11  ;;  %v1965_v32 = vmul.f32 %v4828_v19, %v9077_v18 }
  0x2a   :  { %4448 = vmatpush3.msra.mxu0 %v4055_v42  ;;  %v4053_v42 = vld [vmem:[%s8892_s3 + $0x10] sm:$0xff]  ;;  %v2028_v11 = vrot.slane %v1929_v12, 1  ;;  %v1967_v21 = vmul.f32 %v4828_v19, %v9078_v43  ;;  %v2034_v18 = vrot.slane %v1933_v17, 1  ;;  %v1971_v12 = vmul.f32 %v4828_v19, %v9079_v53 }
  0x2b   :  { %4449 = vmatprep.subr.mxu0 %v4070_v57  ;;  %v4068_v57 = vld [vmem:[%s8892_s3 + $0x88] sm:$0xff]  ;;  %v1953_v59 = vmul.f32 %v4828_v19, %v9073_v45  ;;  %v1961_v45 = vmul.f32 %v4828_v19, %v9076_v40  ;;  %v4051_v40 = vld [vmem:[%s8892_s3] sm:$0xff]  ;;  %v2038_v60 = vrot.slane %v1935_v25, 1  ;;  %v2053_v10 = vrot.slane %v1943_v34, 1 }
  0x2c   :  { %4450 = vmatpush3.msra.mxu0 %v4054_v56  ;;  %v9075_v56 = vunpack.c.h.bf16 %v5032_v20  ;;  %v2024_v20 = vrot.slane %v1927_v5, 1  ;;  %v2044_v5 = vrot.slane %v1939_v22, 1  ;;  %v2054_v43 = vrot.slane %v1945_v27, 1 }
  0x2d   :  { %4451 = vmatprep.subr.mxu0 %v4069_v30  ;;  %v4067_v30 = vld [vmem:[%s8892_s3 + $0x80] sm:$0xff]  ;;  %v2058_v17 = vrot.slane %v1947_v39, 1  ;;  %v2063_v25 = vrot.slane %v1949_v36, 1  ;;  %v2039_v23 = vsel %vm224_vm0, %v2034_v18, %v2038_v60  ;;  %v2068_v46 = vrot.slane %v1953_v59, 1  ;;  %s5651_s3 = sld [smem:[#allocation5 + $0x85]] }
  0x2e   :  { %v1959_v26 = vmul.f32 %v4828_v19, %v9075_v56  ;;  %4452 = vmatpush3.msra.mxu0 %v4053_v42  ;;  %v2033_v56 = vrot.slane %v1931_v62, 1  ;;  %v1969_v42 = vmul.f32 %v4828_v19, %v4954_v63  ;;  %v2043_v62 = vrot.slane %v1937_v33, 1 }
  0x2f   :  { %4453 = vmatprep.subr.mxu0 %v4068_v57  ;;  %v2048_v57 = vrot.slane %v1941_v37, 1  ;;  %v2025_v52 = vsel %vm224_vm0, %v2023_v58, %v2024_v20  ;;  %v2029_v49 = vsel %vm224_vm0, %v2024_v20, %v2028_v11  ;;  %v2073_v53 = vrot.slane %v1955_v55, 1 }
  0x30   :  { %4454 = vmatpush3.msra.mxu0 %v4052_v51  ;;  %v2035_v63 = vsel %vm224_vm0, %v2033_v56, %v2034_v18  ;;  %v2064_v51 = vrot.slane %v1951_v29, 1  ;;  %v2074_v33 = vrot.slane %v1957_v35, 1  ;;  %v2045_v22 = vsel %vm224_vm0, %v2043_v62, %v2044_v5  ;;  %v5242_v18 = vld [vmem:[%s8891_s2 + $0x78] sm:$0xee] }
  0x31   :  { %4455 = vmatprep.subr.mxu0 %v4067_v30  ;;  %v2049_v37 = vsel %vm224_vm0, %v2044_v5, %v2048_v57  ;;  %v2078_v58 = vrot.slane %v1959_v26, 1  ;;  %v2083_v30 = vrot.slane %v1961_v45, 1  ;;  %v2055_v11 = vsel %vm224_vm0, %v2053_v10, %v2054_v43  ;;  %9081 = vst [vmem:[#allocation28_spill] sm:$0xff] %v5242_v18 }
  0x32   :  { %4456 = vmatpush3.msra.mxu0 %v4051_v40  ;;  %v2059_v20 = vsel %vm224_vm0, %v2054_v43, %v2058_v17  ;;  %v2084_v34 = vrot.slane %v1963_v41, 1  ;;  %v2088_v27 = vrot.slane %v1965_v32, 1  ;;  %v2065_v36 = vsel %vm224_vm0, %v2063_v25, %v2064_v51 }
  0x33   :  { %v2093_v39 = vrot.slane %v1967_v21, 1  ;;  %v2094_v29 = vrot.slane %v1969_v42, 1  ;;  %v2098_v60 = vrot.slane %v1971_v12, 1  ;;  %v2069_v59 = vsel %vm224_vm0, %v2064_v51, %v2068_v46  ;;  %v5193_v42 = vld [vmem:[%s8891_s2] sm:$0xee] }
  0x34   :  { %v2075_v55 = vsel %vm224_vm0, %v2073_v53, %v2074_v33  ;;  %v2079_v35 = vsel %vm224_vm0, %v2074_v33, %v2078_v58  ;;  %v2085_v26 = vsel %vm224_vm0, %v2083_v30, %v2084_v34  ;;  %v2089_v45 = vsel %vm224_vm0, %v2084_v34, %v2088_v27  ;;  %v5247_v12 = vld [vmem:[%s8891_s2 + $0x90] sm:$0xee] }
  0x35   :  { %v2095_v10 = vsel %vm224_vm0, %v2093_v39, %v2094_v29  ;;  %v5175_v41 = vadd.f32 %v2025_v52, %v4913_v47  ;;  %v5178_v32 = vadd.f32 %v2029_v49, %v4932_v54  ;;  %v2099_v21 = vsel %vm224_vm0, %v2094_v29, %v2098_v60  ;;  %v5198_v47 = vld [vmem:[%s8891_s2 + $0x18] sm:$0xee]  ;;  %v5203_v52 = vld [vmem:[%s8891_s2 + $0x30] sm:$0xee]  ;;  %9082 = vst [vmem:[#allocation29_spill] sm:$0xff] %v5247_v12 }
  0x36   :  { %v5182_v46 = vadd.f32 %v2035_v63, %v4951_v61  ;;  %v5185_v56 = vadd.f32 %v2039_v23, %v4958_v0  ;;  %v5188_v40 = vadd.f32 %v2045_v22, %v4963_v1  ;;  %v5206_v54 = vadd.f32 %v2049_v37, %v4985_v6  ;;  %v5220_v1 = vld [vmem:[%s8891_s2 + $0x48] sm:$0xee]  ;;  %v5225_v23 = vld [vmem:[%s8891_s2 + $0x60] sm:$0xee]  ;;  %v9087_v27 = vld [vmem:[#allocation17_spill] sm:$0xff] }
  0x37   :  { %v5209_v61 = vadd.f32 %v2055_v11, %v4990_v7  ;;  %v5212_v63 = vadd.f32 %v2059_v20, %v4994_v8  ;;  %v5215_v0 = vadd.f32 %v2065_v36, %v4999_v9  ;;  %9080 = vst [vmem:[#allocation27_spill] sm:$0xff] %v5225_v23  ;;  %v5228_v6 = vadd.f32 %v2069_v59, %v5013_v13  ;;  %v5252_v13 = vld [vmem:[%s8891_s2 + $0xa8] sm:$0xee]  ;;  %v9088_v36 = vld [vmem:[#allocation22_spill] sm:$0xff] }
  0x38   :  { %v5231_v7 = vadd.f32 %v2075_v55, %v5018_v14  ;;  %v5234_v8 = vadd.f32 %v2079_v35, %v5022_v15  ;;  %v5237_v9 = vadd.f32 %v2085_v26, %v5027_v16  ;;  %9083 = vst [vmem:[#allocation30_spill] sm:$0xff] %v5252_v13  ;;  %v5255_v14 = vadd.f32 %v2089_v45, %v5049_v28  ;;  %v9090_v59 = vld [vmem:[#allocation18_spill] sm:$0xff]  ;;  %v9091_v55 = vld [vmem:[#allocation23_spill] sm:$0xff] }
  0x39   :  { %v8932_v15 = vunpack.c.h.bf16 %v5193_v42  ;;  %v8931_v16 = vunpack.c.h.bf16 %v5198_v47  ;;  %v8929_v62 = vunpack.c.h.bf16 %v5203_v52  ;;  %v5261_v5 = vadd.f32 %v2095_v10, %v5060_v48  ;;  %v9093_v10 = vld [vmem:[#allocation19_spill] sm:$0xff] }
  0x3a   :  { %v5264_v57 = vadd.f32 %v2099_v21, %v5064_v50  ;;  %v8928_v49 = vunpack.c.h.bf16 %v5220_v1  ;;  %v8927_v43 = vunpack.c.h.bf16 %v5225_v23  ;;  %v8930_v17 = vunpack.c.h.bf16 %v5242_v18 }
  0x3b   :  { %v8936_v28 = vunpack.c.h.bf16 %v5247_v12  ;;  %v8938_v25 = vunpack.c.h.bf16 %v5252_v13  ;;  %v2190_v51 = vmul.f32 %v4844_v24, %v8932_v15  ;;  %v2192_v48 = vmul.f32 %v4844_v24, %v4866_v31 }
  0x3c   :  { %v9084_v50 = vunpack.c.h.bf16 %v4968_v2  ;;  %v2196_v33 = vmul.f32 %v4844_v24, %v8931_v16  ;;  %v2198_v22 = vmul.f32 %v4844_v24, %v4886_v38  ;;  %v9085_v37 = vunpack.c.h.bf16 %v4973_v3 }
  0x3d   :  { %v2202_v30 = vmul.f32 %v4844_v24, %v8929_v62  ;;  %v2204_v2 = vmul.f32 %v4844_v24, %v4905_v44  ;;  %v9086_v11 = vunpack.c.h.bf16 %v4978_v4  ;;  %v2208_v34 = vmul.f32 %v4844_v24, %v8928_v49 }
  0x3e   :  { %v2194_v53 = vmul.f32 %v4844_v24, %v9084_v50  ;;  %v2200_v58 = vmul.f32 %v4844_v24, %v9085_v37  ;;  %v2210_v3 = vmul.f32 %v4844_v24, %v9087_v27  ;;  %v9089_v39 = vunpack.c.h.bf16 %v9088_v36  ;;  %v9094_v50 = vld [vmem:[#allocation24_spill] sm:$0xff] }
  0x3f   :  { %v2206_v20 = vmul.f32 %v4844_v24, %v9086_v11  ;;  %v2214_v60 = vmul.f32 %v4844_v24, %v8927_v43  ;;  %v2216_v4 = vmul.f32 %v4844_v24, %v9090_v59  ;;  %v9092_v35 = vunpack.c.h.bf16 %v9091_v55  ;;  %v9097_v43 = vld [vmem:[#allocation25_spill] sm:$0xff] }
  0x40   :  { %v2212_v29 = vmul.f32 %v4844_v24, %v9089_v39  ;;  %v2220_v45 = vmul.f32 %v4844_v24, %v8930_v17  ;;  %v2222_v21 = vmul.f32 %v4844_v24, %v9093_v10  ;;  %v9095_v37 = vunpack.c.h.bf16 %v9094_v50  ;;  %v9096_v39 = vld [vmem:[#allocation20_spill] sm:$0xff]  ;;  %v9100_v10 = vld [vmem:[#allocation26_spill] sm:$0xff] }
  0x41   :  { %v2218_v26 = vmul.f32 %v4844_v24, %v9092_v35  ;;  %v2226_v36 = vmul.f32 %v4844_v24, %v8936_v28  ;;  %v2228_v55 = vmul.f32 %v4844_v24, %v9096_v39  ;;  %v9098_v35 = vunpack.c.h.bf16 %v9097_v43 }
  0x42   :  { %v2224_v11 = vmul.f32 %v4844_v24, %v9095_v37  ;;  %v2288_v62 = vrot.slane %v2190_v51, 2  ;;  %v2289_v17 = vrot.slane %v2192_v48, 2  ;;  %v2293_v16 = vrot.slane %v2194_v53, 2  ;;  %v9099_v37 = vld [vmem:[#allocation21_spill] sm:$0xff] }
  0x43   :  { %v2230_v49 = vmul.f32 %v4844_v24, %v9098_v35  ;;  %v2298_v15 = vrot.slane %v2196_v33, 2  ;;  %v2232_v50 = vmul.f32 %v4844_v24, %v8938_v25  ;;  %v2234_v19 = vmul.f32 %v4844_v24, %v9099_v37 }
  0x44   :  { %v2299_v12 = vrot.slane %v2198_v22, 2  ;;  %v2303_v28 = vrot.slane %v2200_v58, 2  ;;  %v9101_v18 = vunpack.c.h.bf16 %v9100_v10  ;;  %v2308_v43 = vrot.slane %v2202_v30, 2 }
  0x45   :  { %v2309_v59 = vrot.slane %v2204_v2, 2  ;;  %v2313_v35 = vrot.slane %v2206_v20, 2  ;;  %v2290_v51 = vsel %vm426_vm1, %v2288_v62, %v2289_v17  ;;  %v2294_v48 = vsel %vm426_vm1, %v2289_v17, %v2293_v16 }
  0x46   :  { %v2236_v39 = vmul.f32 %v4844_v24, %v9101_v18  ;;  %v2318_v53 = vrot.slane %v2208_v34, 2  ;;  %v2319_v33 = vrot.slane %v2210_v3, 2  ;;  %v2300_v25 = vsel %vm426_vm1, %v2298_v15, %v2299_v12 }
  0x47   :  { %v2323_v13 = vrot.slane %v2212_v29, 2  ;;  %v2328_v23 = vrot.slane %v2214_v60, 2  ;;  %v2329_v37 = vrot.slane %v2216_v4, 2  ;;  %v2304_v22 = vsel %vm426_vm1, %v2299_v12, %v2303_v28 }
  0x48   :  { %v2333_v58 = vrot.slane %v2218_v26, 2  ;;  %v2338_v10 = vrot.slane %v2220_v45, 2  ;;  %v2339_v27 = vrot.slane %v2222_v21, 2  ;;  %v2310_v18 = vsel %vm426_vm1, %v2308_v43, %v2309_v59 }
  0x49   :  { %v2314_v30 = vsel %vm426_vm1, %v2309_v59, %v2313_v35  ;;  %v2343_v2 = vrot.slane %v2224_v11, 2  ;;  %v2348_v62 = vrot.slane %v2226_v36, 2  ;;  %v2320_v16 = vsel %vm426_vm1, %v2318_v53, %v2319_v33  ;;  %v5369_v11 = vld [vmem:[%s8891_s2 + $0x10] sm:$0x33]  ;;  %v5396_v36 = vld [vmem:[%s8891_s2 + $0x58] sm:$0x33] }
  0x4a   :  { %v2324_v17 = vsel %vm426_vm1, %v2319_v33, %v2323_v13  ;;  %v2349_v20 = vrot.slane %v2228_v55, 2  ;;  %v2353_v15 = vrot.slane %v2230_v49, 2  ;;  %v2330_v34 = vsel %vm426_vm1, %v2328_v23, %v2329_v37  ;;  %9102 = vst [vmem:[#allocation22_spill] sm:$0xff] %v5396_v36  ;;  %v5418_v55 = vld [vmem:[%s8891_s2 + $0x88] sm:$0x33] }
  0x4b   :  { %v2358_v3 = vrot.slane %v2232_v50, 2  ;;  %v2359_v29 = vrot.slane %v2234_v19, 2  ;;  %v2363_v12 = vrot.slane %v2236_v39, 2  ;;  %v2334_v28 = vsel %vm426_vm1, %v2329_v37, %v2333_v58  ;;  %v5401_v39 = vld [vmem:[%s8891_s2 + $0x70] sm:$0x33]  ;;  %9104 = vst [vmem:[#allocation24_spill] sm:$0xff] %v5418_v55 }
  0x4c   :  { %v2340_v60 = vsel %vm426_vm1, %v2338_v10, %v2339_v27  ;;  %v2344_v4 = vsel %vm426_vm1, %v2339_v27, %v2343_v2  ;;  %v2350_v59 = vsel %vm426_vm1, %v2348_v62, %v2349_v20  ;;  %v2354_v26 = vsel %vm426_vm1, %v2349_v20, %v2353_v15  ;;  %9103 = vst [vmem:[#allocation23_spill] sm:$0xff] %v5401_v39  ;;  %v5423_v50 = vld [vmem:[%s8891_s2 + $0xa0] sm:$0x33] }
  0x4d   :  { %v2360_v45 = vsel %vm426_vm1, %v2358_v3, %v2359_v29  ;;  %v5351_v13 = vadd.f32 %v2290_v51, %v5175_v41  ;;  %v5354_v23 = vadd.f32 %v2294_v48, %v5178_v32  ;;  %v2364_v19 = vsel %vm426_vm1, %v2359_v29, %v2363_v12  ;;  %v5374_v41 = vld [vmem:[%s8891_s2 + $0x28] sm:$0x33]  ;;  %v5379_v32 = vld [vmem:[%s8891_s2 + $0x40] sm:$0x33]  ;;  %9105 = vst [vmem:[#allocation25_spill] sm:$0xff] %v5423_v50 }
  0x4e   :  { %v5358_v49 = vadd.f32 %v2300_v25, %v5182_v46  ;;  %v5361_v21 = vadd.f32 %v2304_v22, %v5185_v56  ;;  %v5364_v27 = vadd.f32 %v2310_v18, %v5188_v40  ;;  %v5382_v46 = vadd.f32 %v2314_v30, %v5206_v54  ;;  %v9108_v58 = vld [vmem:[#allocation15_spill] sm:$0xff] }
  0x4f   :  { %v5385_v56 = vadd.f32 %v2320_v16, %v5209_v61  ;;  %v5388_v40 = vadd.f32 %v2324_v17, %v5212_v63  ;;  %v5391_v25 = vadd.f32 %v2330_v34, %v5215_v0  ;;  %v5404_v54 = vadd.f32 %v2334_v28, %v5228_v6  ;;  %v5428_v6 = vld [vmem:[%s8891_s2 + $0xb8] sm:$0x33]  ;;  %v9113_v29 = vld [vmem:[#allocation27_spill] sm:$0xff] }
  0x50   :  { %v5407_v61 = vadd.f32 %v2340_v60, %v5231_v7  ;;  %v5410_v63 = vadd.f32 %v2344_v4, %v5234_v8  ;;  %v5413_v0 = vadd.f32 %v2350_v59, %v5237_v9  ;;  %9106 = vst [vmem:[#allocation26_spill] sm:$0xff] %v5428_v6  ;;  %v5431_v7 = vadd.f32 %v2354_v26, %v5255_v14  ;;  %v9112_v34 = vld [vmem:[#allocation17_spill] sm:$0xff]  ;;  %v9115_v60 = vld [vmem:[#allocation18_spill] sm:$0xff]  ;;  %v9116_v59 = vld [vmem:[#allocation28_spill] sm:$0xff] }
  0x51   :  { %v8945_v8 = vunpack.c.h.bf16 %v5369_v11  ;;  %v8944_v9 = vunpack.c.h.bf16 %v5374_v41  ;;  %v8943_v37 = vunpack.c.h.bf16 %v5379_v32  ;;  %v5437_v43 = vadd.f32 %v2360_v45, %v5261_v5 }
  0x52   :  { %v5440_v35 = vadd.f32 %v2364_v19, %v5264_v57  ;;  %v8941_v51 = vunpack.c.h.bf16 %v5396_v36  ;;  %v8942_v48 = vunpack.c.h.bf16 %v5401_v39  ;;  %v8948_v53 = vunpack.c.h.bf16 %v5418_v55  ;;  %v9118_v19 = vld [vmem:[#allocation19_spill] sm:$0xff] }
  0x53   :  { %v8952_v14 = vunpack.c.h.bf16 %v5423_v50  ;;  %v9107_v22 = vunpack.c.h.bf16 %v5193_v42  ;;  %v2457_v5 = vmul.f32 %v9108_v58, %v4866_v31  ;;  %v2459_v57 = vmul.f32 %v9108_v58, %v8945_v8  ;;  %v9122_v8 = vld [vmem:[#allocation30_spill] sm:$0xff] }
  0x54   :  { %v9109_v18 = vunpack.c.h.bf16 %v5198_v47  ;;  %v2463_v2 = vmul.f32 %v9108_v58, %v4886_v38  ;;  %v2465_v42 = vmul.f32 %v9108_v58, %v8944_v9  ;;  %v9110_v62 = vunpack.c.h.bf16 %v5203_v52 }
  0x55   :  { %v2455_v10 = vmul.f32 %v9108_v58, %v9107_v22  ;;  %v2469_v17 = vmul.f32 %v9108_v58, %v4905_v44  ;;  %v2471_v47 = vmul.f32 %v9108_v58, %v8943_v37  ;;  %v9111_v20 = vunpack.c.h.bf16 %v5220_v1 }
  0x56   :  { %v2461_v30 = vmul.f32 %v9108_v58, %v9109_v18  ;;  %v2467_v16 = vmul.f32 %v9108_v58, %v9110_v62  ;;  %v2475_v3 = vmul.f32 %v9108_v58, %v9112_v34  ;;  %v2477_v52 = vmul.f32 %v9108_v58, %v8941_v51  ;;  %v9119_v62 = vld [vmem:[#allocation29_spill] sm:$0xff] }
  0x57   :  { %v2473_v15 = vmul.f32 %v9108_v58, %v9111_v20  ;;  %v9114_v12 = vunpack.c.h.bf16 %v9113_v29  ;;  %v2481_v4 = vmul.f32 %v9108_v58, %v9115_v60  ;;  %v2483_v1 = vmul.f32 %v9108_v58, %v8942_v48 }
  0x58   :  { %v9117_v26 = vunpack.c.h.bf16 %v9116_v59  ;;  %v2487_v22 = vmul.f32 %v9108_v58, %v9118_v19  ;;  %v2489_v18 = vmul.f32 %v9108_v58, %v8948_v53  ;;  %v9120_v20 = vunpack.c.h.bf16 %v9119_v62  ;;  %v9124_v53 = vld [vmem:[#allocation21_spill] sm:$0xff] }
  0x59   :  { %v2479_v28 = vmul.f32 %v9108_v58, %v9114_v12  ;;  %v9121_v12 = vld [vmem:[#allocation20_spill] sm:$0xff]  ;;  %v2495_v59 = vmul.f32 %v9108_v58, %v8952_v14  ;;  %v2553_v48 = vrot.slane %v2455_v10, 3  ;;  %v2558_v37 = vrot.slane %v2459_v57, 3 }
  0x5a   :  { %v2485_v45 = vmul.f32 %v9108_v58, %v9117_v26  ;;  %v2491_v29 = vmul.f32 %v9108_v58, %v9120_v20  ;;  %v2493_v51 = vmul.f32 %v9108_v58, %v9121_v12  ;;  %v2554_v26 = vrot.slane %v2457_v5, 3 }
  0x5b   :  { %v2563_v9 = vrot.slane %v2461_v30, 3  ;;  %v9123_v33 = vunpack.c.h.bf16 %v9122_v8  ;;  %v2499_v62 = vmul.f32 %v9108_v58, %v9124_v53  ;;  %v2564_v55 = vrot.slane %v2463_v2, 3 }
  0x5c   :  { %v2568_v20 = vrot.slane %v2465_v42, 3  ;;  %v9125_v19 = vunpack.c.h.bf16 %v5428_v6  ;;  %v2573_v50 = vrot.slane %v2467_v16, 3  ;;  %v2574_v39 = vrot.slane %v2469_v17, 3 }
  0x5d   :  { %v2497_v24 = vmul.f32 %v9108_v58, %v9123_v33  ;;  %v2578_v14 = vrot.slane %v2471_v47, 3  ;;  %v2555_v10 = vsel %vm628_vm2, %v2553_v48, %v2554_v26  ;;  %v2559_v5 = vsel %vm628_vm2, %v2554_v26, %v2558_v37  ;;  %v2700_v26 = vld [vmem:[%s8891_s2 + $0x90] sm:$0xcc] }
  0x5e   :  { %v2501_v12 = vmul.f32 %v9108_v58, %v9125_v19  ;;  %v2583_v57 = vrot.slane %v2473_v15, 3  ;;  %v2584_v8 = vrot.slane %v2475_v3, 3  ;;  %v2565_v33 = vsel %vm628_vm2, %v2563_v9, %v2564_v55 }
  0x5f   :  { %v2588_v30 = vrot.slane %v2477_v52, 3  ;;  %v2593_v60 = vrot.slane %v2479_v28, 3  ;;  %v2594_v53 = vrot.slane %v2481_v4, 3  ;;  %v2569_v2 = vsel %vm628_vm2, %v2564_v55, %v2568_v20 }
  0x60   :  { %v2598_v42 = vrot.slane %v2483_v1, 3  ;;  %v2603_v6 = vrot.slane %v2485_v45, 3  ;;  %v2604_v36 = vrot.slane %v2487_v22, 3  ;;  %v2575_v16 = vsel %vm628_vm2, %v2573_v50, %v2574_v39  ;;  %v2694_v22 = vld [vmem:[%s8891_s2] sm:$0xcc] }
  0x61   :  { %v2579_v17 = vsel %vm628_vm2, %v2574_v39, %v2578_v14  ;;  %v2608_v47 = vrot.slane %v2489_v18, 3  ;;  %v2613_v48 = vrot.slane %v2491_v29, 3  ;;  %v2585_v37 = vsel %vm628_vm2, %v2583_v57, %v2584_v8  ;;  %v2697_v29 = vld [vmem:[%s8891_s2 + $0x48] sm:$0xcc] }
  0x62   :  { %v2589_v15 = vsel %vm628_vm2, %v2584_v8, %v2588_v30  ;;  %v2614_v3 = vrot.slane %v2493_v51, 3  ;;  %v2618_v9 = vrot.slane %v2495_v59, 3  ;;  %v2595_v52 = vsel %vm628_vm2, %v2593_v60, %v2594_v53  ;;  %v2699_v59 = vld [vmem:[%s8891_s2 + $0x78] sm:$0xcc] }
  0x63   :  { %v2623_v28 = vrot.slane %v2497_v24, 3  ;;  %v2624_v4 = vrot.slane %v2499_v62, 3  ;;  %v2628_v55 = vrot.slane %v2501_v12, 3  ;;  %v2599_v1 = vsel %vm628_vm2, %v2594_v53, %v2598_v42  ;;  %v2698_v12 = vld [vmem:[%s8891_s2 + $0x60] sm:$0xcc] }
  0x64   :  { %v2605_v45 = vsel %vm628_vm2, %v2603_v6, %v2604_v36  ;;  %v2609_v50 = vsel %vm628_vm2, %v2604_v36, %v2608_v47  ;;  %v2615_v39 = vsel %vm628_vm2, %v2613_v48, %v2614_v3  ;;  %v2619_v14 = vsel %vm628_vm2, %v2614_v3, %v2618_v9 }
  0x65   :  { %v2625_v19 = vsel %vm628_vm2, %v2623_v28, %v2624_v4  ;;  %v5527_v51 = vadd.f32 %v2555_v10, %v5351_v13  ;;  %v5530_v60 = vadd.f32 %v2559_v5, %v5354_v23  ;;  %v2629_v24 = vsel %vm628_vm2, %v2624_v4, %v2628_v55  ;;  %v2695_v13 = vld [vmem:[%s8891_s2 + $0x18] sm:$0xcc]  ;;  %v2696_v23 = vld [vmem:[%s8891_s2 + $0x30] sm:$0xcc] }
  0x66   :  { %v5534_v53 = vadd.f32 %v2565_v33, %v5358_v49  ;;  %v5537_v6 = vadd.f32 %v2569_v2, %v5361_v21  ;;  %v5540_v36 = vadd.f32 %v2575_v16, %v5364_v27  ;;  %v5552_v49 = vadd.f32 %v2579_v17, %v5382_v46  ;;  %v9126_v2 = vld [vmem:[#allocation16_spill] sm:$0xff]  ;;  %v9132_v4 = vld [vmem:[#allocation18_spill] sm:$0xff] }
  0x67   :  { %v5555_v21 = vadd.f32 %v2585_v37, %v5385_v56  ;;  %v5558_v27 = vadd.f32 %v2589_v15, %v5388_v40  ;;  %v5561_v18 = vadd.f32 %v2595_v52, %v5391_v25  ;;  %v5570_v46 = vadd.f32 %v2599_v1, %v5404_v54  ;;  %v2701_v54 = vld [vmem:[%s8891_s2 + $0xa8] sm:$0xcc]  ;;  %v9130_v52 = vld [vmem:[#allocation22_spill] sm:$0xff] }
  0x68   :  { %v5573_v56 = vadd.f32 %v2605_v45, %v5407_v61  ;;  %v5576_v40 = vadd.f32 %v2609_v50, %v5410_v63  ;;  %v5579_v25 = vadd.f32 %v2615_v39, %v5413_v0  ;;  %v5591_v61 = vadd.f32 %v2619_v14, %v5431_v7  ;;  %v9133_v1 = vld [vmem:[#allocation23_spill] sm:$0xff]  ;;  %v9136_v14 = vld [vmem:[#allocation24_spill] sm:$0xff] }
  0x69   :  { %v2703_v63 = vunpack.c.h.bf16 %v2694_v22  ;;  %v2705_v62 = vunpack.c.h.bf16 %v2695_v13  ;;  %v2707_v0 = vunpack.c.h.bf16 %v2696_v23  ;;  %v5594_v20 = vadd.f32 %v2625_v19, %v5437_v43  ;;  %v9135_v50 = vld [vmem:[#allocation19_spill] sm:$0xff]  ;;  %v9138_v22 = vld [vmem:[#allocation20_spill] sm:$0xff]  ;;  %v9139_v23 = vld [vmem:[#allocation25_spill] sm:$0xff] }
  0x6a   :  { %v5597_v10 = vadd.f32 %v2629_v24, %v5440_v35  ;;  %v2709_v5 = vunpack.c.h.bf16 %v2697_v29  ;;  %v2711_v57 = vunpack.c.h.bf16 %v2698_v12  ;;  %v2713_v8 = vunpack.c.h.bf16 %v2699_v59 }
  0x6b   :  { %v2715_v33 = vunpack.c.h.bf16 %v2700_v26  ;;  %v2717_v30 = vunpack.c.h.bf16 %v2701_v54  ;;  %v2720_v42 = vmul.f32 %v9126_v2, %v2703_v63  ;;  %v2722_v7 = vmul.f32 %v9126_v2, %v4866_v31 }
  0x6c   :  { %v9127_v16 = vunpack.c.h.bf16 %v5369_v11  ;;  %v2726_v43 = vmul.f32 %v9126_v2, %v2705_v62  ;;  %v2728_v35 = vmul.f32 %v9126_v2, %v4886_v38  ;;  %v9128_v47 = vunpack.c.h.bf16 %v5374_v41 }
  0x6d   :  { %v2732_v37 = vmul.f32 %v9126_v2, %v2707_v0  ;;  %v2734_v15 = vmul.f32 %v9126_v2, %v4905_v44  ;;  %v9129_v31 = vunpack.c.h.bf16 %v5379_v32  ;;  %v2738_v3 = vmul.f32 %v9126_v2, %v2709_v5  ;;  %v9141_v0 = vld [vmem:[#allocation21_spill] sm:$0xff] }
  0x6e   :  { %v2724_v17 = vmul.f32 %v9126_v2, %v9127_v16  ;;  %v2730_v48 = vmul.f32 %v9126_v2, %v9128_v47  ;;  %v2740_v9 = vmul.f32 %v9126_v2, %v9112_v34  ;;  %v9131_v38 = vunpack.c.h.bf16 %v9130_v52  ;;  %v9142_v16 = vld [vmem:[#allocation26_spill] sm:$0xff] }
  0x6f   :  { %v2736_v11 = vmul.f32 %v9126_v2, %v9129_v31  ;;  %v2744_v28 = vmul.f32 %v9126_v2, %v2711_v57  ;;  %v2746_v55 = vmul.f32 %v9126_v2, %v9132_v4  ;;  %v9134_v44 = vunpack.c.h.bf16 %v9133_v1 }
  0x70   :  { %v2742_v41 = vmul.f32 %v9126_v2, %v9131_v38  ;;  %v2750_v45 = vmul.f32 %v9126_v2, %v2713_v8  ;;  %v2752_v39 = vmul.f32 %v9126_v2, %v9135_v50  ;;  %v9137_v34 = vunpack.c.h.bf16 %v9136_v14 }
  0x71   :  { %v2748_v32 = vmul.f32 %v9126_v2, %v9134_v44  ;;  %v2756_v24 = vmul.f32 %v9126_v2, %v2715_v33  ;;  %v2758_v13 = vmul.f32 %v9126_v2, %v9138_v22  ;;  %v9140_v29 = vunpack.c.h.bf16 %v9139_v23 }
  0x72   :  { %v2754_v19 = vmul.f32 %v9126_v2, %v9137_v34  ;;  %v2818_v59 = vrot.slane %v2720_v42, 4  ;;  %v2819_v26 = vrot.slane %v2722_v7, 4  ;;  %v2823_v54 = vrot.slane %v2724_v17, 4 }
  0x73   :  { %v2760_v12 = vmul.f32 %v9126_v2, %v9140_v29  ;;  %v2828_v63 = vrot.slane %v2726_v43, 4  ;;  %v2762_v62 = vmul.f32 %v9126_v2, %v2717_v30  ;;  %v2764_v5 = vmul.f32 %v9126_v2, %v9141_v0 }
  0x74   :  { %v2829_v57 = vrot.slane %v2728_v35, 4  ;;  %v2833_v8 = vrot.slane %v2730_v48, 4  ;;  %v9143_v33 = vunpack.c.h.bf16 %v9142_v16  ;;  %v2838_v31 = vrot.slane %v2732_v37, 4 }
  0x75   :  { %v2839_v52 = vrot.slane %v2734_v15, 4  ;;  %v2843_v38 = vrot.slane %v2736_v11, 4  ;;  %v2820_v4 = vsel %vm830_vm3, %v2818_v59, %v2819_v26  ;;  %v2824_v42 = vsel %vm830_vm3, %v2819_v26, %v2823_v54 }
  0x76   :  { %v2766_v47 = vmul.f32 %v9126_v2, %v9143_v33  ;;  %v2848_v7 = vrot.slane %v2738_v3, 4  ;;  %v2849_v17 = vrot.slane %v2740_v9, 4  ;;  %v2830_v30 = vsel %vm830_vm3, %v2828_v63, %v2829_v57 }
  0x77   :  { %v2853_v43 = vrot.slane %v2742_v41, 4  ;;  %v2858_v1 = vrot.slane %v2744_v28, 4  ;;  %v2859_v44 = vrot.slane %v2746_v55, 4  ;;  %v2834_v35 = vsel %vm830_vm3, %v2829_v57, %v2833_v8 }
  0x78   :  { %v2863_v48 = vrot.slane %v2748_v32, 4  ;;  %v2868_v50 = vrot.slane %v2750_v45, 4  ;;  %v2869_v14 = vrot.slane %v2752_v39, 4  ;;  %v2840_v37 = vsel %vm830_vm3, %v2838_v31, %v2839_v52 }
  0x79   :  { %v2844_v15 = vsel %vm830_vm3, %v2839_v52, %v2843_v38  ;;  %v2873_v11 = vrot.slane %v2754_v19, 4  ;;  %v2878_v34 = vrot.slane %v2756_v24, 4  ;;  %v2850_v3 = vsel %vm830_vm3, %v2848_v7, %v2849_v17 }
  0x7a   :  { %v2854_v9 = vsel %vm830_vm3, %v2849_v17, %v2853_v43  ;;  %v2879_v41 = vrot.slane %v2758_v13, 4  ;;  %v2883_v28 = vrot.slane %v2760_v12, 4  ;;  %v2860_v55 = vsel %vm830_vm3, %v2858_v1, %v2859_v44 }
  0x7b   :  { %v2888_v22 = vrot.slane %v2762_v62, 4  ;;  %v2889_v32 = vrot.slane %v2764_v5, 4  ;;  %v2893_v45 = vrot.slane %v2766_v47, 4  ;;  %v2864_v39 = vsel %vm830_vm3, %v2859_v44, %v2863_v48 }
  0x7c   :  { %v2870_v23 = vsel %vm830_vm3, %v2868_v50, %v2869_v14  ;;  %v2874_v29 = vsel %vm830_vm3, %v2869_v14, %v2873_v11  ;;  %v2880_v19 = vsel %vm830_vm3, %v2878_v34, %v2879_v41  ;;  %v2884_v24 = vsel %vm830_vm3, %v2879_v41, %v2883_v28 }
  0x7d   :  { %v2890_v59 = vsel %vm830_vm3, %v2888_v22, %v2889_v32  ;;  %v2928_v13 = vadd.f32 %v2820_v4, %v5527_v51  ;;  %v2930_v12 = vadd.f32 %v2824_v42, %v5530_v60  ;;  %v2894_v26 = vsel %vm830_vm3, %v2889_v32, %v2893_v45 }
  0x7e   :  { %v2932_v54 = vadd.f32 %v2830_v30, %v5534_v53  ;;  %v2934_v63 = vadd.f32 %v2834_v35, %v5537_v6  ;;  %v2936_v62 = vadd.f32 %v2840_v37, %v5540_v36  ;;  %v2938_v0 = vadd.f32 %v2844_v15, %v5552_v49 }
  0x7f   :  { %v2940_v5 = vadd.f32 %v2850_v3, %v5555_v21  ;;  %v2942_v57 = vadd.f32 %v2854_v9, %v5558_v27  ;;  %v2944_v8 = vadd.f32 %v2860_v55, %v5561_v18  ;;  %v2946_v51 = vadd.f32 %v2864_v39, %v5570_v46 }
  0x80   :  { %v2948_v60 = vadd.f32 %v2870_v23, %v5573_v56  ;;  %v2950_v16 = vadd.f32 %v2874_v29, %v5576_v40  ;;  %v2952_v53 = vadd.f32 %v2880_v19, %v5579_v25  ;;  %v2954_v6 = vadd.f32 %v2884_v24, %v5591_v61 }
  0x81   :  { %v2956_v36 = vadd.f32 %v2890_v59, %v5594_v20  ;;  %v2958_v49 = vadd.f32 %v2894_v26, %v5597_v10  ;;  %v5682_v33 = vstv %s5651_s3 }
  0x82   :  { %9144 = vst [vmem:[#allocation17_spill] sm:$0xff] %v5682_v33  ;;  %v2961_v21 = vadd.f32 %v5682_v33, %v2928_v13  ;;  %v2963_v27 = vadd.f32 %v5682_v33, %v2930_v12  ;;  %v2965_v18 = vadd.f32 %v5682_v33, %v2932_v54  ;;  %v2967_v46 = vadd.f32 %v5682_v33, %v2934_v63 }
  0x83   :  { %v2969_v56 = vadd.f32 %v5682_v33, %v2936_v62  ;;  %v5690_v40 = vadd.f32 %v5682_v33, %v2938_v0  ;;  %v5693_v25 = vadd.f32 %v5682_v33, %v2940_v5  ;;  %v5696_v61 = vadd.f32 %v5682_v33, %v2942_v57 }
  0x84   :  { %v5699_v20 = vadd.f32 %v5682_v33, %v2944_v8  ;;  %v5702_v10 = vadd.f32 %v5682_v33, %v2946_v51  ;;  %v5705_v47 = vadd.f32 %v5682_v33, %v2948_v60  ;;  %v5708_v31 = vadd.f32 %v5682_v33, %v2950_v16 }
  0x85   :  { %v5711_v52 = vadd.f32 %v5682_v33, %v2952_v53  ;;  %v5714_v38 = vadd.f32 %v5682_v33, %v2954_v6  ;;  %v5717_v4 = vadd.f32 %v5682_v33, %v2956_v36  ;;  %v5720_v42 = vadd.f32 %v5682_v33, %v2958_v49 }
  0x86   :  { %v2993_v7 = vmax.f32 %v2961_v21, 0.0  ;;  %v2995_v17 = vmax.f32 %v2963_v27, 0.0  ;;  %v2997_v30 = vmax.f32 %v2965_v18, 0.0  ;;  %v2999_v43 = vmax.f32 %v2967_v46, 0.0 }
  0x87   :  { %v3001_v1 = vmax.f32 %v2969_v56, 0.0  ;;  %v3003_v44 = vmax.f32 %v5690_v40, 0.0  ;;  %v3005_v35 = vmax.f32 %v5693_v25, 0.0  ;;  %v3007_v48 = vmax.f32 %v5696_v61, 0.0 }
  0x88   :  { %v3009_v50 = vmax.f32 %v5699_v20, 0.0  ;;  %v3011_v14 = vmax.f32 %v5702_v10, 0.0  ;;  %v3013_v37 = vmax.f32 %v5705_v47, 0.0  ;;  %v3015_v15 = vmax.f32 %v5708_v31, 0.0  ;;  %v9145_v31 = vld [vmem:[#allocation14_spill] sm:$0xff] }
  0x89   :  { %v3017_v11 = vmax.f32 %v5711_v52, 0.0  ;;  %v3019_v34 = vmax.f32 %v5714_v38, 0.0  ;;  %v3021_v3 = vmax.f32 %v5717_v4, 0.0  ;;  %v3023_v9 = vmax.f32 %v5720_v42, 0.0  ;;  %v5757_v38 = vld [vmem:[%s8891_s2] sm:$0xff] }
  0x8a   :  { %v3059_v41 = vrot.slane %v2993_v7, 1  ;;  %v3060_v28 = vrot.slane %v2995_v17, 1  ;;  %v3065_v55 = vrot.slane %v2997_v30, 1  ;;  %v3066_v22 = vrot.slane %v2999_v43, 1 }
  0x8b   :  { %v3071_v32 = vrot.slane %v3001_v1, 1  ;;  %v3072_v45 = vrot.slane %v3003_v44, 1  ;;  %v3077_v39 = vrot.slane %v3005_v35, 1  ;;  %v3078_v23 = vrot.slane %v3007_v48, 1 }
  0x8c   :  { %v3061_v29 = vsel %vm224_vm0, %v3059_v41, %v3060_v28  ;;  %v3067_v19 = vsel %vm224_vm0, %v3065_v55, %v3066_v22  ;;  %v3083_v24 = vrot.slane %v3009_v50, 1  ;;  %v3084_v59 = vrot.slane %v3011_v14, 1 }
  0x8d   :  { %v3073_v13 = vsel %vm224_vm0, %v3071_v32, %v3072_v45  ;;  %v3079_v12 = vsel %vm224_vm0, %v3077_v39, %v3078_v23  ;;  %v3089_v26 = vrot.slane %v3013_v37, 1  ;;  %v3090_v54 = vrot.slane %v3015_v15, 1  ;;  %v4585_v32 = vld [vmem:[%s8891_s2 + $0x50] sm:$0xff]  ;;  %v5819_v39 = vld [vmem:[%s8891_s2 + $0x60] sm:$0xff] }
  0x8e   :  { %v3085_v63 = vsel %vm224_vm0, %v3083_v24, %v3084_v59  ;;  %v3095_v62 = vrot.slane %v3017_v11, 1  ;;  %v3096_v0 = vrot.slane %v3019_v34, 1  ;;  %v3101_v5 = vrot.slane %v3021_v3, 1  ;;  %v5830_v24 = vld [vmem:[%s8891_s2 + $0x78] sm:$0xff] }
  0x8f   :  { %v3091_v57 = vsel %vm224_vm0, %v3089_v26, %v3090_v54  ;;  %v3102_v8 = vrot.slane %v3023_v9, 1  ;;  %v3137_v51 = vmax.f32 %v2993_v7, %v3061_v29  ;;  %v3139_v60 = vmax.f32 %v2995_v17, %v3060_v28  ;;  %v4587_v29 = vld [vmem:[%s8891_s2 + $0x68] sm:$0xff] }
  0x90   :  { %v3097_v16 = vsel %vm224_vm0, %v3095_v62, %v3096_v0  ;;  %v3141_v53 = vmax.f32 %v2997_v30, %v3067_v19  ;;  %v3143_v6 = vmax.f32 %v2999_v43, %v3066_v22  ;;  %v3145_v36 = vmax.f32 %v3001_v1, %v3073_v13 }
  0x91   :  { %v3103_v49 = vsel %vm224_vm0, %v3101_v5, %v3102_v8  ;;  %v3147_v21 = vmax.f32 %v3003_v44, %v3072_v45  ;;  %v3149_v27 = vmax.f32 %v3005_v35, %v3079_v12  ;;  %v3151_v18 = vmax.f32 %v3007_v48, %v3078_v23  ;;  %3169 = vst [vmem:[#allocation3 + $0xc8] sm:$0xff] %v3137_v51  ;;  %v4579_v44 = vld [vmem:[%s8891_s2 + $0x8] sm:$0xff]  ;;  %v5786_v48 = vld [vmem:[%s8891_s2 + $0x18] sm:$0xff] }
  0x92   :  { %3171 = vst [vmem:[#allocation3 + $0x78] sm:$0x7f] %v3139_v60  ;;  %v3153_v46 = vmax.f32 %v3009_v50, %v3085_v63  ;;  %v3155_v56 = vmax.f32 %v3011_v14, %v3084_v59  ;;  %v3157_v40 = vmax.f32 %v3013_v37, %v3091_v57  ;;  %v3159_v25 = vmax.f32 %v3015_v15, %v3090_v54  ;;  %v4581_v14 = vld [vmem:[%s8891_s2 + $0x20] sm:$0xff]  ;;  %v5797_v15 = vld [vmem:[%s8891_s2 + $0x30] sm:$0xff] }
  0x93   :  { %3173 = vst [vmem:[#allocation3 + $0x90] sm:$0xff] %v3141_v53  ;;  %3175 = vst [vmem:[#allocation3 + $0xa8] sm:$0x7f] %v3143_v6  ;;  %v3161_v61 = vmax.f32 %v3017_v11, %v3097_v16  ;;  %v3163_v20 = vmax.f32 %v3019_v34, %v3096_v0  ;;  %v3165_v10 = vmax.f32 %v3021_v3, %v3103_v49  ;;  %v8955_v4 = vunpack.c.l.bf16 %v5757_v38  ;;  %v4583_v34 = vld [vmem:[%s8891_s2 + $0x38] sm:$0xff]  ;;  %v4589_v0 = vld [vmem:[%s8891_s2 + $0x80] sm:$0xff] }
  0x94   :  { %3177 = vst [vmem:[#allocation3 + $0xb0] sm:$0xff] %v3145_v36  ;;  %v3167_v47 = vmax.f32 %v3023_v9, %v3102_v8  ;;  %3179 = vst [vmem:[#allocation3 + $0x40] sm:$0x7f] %v3147_v21  ;;  %v5761_v42 = vstv %s5733_s19  ;;  %v5764_v7 = vstv %s5735_s20  ;;  %v5767_v17 = vstv %s5737_s21  ;;  %v5808_v9 = vld [vmem:[%s8891_s2 + $0x48] sm:$0xff]  ;;  %s7449_s21 = sld [smem:[#allocation5 + $0x3]] }
  0x95   :  { %3181 = vst [vmem:[#allocation3 + $0x60] sm:$0xff] %v3149_v27  ;;  %3183 = vst [vmem:[#allocation3 + $0x68] sm:$0x7f] %v3151_v18  ;;  %v5770_v30 = vstv %s5741_s30  ;;  %v5773_v43 = vstv %s5745_s22  ;;  %v5776_v1 = vstv %s5748_s23  ;;  %v5781_v35 = vunpack.c.l.bf16 %v4579_v44  ;;  %v5857_v6 = vld [vmem:[%s8891_s2 + $0x90] sm:$0xff]  ;;  %s4713_s23 = smov 64  }
  0x96   :  { %3185 = vst [vmem:[#allocation3 + $0x70] sm:$0xff] %v3153_v46  ;;  %3187 = vst [vmem:[#allocation3 + $0xa0] sm:$0x7f] %v3155_v56  ;;  %v5792_v37 = vunpack.c.l.bf16 %v4581_v14  ;;  %v5803_v3 = vunpack.c.l.bf16 %v4583_v34  ;;  %v5814_v45 = vunpack.c.l.bf16 %v4585_v32  ;;  %v5825_v19 = vunpack.c.l.bf16 %v4587_v29  ;;  %v5880_v34 = vld [vmem:[%s8891_s2 + $0xa8] sm:$0xff] }
  0x97   :  { %3189 = vst [vmem:[#allocation3 + $0x30] sm:$0xff] %v3157_v40  ;;  %3191 = vst [vmem:[#allocation3 + $0xf0] sm:$0x7f] %v3159_v25  ;;  %v5845_v5 = vunpack.c.l.bf16 %v4589_v0  ;;  %v4591_v40 = vld [vmem:[%s8891_s2 + $0x98] sm:$0xff] }
  0x98   :  { %3193 = vst [vmem:[#allocation3 + $0x48] sm:$0xff] %v3161_v61  ;;  %3195 = vst [vmem:[#allocation3 + $0xc0] sm:$0x7f] %v3163_v20  ;;  %v3207_v28 = vld [vmem:[#allocation3 + $0xc8] sm:$0x7f]  ;;  %v5868_v25 = vunpack.c.l.bf16 %v4591_v40 }
  0x99   :  { %3197 = vst [vmem:[#allocation3] sm:$0xff] %v3165_v10  ;;  %3199 = vst [vmem:[#allocation3 + $0x98] sm:$0x7f] %v3167_v47  ;;  %v3240_v55 = vld [vmem:[#allocation3 + $0xc8] sm:$0xfc]  ;;  %v5834_v26 = vmul.f32 %v5761_v42, %v3207_v28 }
  0x9a   :  { %9146 = vst [vmem:[#allocation27_spill] sm:$0xff] %v5761_v42  ;;  %9147 = vst [vmem:[#allocation28_spill] sm:$0xff] %v5764_v7  ;;  %v3242_v22 = vld [vmem:[#allocation3 + $0x78] sm:$0x1]  ;;  %v3209_v13 = vld [vmem:[#allocation3 + $0x90] sm:$0x7f]  ;;  %v5837_v63 = vmul.f32 %v5764_v7, %v3240_v55 }
  0x9b   :  { %9148 = vst [vmem:[#allocation29_spill] sm:$0xff] %v5767_v17  ;;  %9149 = vst [vmem:[#allocation30_spill] sm:$0xff] %v5770_v30  ;;  %v3211_v12 = vld [vmem:[#allocation3 + $0xb0] sm:$0x7f]  ;;  %v5840_v62 = vmul.f32 %v5764_v7, %v3242_v22  ;;  %v5848_v8 = vmul.f32 %v5761_v42, %v3209_v13  ;;  %v3246_v60 = vld [vmem:[#allocation3 + $0xa8] sm:$0x1] }
  0x9c   :  { %9150 = vst [vmem:[#allocation22_spill] sm:$0xff] %v5773_v43  ;;  %9151 = vst [vmem:[#allocation18_spill] sm:$0xff] %v5776_v1  ;;  %v3244_v54 = vld [vmem:[#allocation3 + $0x90] sm:$0xfc]  ;;  %v3213_v57 = vld [vmem:[#allocation3 + $0x60] sm:$0x7f]  ;;  %v5851_v51 = vmul.f32 %v5761_v42, %v3211_v12  ;;  %v3279_v46 = vmul.f32 %v5764_v7, %v3246_v60 }
  0x9d   :  { %9152 = vst [vmem:[#allocation23_spill] sm:$0xff] %v5825_v19  ;;  %9153 = vst [vmem:[#allocation19_spill] sm:$0xff] %v5845_v5  ;;  %v3248_v16 = vld [vmem:[#allocation3 + $0xb0] sm:$0xfc]  ;;  %v3277_v53 = vmul.f32 %v5764_v7, %v3244_v54  ;;  %v5861_v27 = vmul.f32 %v5761_v42, %v3213_v57  ;;  %v3250_v18 = vld [vmem:[#allocation3 + $0x40] sm:$0x1] }
  0x9e   :  { %v3215_v49 = vld [vmem:[#allocation3 + $0x70] sm:$0x7f]  ;;  %v3281_v56 = vmul.f32 %v5764_v7, %v3248_v16  ;;  %9154 = vst [vmem:[#allocation24_spill] sm:$0xff] %v5868_v25  ;;  %v3252_v44 = vld [vmem:[#allocation3 + $0x60] sm:$0xfc]  ;;  %v3283_v14 = vmul.f32 %v5764_v7, %v3250_v18  ;;  %v3339_v23 = vrot.slane %v5837_v63, 2 }
  0x9f   :  { %v3217_v21 = vld [vmem:[#allocation3 + $0x30] sm:$0x7f]  ;;  %v3219_v61 = vld [vmem:[#allocation3 + $0x48] sm:$0x7f]  ;;  %v5871_v10 = vmul.f32 %v5761_v42, %v3215_v49  ;;  %v3258_v13 = vld [vmem:[#allocation3 + $0xa0] sm:$0x1]  ;;  %v3285_v12 = vmul.f32 %v5764_v7, %v3252_v44 }
  0xa0   :  { %v3221_v20 = vld [vmem:[#allocation3] sm:$0x7f]  ;;  %v5874_v47 = vmul.f32 %v5761_v42, %v3217_v21  ;;  %v5884_v55 = vmul.f32 %v5761_v42, %v3219_v61  ;;  %v3254_v32 = vld [vmem:[#allocation3 + $0x68] sm:$0x1]  ;;  %v3256_v29 = vld [vmem:[#allocation3 + $0x70] sm:$0xfc]  ;;  %v3291_v18 = vmul.f32 %v5764_v7, %v3258_v13 }
  0xa1   :  { %v5887_v22 = vmul.f32 %v5761_v42, %v3221_v20  ;;  %v4593_v54 = vld [vmem:[%s8891_s2 + $0xb0] sm:$0xff]  ;;  %v3264_v16 = vld [vmem:[#allocation3 + $0x48] sm:$0xfc]  ;;  %v3287_v49 = vmul.f32 %v5764_v7, %v3254_v32  ;;  %v3289_v21 = vmul.f32 %v5764_v7, %v3256_v29  ;;  %v3266_v20 = vld [vmem:[#allocation3 + $0xc0] sm:$0x1]  ;;  %v3340_v41 = vrot.slane %v5840_v62, 2 }
  0xa2   :  { %v5893_v0 = vunpack.c.l.bf16 %v4593_v54  ;;  %v3260_v57 = vld [vmem:[#allocation3 + $0x30] sm:$0xfc]  ;;  %v3262_v60 = vld [vmem:[#allocation3 + $0xf0] sm:$0x1]  ;;  %v9156_v40 = vld [vmem:[#allocation11_spill] sm:$0xff]  ;;  %v3297_v59 = vmul.f32 %v5764_v7, %v3264_v16  ;;  %v3299_v29 = vmul.f32 %v5764_v7, %v3266_v20  ;;  %v3345_v11 = vrot.slane %v3277_v53, 2 }
  0xa3   :  { %v5901_v61 = vmul.f32 %v9156_v40, %v8955_v4  ;;  %v3268_v44 = vld [vmem:[#allocation3] sm:$0xfc]  ;;  %v3270_v28 = vld [vmem:[#allocation3 + $0x98] sm:$0x1]  ;;  %v3293_v54 = vmul.f32 %v5764_v7, %v3260_v57  ;;  %v3295_v36 = vmul.f32 %v5764_v7, %v3262_v60  ;;  %v5908_v32 = vmul.f32 %v9156_v40, %v5781_v35 }
  0xa4   :  { %9155 = vst [vmem:[#allocation20_spill] sm:$0xff] %v5893_v0  ;;  %v3301_v13 = vmul.f32 %v5764_v7, %v3268_v44  ;;  %v3303_v4 = vmul.f32 %v5764_v7, %v3270_v28  ;;  %v3346_v57 = vrot.slane %v3279_v46, 2  ;;  %v3351_v50 = vrot.slane %v3281_v56, 2  ;;  %v3417_v44 = vld [vmem:[#allocation3 + $0xc8] sm:$0xf0] }
  0xa5   :  { %v3352_v60 = vrot.slane %v3283_v14, 2  ;;  %v3357_v52 = vrot.slane %v3285_v12, 2  ;;  %v3358_v16 = vrot.slane %v3287_v49, 2  ;;  %v3363_v42 = vrot.slane %v3289_v21, 2  ;;  %v3419_v53 = vld [vmem:[#allocation3 + $0x78] sm:$0x7] }
  0xa6   :  { %v3341_v33 = vsel %vm426_vm1, %v3339_v23, %v3340_v41  ;;  %v3347_v2 = vsel %vm426_vm1, %v3345_v11, %v3346_v57  ;;  %v3364_v20 = vrot.slane %v3291_v18, 2  ;;  %v3369_v58 = vrot.slane %v3293_v54, 2  ;;  %v3421_v46 = vld [vmem:[#allocation3 + $0x90] sm:$0xf0]  ;;  %v3423_v21 = vld [vmem:[#allocation3 + $0xa8] sm:$0x7] }
  0xa7   :  { %v3353_v28 = vsel %vm426_vm1, %v3351_v50, %v3352_v60  ;;  %v3359_v63 = vsel %vm426_vm1, %v3357_v52, %v3358_v16  ;;  %v3370_v7 = vrot.slane %v3295_v36, 2  ;;  %v3375_v62 = vrot.slane %v3297_v59, 2  ;;  %v3425_v50 = vld [vmem:[#allocation3 + $0xb0] sm:$0xf0]  ;;  %v3427_v59 = vld [vmem:[#allocation3 + $0x40] sm:$0x7] }
  0xa8   :  { %v3365_v56 = vsel %vm426_vm1, %v3363_v42, %v3364_v20  ;;  %v3376_v14 = vrot.slane %v3299_v29, 2  ;;  %v3381_v12 = vrot.slane %v3301_v13, 2  ;;  %v3382_v49 = vrot.slane %v3303_v4, 2  ;;  %v3429_v36 = vld [vmem:[#allocation3 + $0x60] sm:$0xf0] }
  0xa9   :  { %v3371_v41 = vsel %vm426_vm1, %v3369_v58, %v3370_v7  ;;  %v5922_v11 = vadd.f32 %v3341_v33, %v5834_v26  ;;  %v5925_v23 = vadd.f32 %v3347_v2, %v5848_v8  ;;  %v5928_v52 = vadd.f32 %v3353_v28, %v5851_v51  ;;  %v3431_v33 = vld [vmem:[#allocation3 + $0x68] sm:$0x7]  ;;  %v3433_v7 = vld [vmem:[#allocation3 + $0x70] sm:$0xf0]  ;;  %v3435_v2 = vld [vmem:[#allocation3 + $0xa0] sm:$0x7] }
  0xaa   :  { %v3377_v42 = vsel %vm426_vm1, %v3375_v62, %v3376_v14  ;;  %v3383_v18 = vsel %vm426_vm1, %v3381_v12, %v3382_v49  ;;  %v5933_v4 = vadd.f32 %v3359_v63, %v5861_v27  ;;  %v5936_v58 = vadd.f32 %v3365_v56, %v5871_v10  ;;  %v3437_v54 = vld [vmem:[#allocation3 + $0x30] sm:$0xf0]  ;;  %v3439_v29 = vld [vmem:[#allocation3 + $0xf0] sm:$0x7]  ;;  %v3441_v13 = vld [vmem:[#allocation3 + $0x48] sm:$0xf0] }
  0xab   :  { %v5939_v26 = vadd.f32 %v3371_v41, %v5874_v47  ;;  %v5942_v8 = vadd.f32 %v3377_v42, %v5884_v55  ;;  %v5945_v51 = vadd.f32 %v3383_v18, %v5887_v22  ;;  %v3450_v27 = vmul.f32 %v5767_v17, %v3417_v44  ;;  %v3443_v57 = vld [vmem:[#allocation3 + $0xc0] sm:$0x7]  ;;  %v3445_v10 = vld [vmem:[#allocation3] sm:$0xf0]  ;;  %v3447_v60 = vld [vmem:[#allocation3 + $0x98] sm:$0x7] }
  0xac   :  { %v3452_v16 = vmul.f32 %v5767_v17, %v3419_v53  ;;  %v3454_v20 = vmul.f32 %v5767_v17, %v3421_v46  ;;  %v3456_v47 = vmul.f32 %v5767_v17, %v3423_v21  ;;  %v3458_v55 = vmul.f32 %v5767_v17, %v3425_v50 }
  0xad   :  { %v3460_v28 = vmul.f32 %v5767_v17, %v3427_v59  ;;  %v3462_v22 = vmul.f32 %v5767_v17, %v3429_v36  ;;  %v3464_v63 = vmul.f32 %v5767_v17, %v3431_v33  ;;  %v3466_v62 = vmul.f32 %v5767_v17, %v3433_v7 }
  0xae   :  { %v3468_v44 = vmul.f32 %v5767_v17, %v3435_v2  ;;  %v3470_v56 = vmul.f32 %v5767_v17, %v3437_v54  ;;  %v3472_v53 = vmul.f32 %v5767_v17, %v3439_v29  ;;  %v3474_v46 = vmul.f32 %v5767_v17, %v3441_v13 }
  0xaf   :  { %v3476_v14 = vmul.f32 %v5767_v17, %v3443_v57  ;;  %v3478_v12 = vmul.f32 %v5767_v17, %v3445_v10  ;;  %v3480_v49 = vmul.f32 %v5767_v17, %v3447_v60  ;;  %v3516_v21 = vrot.slane %v3450_v27, 4  ;;  %v3594_v57 = vld [vmem:[#allocation3 + $0xc8] sm:$0xc0] }
  0xb0   :  { %v3517_v41 = vrot.slane %v3452_v16, 4  ;;  %v3522_v50 = vrot.slane %v3454_v20, 4  ;;  %v3523_v59 = vrot.slane %v3456_v47, 4  ;;  %v3528_v36 = vrot.slane %v3458_v55, 4  ;;  %v3596_v20 = vld [vmem:[#allocation3 + $0x78] sm:$0x1f] }
  0xb1   :  { %v3529_v42 = vrot.slane %v3460_v28, 4  ;;  %v3534_v18 = vrot.slane %v3462_v22, 4  ;;  %v3535_v33 = vrot.slane %v3464_v63, 4  ;;  %v3540_v7 = vrot.slane %v3466_v62, 4  ;;  %v3598_v47 = vld [vmem:[#allocation3 + $0x90] sm:$0xc0] }
  0xb2   :  { %v3518_v2 = vsel %vm830_vm3, %v3516_v21, %v3517_v41  ;;  %v3524_v54 = vsel %vm830_vm3, %v3522_v50, %v3523_v59  ;;  %v3541_v29 = vrot.slane %v3468_v44, 4  ;;  %v3546_v13 = vrot.slane %v3470_v56, 4  ;;  %v3600_v62 = vld [vmem:[#allocation3 + $0xa8] sm:$0x1f]  ;;  %v3606_v50 = vld [vmem:[#allocation3 + $0x60] sm:$0xc0] }
  0xb3   :  { %v3530_v10 = vsel %vm830_vm3, %v3528_v36, %v3529_v42  ;;  %v3536_v27 = vsel %vm830_vm3, %v3534_v18, %v3535_v33  ;;  %v3547_v60 = vrot.slane %v3472_v53, 4  ;;  %v3552_v16 = vrot.slane %v3474_v46, 4  ;;  %v3602_v53 = vld [vmem:[#allocation3 + $0xb0] sm:$0xc0]  ;;  %v3604_v46 = vld [vmem:[#allocation3 + $0x40] sm:$0x1f] }
  0xb4   :  { %v3542_v55 = vsel %vm830_vm3, %v3540_v7, %v3541_v29  ;;  %v3553_v28 = vrot.slane %v3476_v14, 4  ;;  %v3558_v22 = vrot.slane %v3478_v12, 4  ;;  %v3559_v63 = vrot.slane %v3480_v49, 4  ;;  %v3610_v36 = vld [vmem:[#allocation3 + $0x70] sm:$0xc0] }
  0xb5   :  { %v3548_v21 = vsel %vm830_vm3, %v3546_v13, %v3547_v60  ;;  %v5970_v44 = vadd.f32 %v3518_v2, %v5922_v11  ;;  %v5973_v56 = vadd.f32 %v3524_v54, %v5925_v23  ;;  %v5976_v41 = vadd.f32 %v3530_v10, %v5928_v52  ;;  %v3608_v11 = vld [vmem:[#allocation3 + $0x68] sm:$0x1f]  ;;  %v3612_v23 = vld [vmem:[#allocation3 + $0xa0] sm:$0x1f]  ;;  %v3614_v33 = vld [vmem:[#allocation3 + $0x30] sm:$0xc0] }
  0xb6   :  { %v3554_v59 = vsel %vm830_vm3, %v3552_v16, %v3553_v28  ;;  %v3560_v14 = vsel %vm830_vm3, %v3558_v22, %v3559_v63  ;;  %v5981_v12 = vadd.f32 %v3536_v27, %v5933_v4  ;;  %v5984_v49 = vadd.f32 %v3542_v55, %v5936_v58  ;;  %v3616_v7 = vld [vmem:[#allocation3 + $0xf0] sm:$0x1f]  ;;  %v3618_v2 = vld [vmem:[#allocation3 + $0x48] sm:$0xc0]  ;;  %v3620_v54 = vld [vmem:[#allocation3 + $0xc0] sm:$0x1f] }
  0xb7   :  { %v5987_v42 = vadd.f32 %v3548_v21, %v5939_v26  ;;  %v5990_v52 = vadd.f32 %v3554_v59, %v5942_v8  ;;  %v5993_v18 = vadd.f32 %v3560_v14, %v5945_v51  ;;  %v3627_v4 = vmul.f32 %v5770_v30, %v3594_v57  ;;  %v3622_v58 = vld [vmem:[#allocation3] sm:$0xc0]  ;;  %v3624_v29 = vld [vmem:[#allocation3 + $0x98] sm:$0x1f] }
  0xb8   :  { %v3629_v13 = vmul.f32 %v5770_v30, %v3596_v20  ;;  %v3631_v10 = vmul.f32 %v5770_v30, %v3598_v47  ;;  %v3633_v26 = vmul.f32 %v5770_v30, %v3600_v62  ;;  %v3635_v8 = vmul.f32 %v5770_v30, %v3602_v53 }
  0xb9   :  { %v3637_v27 = vmul.f32 %v5770_v30, %v3604_v46  ;;  %v3639_v51 = vmul.f32 %v5770_v30, %v3606_v50  ;;  %v3641_v60 = vmul.f32 %v5770_v30, %v3608_v11  ;;  %v3643_v16 = vmul.f32 %v5770_v30, %v3610_v36 }
  0xba   :  { %v3645_v57 = vmul.f32 %v5770_v30, %v3612_v23  ;;  %v3647_v55 = vmul.f32 %v5770_v30, %v3614_v33  ;;  %v3649_v20 = vmul.f32 %v5770_v30, %v3616_v7  ;;  %v3651_v47 = vmul.f32 %v5770_v30, %v3618_v2 }
  0xbb   :  { %v3653_v28 = vmul.f32 %v5770_v30, %v3620_v54  ;;  %v3655_v22 = vmul.f32 %v5770_v30, %v3622_v58  ;;  %v3657_v63 = vmul.f32 %v5770_v30, %v3624_v29  ;;  %v3693_v62 = vrot.slane %v3627_v4, 6 }
  0xbc   :  { %v3694_v21 = vrot.slane %v3629_v13, 6  ;;  %v3699_v53 = vrot.slane %v3631_v10, 6  ;;  %v3700_v46 = vrot.slane %v3633_v26, 6  ;;  %v3705_v50 = vrot.slane %v3635_v8, 6  ;;  %v3771_v13 = vld [vmem:[#allocation3 + $0x78] sm:$0x7f] }
  0xbd   :  { %v3706_v59 = vrot.slane %v3637_v27, 6  ;;  %v3711_v14 = vrot.slane %v3639_v51, 6  ;;  %v3712_v11 = vrot.slane %v3641_v60, 6  ;;  %v3717_v36 = vrot.slane %v3643_v16, 6  ;;  %v3773_v16 = vld [vmem:[#allocation3 + $0xa8] sm:$0x7f] }
  0xbe   :  { %v3695_v23 = vsel %vm1514_vm4, %v3693_v62, %v3694_v21  ;;  %v3701_v33 = vsel %vm1514_vm4, %v3699_v53, %v3700_v46  ;;  %v3718_v7 = vrot.slane %v3645_v57, 6  ;;  %v3723_v2 = vrot.slane %v3647_v55, 6  ;;  %v3775_v62 = vld [vmem:[#allocation3 + $0x40] sm:$0x7f]  ;;  %v3777_v21 = vld [vmem:[#allocation3 + $0x68] sm:$0x7f] }
  0xbf   :  { %v3707_v54 = vsel %vm1514_vm4, %v3705_v50, %v3706_v59  ;;  %v3713_v58 = vsel %vm1514_vm4, %v3711_v14, %v3712_v11  ;;  %v3724_v29 = vrot.slane %v3649_v20, 6  ;;  %v3729_v4 = vrot.slane %v3651_v47, 6  ;;  %v3779_v53 = vld [vmem:[#allocation3 + $0xa0] sm:$0x7f]  ;;  %v3785_v14 = vld [vmem:[#allocation3 + $0x98] sm:$0x7f] }
  0xc0   :  { %v9157_v10 = vand.u32 1, %v9145_v31  ;;  %v9158_v26 = vmov 0  ;;  %v3719_v8 = vsel %vm1514_vm4, %v3717_v36, %v3718_v7  ;;  %v3730_v27 = vrot.slane %v3653_v28, 6  ;;  %v3783_v59 = vld [vmem:[#allocation3 + $0xc0] sm:$0x7f] }
  0xc1   :  { %v3735_v51 = vrot.slane %v3655_v22, 6  ;;  %v3736_v60 = vrot.slane %v3657_v63, 6  ;;  %v3725_v57 = vsel %vm1514_vm4, %v3723_v2, %v3724_v29  ;;  %v3755_v55 = vadd.f32 %v3695_v23, %v5970_v44  ;;  %v3781_v63 = vld [vmem:[#allocation3 + $0xf0] sm:$0x7f] }
  0xc2   :  { %vm6017_vm5 = vcmp.eq.s32.totalorder %v9157_v10, 0  ;;  %v3757_v20 = vadd.f32 %v3701_v33, %v5973_v56  ;;  %v3759_v47 = vadd.f32 %v3707_v54, %v5976_v41  ;;  %v3731_v46 = vsel %vm1514_vm4, %v3729_v4, %v3730_v27 }
  0xc3   :  { %v9159_v26 = vsel %vm6017_vm5, 4294967295, %v9158_v26  ;;  %v3737_v50 = vsel %vm1514_vm4, %v3735_v51, %v3736_v60  ;;  %v3761_v28 = vadd.f32 %v3713_v58, %v5981_v12  ;;  %v3763_v22 = vadd.f32 %v3719_v8, %v5984_v49 }
  0xc4   :  { %9160 = vst [vmem:[#allocation25_spill] sm:$0xff] %v9159_v26  ;;  %v3765_v44 = vadd.f32 %v3725_v57, %v5987_v42  ;;  %v3767_v56 = vadd.f32 %v3731_v46, %v5990_v52  ;;  %v3769_v41 = vadd.f32 %v3737_v50, %v5993_v18  ;;  %v3788_v11 = vmul.f32 %v5773_v43, %v3771_v13 }
  0xc5   :  { %v3790_v36 = vmul.f32 %v5773_v43, %v3773_v16  ;;  %v3792_v23 = vmul.f32 %v5773_v43, %v3775_v62  ;;  %v3794_v33 = vmul.f32 %v5773_v43, %v3777_v21  ;;  %v3796_v12 = vmul.f32 %v5773_v43, %v3779_v53 }
  0xc6   :  { %v3798_v49 = vmul.f32 %v5773_v43, %v3781_v63  ;;  %v3800_v7 = vmul.f32 %v5773_v43, %v3783_v59  ;;  %v3802_v42 = vmul.f32 %v5773_v43, %v3785_v14  ;;  %v3804_v2 = vadd.f32 %v3788_v11, %v3755_v55 }
  0xc7   :  { %v3806_v52 = vadd.f32 %v3790_v36, %v3757_v20  ;;  %v3808_v54 = vadd.f32 %v3792_v23, %v3759_v47  ;;  %v3810_v18 = vadd.f32 %v3794_v33, %v3761_v28  ;;  %v3812_v58 = vadd.f32 %v3796_v12, %v3763_v22 }
  0xc8   :  { %v3814_v29 = vadd.f32 %v3798_v49, %v3765_v44  ;;  %v3816_v4 = vadd.f32 %v3800_v7, %v3767_v56  ;;  %v3818_v13 = vadd.f32 %v3802_v42, %v3769_v41  ;;  %v3821_v10 = vadd.f32 %v5776_v1, %v3804_v2 }
  0xc9   :  { %v3823_v8 = vadd.f32 %v5776_v1, %v3806_v52  ;;  %v3825_v27 = vadd.f32 %v5776_v1, %v3808_v54  ;;  %v3827_v51 = vadd.f32 %v5776_v1, %v3810_v18  ;;  %v3829_v60 = vadd.f32 %v5776_v1, %v3812_v58 }
  0xca   :  { %v3831_v16 = vadd.f32 %v5776_v1, %v3814_v29  ;;  %v3833_v57 = vadd.f32 %v5776_v1, %v3816_v4  ;;  %v3835_v55 = vadd.f32 %v5776_v1, %v3818_v13  ;;  %v3837_v20 = vmax.f32 %v3821_v10, 0.0 }
  0xcb   :  { %v3839_v47 = vmax.f32 %v3823_v8, 0.0  ;;  %v3841_v62 = vmax.f32 %v3825_v27, 0.0  ;;  %v3843_v21 = vmax.f32 %v3827_v51, 0.0  ;;  %v3845_v53 = vmax.f32 %v3829_v60, 0.0 }
  0xcc   :  { %v3847_v46 = vmax.f32 %v3831_v16, 0.0  ;;  %v3849_v50 = vmax.f32 %v3833_v57, 0.0  ;;  %v3851_v28 = vmax.f32 %v3835_v55, 0.0  ;;  %v3853_v22 = vsel %vm6017_vm5, %v3837_v20, 0.0 }
  0xcd   :  { %v3855_v63 = vsel %vm6017_vm5, %v3839_v47, 0.0  ;;  %v3857_v59 = vsel %vm6017_vm5, %v3841_v62, 0.0  ;;  %v3859_v14 = vsel %vm6017_vm5, %v3843_v21, 0.0  ;;  %v3861_v44 = vsel %vm6017_vm5, %v3845_v53, 0.0 }
  0xce   :  { %v3863_v56 = vsel %vm6017_vm5, %v3847_v46, 0.0  ;;  %v3865_v41 = vsel %vm6017_vm5, %v3849_v50, 0.0  ;;  %v3867_v11 = vsel %vm6017_vm5, %v3851_v28, 0.0  ;;  %v3875_v36 = vsel %vm224_vm0, %v3853_v22, -inf }
  0xcf   :  { %v3876_v23 = vrot.slane %v3875_v36, 4  ;;  %v3889_v33 = vsel %vm224_vm0, %v3855_v63, -inf  ;;  %v3903_v12 = vsel %vm224_vm0, %v3857_v59, -inf  ;;  %v3917_v49 = vsel %vm224_vm0, %v3859_v14, -inf }
  0xd0   :  { %v3890_v7 = vrot.slane %v3889_v33, 4  ;;  %v3904_v42 = vrot.slane %v3903_v12, 4  ;;  %v3918_v2 = vrot.slane %v3917_v49, 4  ;;  %v3931_v52 = vsel %vm224_vm0, %v3861_v44, -inf }
  0xd1   :  { %v3877_v54 = vmax.f32 %v3875_v36, %v3876_v23  ;;  %v3932_v18 = vrot.slane %v3931_v52, 4  ;;  %v3945_v58 = vsel %vm224_vm0, %v3863_v56, -inf  ;;  %v3959_v29 = vsel %vm224_vm0, %v3865_v41, -inf }
  0xd2   :  { %v3891_v4 = vmax.f32 %v3889_v33, %v3890_v7  ;;  %v3905_v13 = vmax.f32 %v3903_v12, %v3904_v42  ;;  %v3919_v10 = vmax.f32 %v3917_v49, %v3918_v2  ;;  %v3946_v8 = vrot.slane %v3945_v58, 4 }
  0xd3   :  { %v3878_v27 = vrot.slane %v3877_v54, 2  ;;  %v3933_v51 = vmax.f32 %v3931_v52, %v3932_v18  ;;  %v3960_v60 = vrot.slane %v3959_v29, 4  ;;  %v3973_v16 = vsel %vm224_vm0, %v3867_v11, -inf }
  0xd4   :  { %v3892_v57 = vrot.slane %v3891_v4, 2  ;;  %v3906_v55 = vrot.slane %v3905_v13, 2  ;;  %v3920_v20 = vrot.slane %v3919_v10, 2  ;;  %v3947_v47 = vmax.f32 %v3945_v58, %v3946_v8 }
  0xd5   :  { %v3879_v62 = vmax.f32 %v3877_v54, %v3878_v27  ;;  %v3934_v21 = vrot.slane %v3933_v51, 2  ;;  %v3961_v53 = vmax.f32 %v3959_v29, %v3960_v60  ;;  %v3974_v46 = vrot.slane %v3973_v16, 4 }
  0xd6   :  { %v3893_v50 = vmax.f32 %v3891_v4, %v3892_v57  ;;  %v3907_v28 = vmax.f32 %v3905_v13, %v3906_v55  ;;  %v3921_v22 = vmax.f32 %v3919_v10, %v3920_v20  ;;  %v3948_v63 = vrot.slane %v3947_v47, 2 }
  0xd7   :  { %v3880_v59 = vrot.slane %v3879_v62, 1  ;;  %v3935_v14 = vmax.f32 %v3933_v51, %v3934_v21  ;;  %v3962_v44 = vrot.slane %v3961_v53, 2  ;;  %v3975_v56 = vmax.f32 %v3973_v16, %v3974_v46 }
  0xd8   :  { %v3894_v41 = vrot.slane %v3893_v50, 1  ;;  %v3908_v11 = vrot.slane %v3907_v28, 1  ;;  %v3922_v36 = vrot.slane %v3921_v22, 1  ;;  %v3949_v23 = vmax.f32 %v3947_v47, %v3948_v63 }
  0xd9   :  { %v3881_v33 = vmax.f32 %v3879_v62, %v3880_v59  ;;  %v3936_v12 = vrot.slane %v3935_v14, 1  ;;  %v3963_v49 = vmax.f32 %v3961_v53, %v3962_v44  ;;  %v3976_v7 = vrot.slane %v3975_v56, 2 }
  0xda   :  { %v3895_v42 = vmax.f32 %v3893_v50, %v3894_v41  ;;  %v3909_v2 = vmax.f32 %v3907_v28, %v3908_v11  ;;  %v3923_v52 = vmax.f32 %v3921_v22, %v3922_v36  ;;  %v3950_v54 = vrot.slane %v3949_v23, 1 }
  0xdb   :  { %v3937_v18 = vmax.f32 %v3935_v14, %v3936_v12  ;;  %v3964_v58 = vrot.slane %v3963_v49, 1  ;;  %v3977_v29 = vmax.f32 %v3975_v56, %v3976_v7  ;;  %v9161_v4 = vunpack.c.l.bf16 %v5786_v48  ;;  %v6145_v7 = vld [vmem:[%s8891_s2 + $0x10] sm:$0x11] }
  0xdc   :  { %v3951_v10 = vmax.f32 %v3949_v23, %v3950_v54  ;;  %v4010_v8 = vsel %vm3996_vm6, %v3895_v42, %v3881_v33  ;;  %v6081_v27 = vmul.f32 %v9156_v40, %v5792_v37  ;;  %v9162_v51 = vunpack.c.l.bf16 %v5797_v15 }
  0xdd   :  { %v6076_v13 = vmul.f32 %v9156_v40, %v9161_v4  ;;  %v3965_v16 = vmax.f32 %v3963_v49, %v3964_v58  ;;  %v3978_v57 = vrot.slane %v3977_v29, 1  ;;  %v4011_v55 = vsel %vm3998_vm7, %v3909_v2, %v4010_v8  ;;  %v6164_v58 = vld [vmem:[%s8891_s2 + $0x58] sm:$0x11]  ;;  %v6170_v4 = vld [vmem:[%s8891_s2 + $0x70] sm:$0x11] }
  0xde   :  { %v6086_v60 = vmul.f32 %v9156_v40, %v9162_v51  ;;  %v6091_v20 = vmul.f32 %v9156_v40, %v5803_v3  ;;  %v4012_v47 = vsel %vm4000_vm8, %v3923_v52, %v4011_v55  ;;  %v9163_v62 = vunpack.c.l.bf16 %v5808_v9  ;;  %v6152_v52 = vld [vmem:[%s8891_s2 + $0x28] sm:$0x11]  ;;  %9168 = vst [vmem:[#allocation21_spill] sm:$0xff] %v6170_v4  ;;  %v6188_v55 = vld [vmem:[%s8891_s2 + $0xb8] sm:$0x11] }
  0xdf   :  { %v6101_v53 = vmul.f32 %v9156_v40, %v5814_v45  ;;  %v9164_v46 = vunpack.c.l.bf16 %v5819_v39  ;;  %v3979_v28 = vmax.f32 %v3977_v29, %v3978_v57  ;;  %v4013_v22 = vsel %vm4002_vm9, %v3937_v18, %v4012_v47  ;;  %v6176_v8 = vld [vmem:[%s8891_s2 + $0x88] sm:$0x11]  ;;  %9171 = vst [vmem:[#allocation31_spill] sm:$0xff] %v6188_v55 }
  0xe0   :  { %v6097_v21 = vmul.f32 %v9156_v40, %v9163_v62  ;;  %v6111_v63 = vmul.f32 %v9156_v40, %v5825_v19  ;;  %v9165_v59 = vunpack.c.l.bf16 %v5830_v24  ;;  %v4014_v44 = vsel %vm4004_vm10, %v3951_v10, %v4013_v22  ;;  %9169 = vst [vmem:[#allocation26_spill] sm:$0xff] %v6176_v8 }
  0xe1   :  { %v6106_v50 = vmul.f32 %v9156_v40, %v9164_v46  ;;  %v6121_v56 = vmul.f32 %v9156_v40, %v5845_v5  ;;  %v9166_v41 = vunpack.c.l.bf16 %v5857_v6  ;;  %v6130_v36 = vmul.f32 %v9156_v40, %v5868_v25  ;;  %v9173_v46 = vld [vmem:[#allocation12_spill] sm:$0xff] }
  0xe2   :  { %v6116_v14 = vmul.f32 %v9156_v40, %v9165_v59  ;;  %v4015_v23 = vsel %vm4006_vm11, %v3965_v16, %v4014_v44  ;;  %v9167_v33 = vunpack.c.l.bf16 %v5880_v34  ;;  %v6140_v49 = vmul.f32 %v9156_v40, %v5893_v0  ;;  %v6182_v16 = vld [vmem:[%s8891_s2 + $0xa0] sm:$0x11] }
  0xe3   :  { %v6126_v11 = vmul.f32 %v9156_v40, %v9166_v41  ;;  %v8964_v42 = vunpack.c.l.bf16 %v6145_v7  ;;  %v4016_v2 = vsel %vm4008_vm12, %v3979_v28, %v4015_v23  ;;  %v8965_v54 = vunpack.c.l.bf16 %v6152_v52  ;;  %9170 = vst [vmem:[#allocation11_spill] sm:$0xff] %v6182_v16 }
  0xe4   :  { %v6136_v12 = vmul.f32 %v9156_v40, %v9167_v33  ;;  %v6158_v40 = vld [vmem:[%s8891_s2 + $0x40] sm:$0x11]  ;;  %v8967_v29 = vunpack.c.l.bf16 %v6164_v58  ;;  %4154 = vmatprep.mubr.f32.mxu0 %v4016_v2  ;;  %v8971_v10 = vunpack.c.l.bf16 %v6170_v4  ;;  %v9172_v62 = vunpack.c.l.bf16 %v5757_v38 }
  0xe5   :  { %v8966_v18 = vunpack.c.l.bf16 %v6158_v40  ;;  %v1926_v22 = vmul.f32 %v9173_v46, %v5781_v35  ;;  %v1928_v59 = vmul.f32 %v9173_v46, %v8964_v42  ;;  %v9174_v44 = vunpack.c.l.bf16 %v5786_v48 }
  0xe6   :  { %v1924_v28 = vmul.f32 %v9173_v46, %v9172_v62  ;;  %v1932_v23 = vmul.f32 %v9173_v46, %v5792_v37  ;;  %v1934_v38 = vmul.f32 %v9173_v46, %v8965_v54  ;;  %v9175_v33 = vmov %v9162_v51 }
  0xe7   :  { %v1930_v41 = vmul.f32 %v9173_v46, %v9174_v44  ;;  %v1936_v2 = vmul.f32 %v9173_v46, %v9175_v33  ;;  %v1938_v62 = vmul.f32 %v9173_v46, %v5803_v3  ;;  %v1940_v48 = vmul.f32 %v9173_v46, %v8966_v18 }
  0xe8   :  { %v9176_v44 = vunpack.c.l.bf16 %v5808_v9  ;;  %v1944_v47 = vmul.f32 %v9173_v46, %v5814_v45  ;;  %v1946_v15 = vmul.f32 %v9173_v46, %v8967_v29  ;;  %v9177_v33 = vunpack.c.l.bf16 %v5819_v39 }
  0xe9   :  { %v1950_v57 = vmul.f32 %v9173_v46, %v5825_v19  ;;  %v1952_v9 = vmul.f32 %v9173_v46, %v8971_v10  ;;  %v1956_v51 = vmul.f32 %v9173_v46, %v5845_v5  ;;  %v9179_v29 = vunpack.c.l.bf16 %v6176_v8 }
  0xea   :  { %v1942_v42 = vmul.f32 %v9173_v46, %v9176_v44  ;;  %v1948_v54 = vmul.f32 %v9173_v46, %v9177_v33  ;;  %v9178_v44 = vunpack.c.l.bf16 %v5830_v24  ;;  %v9180_v33 = vunpack.c.l.bf16 %v5857_v6 }
  0xeb   :  { %v1958_v39 = vmul.f32 %v9173_v46, %v9179_v29  ;;  %v1962_v26 = vmul.f32 %v9173_v46, %v5868_v25  ;;  %v9181_v10 = vunpack.c.l.bf16 %v6182_v16  ;;  %v1968_v43 = vmul.f32 %v9173_v46, %v5893_v0 }
  0xec   :  { %v1954_v18 = vmul.f32 %v9173_v46, %v9178_v44  ;;  %v1960_v31 = vmul.f32 %v9173_v46, %v9180_v33  ;;  %v9182_v44 = vunpack.c.l.bf16 %v5880_v34  ;;  %v9183_v29 = vunpack.c.l.bf16 %v6188_v55 }
  0xed   :  { %v1964_v24 = vmul.f32 %v9173_v46, %v9181_v10  ;;  %v2020_v30 = vrot.slane %v1924_v28, 1  ;;  %v2021_v33 = vrot.slane %v1926_v22, 1  ;;  %v2026_v17 = vrot.slane %v1928_v59, 1 }
  0xee   :  { %v1966_v1 = vmul.f32 %v9173_v46, %v9182_v44  ;;  %v1970_v6 = vmul.f32 %v9173_v46, %v9183_v29  ;;  %v2030_v8 = vrot.slane %v1930_v41, 1  ;;  %v2031_v25 = vrot.slane %v1932_v23, 1 }
  0xef   :  { %v2036_v5 = vrot.slane %v1934_v38, 1  ;;  %v2040_v16 = vrot.slane %v1936_v2, 1  ;;  %v2041_v4 = vrot.slane %v1938_v62, 1  ;;  %v2022_v10 = vsel %vm224_vm0, %v2020_v30, %v2021_v33 }
  0xf0   :  { %v2027_v34 = vsel %vm224_vm0, %v2021_v33, %v2026_v17  ;;  %v2046_v44 = vrot.slane %v1940_v48, 1  ;;  %v2050_v19 = vrot.slane %v1942_v42, 1  ;;  %v2032_v0 = vsel %vm224_vm0, %v2030_v8, %v2031_v25  ;;  %v6352_v33 = vld [vmem:[%s8891_s2 + $0x78] sm:$0xee] }
  0xf1   :  { %v2037_v55 = vsel %vm224_vm0, %v2031_v25, %v2036_v5  ;;  %v2042_v46 = vsel %vm224_vm0, %v2040_v16, %v2041_v4  ;;  %v2051_v28 = vrot.slane %v1944_v47, 1  ;;  %v2056_v59 = vrot.slane %v1946_v15, 1  ;;  %9185 = vst [vmem:[#allocation32_spill] sm:$0xff] %v6352_v33 }
  0xf2   :  { %v2047_v22 = vsel %vm224_vm0, %v2041_v4, %v2046_v44  ;;  %v2060_v41 = vrot.slane %v1948_v54, 1  ;;  %v2061_v23 = vrot.slane %v1950_v57, 1  ;;  %v2066_v2 = vrot.slane %v1952_v9, 1 }
  0xf3   :  { %v2052_v38 = vsel %vm224_vm0, %v2050_v19, %v2051_v28  ;;  %v2070_v30 = vrot.slane %v1954_v18, 1  ;;  %v2071_v62 = vrot.slane %v1956_v51, 1  ;;  %v2057_v17 = vsel %vm224_vm0, %v2051_v28, %v2056_v59 }
  0xf4   :  { %v2062_v42 = vsel %vm224_vm0, %v2060_v41, %v2061_v23  ;;  %v2076_v8 = vrot.slane %v1958_v39, 1  ;;  %v2080_v48 = vrot.slane %v1960_v31, 1  ;;  %v2067_v5 = vsel %vm224_vm0, %v2061_v23, %v2066_v2 }
  0xf5   :  { %v2072_v25 = vsel %vm224_vm0, %v2070_v30, %v2071_v62  ;;  %v2081_v16 = vrot.slane %v1962_v26, 1  ;;  %v2086_v4 = vrot.slane %v1964_v24, 1  ;;  %v2090_v57 = vrot.slane %v1966_v1, 1 }
  0xf6   :  { %v2077_v54 = vsel %vm224_vm0, %v2071_v62, %v2076_v8  ;;  %v2091_v47 = vrot.slane %v1968_v43, 1  ;;  %v2096_v19 = vrot.slane %v1970_v6, 1  ;;  %v6270_v15 = vadd.f32 %v2022_v10, %v5901_v61 }
  0xf7   :  { %v2082_v18 = vsel %vm224_vm0, %v2080_v48, %v2081_v16  ;;  %v2087_v51 = vsel %vm224_vm0, %v2081_v16, %v2086_v4  ;;  %v6273_v31 = vadd.f32 %v2027_v34, %v5908_v32  ;;  %v6278_v39 = vadd.f32 %v2032_v0, %v6076_v13  ;;  %v6358_v34 = vld [vmem:[%s8891_s2 + $0x90] sm:$0xee] }
  0xf8   :  { %v2092_v9 = vsel %vm224_vm0, %v2090_v57, %v2091_v47  ;;  %v2097_v26 = vsel %vm224_vm0, %v2091_v47, %v2096_v19  ;;  %v6281_v43 = vadd.f32 %v2037_v55, %v6081_v27  ;;  %v6284_v1 = vadd.f32 %v2042_v46, %v6086_v60  ;;  %v6346_v55 = vld [vmem:[%s8891_s2 + $0x60] sm:$0xee]  ;;  %9186 = vst [vmem:[#allocation33_spill] sm:$0xff] %v6358_v34  ;;  %v6364_v46 = vld [vmem:[%s8891_s2 + $0xa8] sm:$0xee]  ;;  %v9194_v57 = vld [vmem:[#allocation21_spill] sm:$0xff] }
  0xf9   :  { %v6287_v24 = vadd.f32 %v2047_v22, %v6091_v20  ;;  %v6290_v61 = vadd.f32 %v2052_v38, %v6097_v21  ;;  %v6293_v32 = vadd.f32 %v2057_v17, %v6101_v53  ;;  %v6296_v29 = vadd.f32 %v2062_v42, %v6106_v50  ;;  %v6322_v50 = vld [vmem:[%s8891_s2] sm:$0xee]  ;;  %9184 = vst [vmem:[#allocation12_spill] sm:$0xff] %v6346_v55  ;;  %v9188_v22 = vld [vmem:[#allocation13_spill] sm:$0xff] }
  0xfa   :  { %v6299_v0 = vadd.f32 %v2067_v5, %v6111_v63  ;;  %v6302_v13 = vadd.f32 %v2072_v25, %v6116_v14  ;;  %v6305_v27 = vadd.f32 %v2077_v54, %v6121_v56  ;;  %v6308_v60 = vadd.f32 %v2082_v18, %v6126_v11  ;;  %v6328_v14 = vld [vmem:[%s8891_s2 + $0x18] sm:$0xee]  ;;  %v6334_v11 = vld [vmem:[%s8891_s2 + $0x30] sm:$0xee]  ;;  %9187 = vst [vmem:[#allocation34_spill] sm:$0xff] %v6364_v46  ;;  %v9193_v54 = vld [vmem:[#allocation23_spill] sm:$0xff] }
  0xfb   :  { %v6311_v20 = vadd.f32 %v2087_v51, %v6130_v36  ;;  %v6314_v21 = vadd.f32 %v2092_v9, %v6136_v12  ;;  %v6317_v53 = vadd.f32 %v2097_v26, %v6140_v49  ;;  %v8997_v63 = vunpack.c.l.bf16 %v6322_v50  ;;  %v6340_v12 = vld [vmem:[%s8891_s2 + $0x48] sm:$0xee]  ;;  %v9197_v9 = vld [vmem:[#allocation26_spill] sm:$0xff] }
  0xfc   :  { %v8996_v56 = vunpack.c.l.bf16 %v6328_v14  ;;  %v8995_v36 = vunpack.c.l.bf16 %v6334_v11  ;;  %v8994_v49 = vunpack.c.l.bf16 %v6340_v12  ;;  %v8992_v6 = vunpack.c.l.bf16 %v6346_v55  ;;  %v9196_v51 = vld [vmem:[#allocation19_spill] sm:$0xff] }
  0xfd   :  { %v8993_v10 = vunpack.c.l.bf16 %v6352_v33  ;;  %v8998_v44 = vunpack.c.l.bf16 %v6358_v34  ;;  %v9002_v28 = vunpack.c.l.bf16 %v6364_v46  ;;  %v2189_v59 = vmul.f32 %v9188_v22, %v8997_v63 }
  0xfe   :  { %v2191_v41 = vmul.f32 %v9188_v22, %v5781_v35  ;;  %v9189_v23 = vunpack.c.l.bf16 %v6145_v7  ;;  %v2195_v2 = vmul.f32 %v9188_v22, %v8996_v56  ;;  %v2197_v30 = vmul.f32 %v9188_v22, %v5792_v37 }
  0xff   :  { %v9190_v62 = vunpack.c.l.bf16 %v6152_v52  ;;  %v2201_v42 = vmul.f32 %v9188_v22, %v8995_v36  ;;  %v2203_v7 = vmul.f32 %v9188_v22, %v5803_v3  ;;  %v9191_v8 = vunpack.c.l.bf16 %v6158_v40  ;;  %v9203_v36 = vld [vmem:[#allocation31_spill] sm:$0xff] }
 0x100   :  { %v2193_v38 = vmul.f32 %v9188_v22, %v9189_v23  ;;  %v2207_v5 = vmul.f32 %v9188_v22, %v8994_v49  ;;  %v2209_v52 = vmul.f32 %v9188_v22, %v5814_v45  ;;  %v9192_v25 = vunpack.c.l.bf16 %v6164_v58  ;;  %v9202_v49 = vld [vmem:[#allocation20_spill] sm:$0xff] }
 0x101   :  { %v2199_v17 = vmul.f32 %v9188_v22, %v9190_v62  ;;  %v2205_v48 = vmul.f32 %v9188_v22, %v9191_v8  ;;  %v2213_v4 = vmul.f32 %v9188_v22, %v8992_v6  ;;  %v2215_v40 = vmul.f32 %v9188_v22, %v9193_v54  ;;  %v9199_v8 = vld [vmem:[#allocation24_spill] sm:$0xff] }
 0x102   :  { %v2211_v16 = vmul.f32 %v9188_v22, %v9192_v25  ;;  %v9195_v47 = vunpack.c.l.bf16 %v9194_v57  ;;  %v2219_v18 = vmul.f32 %v9188_v22, %v8993_v10  ;;  %v2221_v58 = vmul.f32 %v9188_v22, %v9196_v51  ;;  %v9200_v57 = vld [vmem:[#allocation11_spill] sm:$0xff] }
 0x103   :  { %v9198_v26 = vunpack.c.l.bf16 %v9197_v9  ;;  %v2225_v62 = vmul.f32 %v9188_v22, %v8998_v44  ;;  %v2227_v25 = vmul.f32 %v9188_v22, %v9199_v8  ;;  %v2231_v10 = vmul.f32 %v9188_v22, %v9002_v28 }
 0x104   :  { %v2217_v19 = vmul.f32 %v9188_v22, %v9195_v47  ;;  %v9201_v47 = vunpack.c.l.bf16 %v9200_v57  ;;  %v2233_v9 = vmul.f32 %v9188_v22, %v9202_v49  ;;  %v2285_v63 = vrot.slane %v2189_v59, 2 }
 0x105   :  { %v2223_v23 = vmul.f32 %v9188_v22, %v9198_v26  ;;  %v9204_v26 = vunpack.c.l.bf16 %v9203_v36  ;;  %v2286_v44 = vrot.slane %v2191_v41, 2  ;;  %v2291_v34 = vrot.slane %v2193_v38, 2 }
 0x106   :  { %v2229_v6 = vmul.f32 %v9188_v22, %v9201_v47  ;;  %v2295_v51 = vrot.slane %v2195_v2, 2  ;;  %v2296_v8 = vrot.slane %v2197_v30, 2  ;;  %v2301_v33 = vrot.slane %v2199_v17, 2 }
 0x107   :  { %v2235_v56 = vmul.f32 %v9188_v22, %v9204_v26  ;;  %v2305_v57 = vrot.slane %v2201_v42, 2  ;;  %v2306_v54 = vrot.slane %v2203_v7, 2  ;;  %v2287_v47 = vsel %vm426_vm1, %v2285_v63, %v2286_v44  ;;  %v6528_v26 = vld [vmem:[%s8891_s2 + $0x88] sm:$0x33] }
 0x108   :  { %v2292_v46 = vsel %vm426_vm1, %v2286_v44, %v2291_v34  ;;  %v2311_v28 = vrot.slane %v2205_v48, 2  ;;  %v2315_v55 = vrot.slane %v2207_v5, 2  ;;  %v2297_v49 = vsel %vm426_vm1, %v2295_v51, %v2296_v8  ;;  %9206 = vst [vmem:[#allocation21_spill] sm:$0xff] %v6528_v26 }
 0x109   :  { %v2302_v36 = vsel %vm426_vm1, %v2296_v8, %v2301_v33  ;;  %v2307_v22 = vsel %vm426_vm1, %v2305_v57, %v2306_v54  ;;  %v2316_v59 = vrot.slane %v2209_v52, 2  ;;  %v2321_v38 = vrot.slane %v2211_v16, 2 }
 0x10a   :  { %v2312_v41 = vsel %vm426_vm1, %v2306_v54, %v2311_v28  ;;  %v2325_v2 = vrot.slane %v2213_v4, 2  ;;  %v2326_v30 = vrot.slane %v2215_v40, 2  ;;  %v2331_v42 = vrot.slane %v2217_v19, 2 }
 0x10b   :  { %v2317_v17 = vsel %vm426_vm1, %v2315_v55, %v2316_v59  ;;  %v2335_v63 = vrot.slane %v2219_v18, 2  ;;  %v2336_v7 = vrot.slane %v2221_v58, 2  ;;  %v2322_v34 = vsel %vm426_vm1, %v2316_v59, %v2321_v38  ;;  %v9210_v38 = vld [vmem:[#allocation15_spill] sm:$0xff] }
 0x10c   :  { %v2327_v44 = vsel %vm426_vm1, %v2325_v2, %v2326_v30  ;;  %v2341_v48 = vrot.slane %v2223_v23, 2  ;;  %v2345_v5 = vrot.slane %v2225_v62, 2  ;;  %v2332_v33 = vsel %vm426_vm1, %v2326_v30, %v2331_v42 }
 0x10d   :  { %v2337_v52 = vsel %vm426_vm1, %v2335_v63, %v2336_v7  ;;  %v2346_v51 = vrot.slane %v2227_v25, 2  ;;  %v2351_v28 = vrot.slane %v2229_v6, 2  ;;  %v2355_v4 = vrot.slane %v2231_v10, 2  ;;  %v6522_v25 = vld [vmem:[%s8891_s2 + $0x70] sm:$0x33] }
 0x10e   :  { %v2342_v16 = vsel %vm426_vm1, %v2336_v7, %v2341_v48  ;;  %v2356_v54 = vrot.slane %v2233_v9, 2  ;;  %v2361_v55 = vrot.slane %v2235_v56, 2  ;;  %v6446_v18 = vadd.f32 %v2287_v47, %v6270_v15  ;;  %9205 = vst [vmem:[#allocation13_spill] sm:$0xff] %v6522_v25  ;;  %v6534_v47 = vld [vmem:[%s8891_s2 + $0xa0] sm:$0x33] }
 0x10f   :  { %v2347_v40 = vsel %vm426_vm1, %v2345_v5, %v2346_v51  ;;  %v2352_v19 = vsel %vm426_vm1, %v2346_v51, %v2351_v28  ;;  %v6449_v58 = vadd.f32 %v2292_v46, %v6273_v31  ;;  %v6454_v6 = vadd.f32 %v2297_v49, %v6278_v39  ;;  %9207 = vst [vmem:[#allocation26_spill] sm:$0xff] %v6534_v47  ;;  %v9214_v51 = vld [vmem:[#allocation12_spill] sm:$0xff] }
 0x110   :  { %v2357_v23 = vsel %vm426_vm1, %v2355_v4, %v2356_v54  ;;  %v2362_v62 = vsel %vm426_vm1, %v2356_v54, %v2361_v55  ;;  %v6457_v10 = vadd.f32 %v2302_v36, %v6281_v43  ;;  %v6460_v56 = vadd.f32 %v2307_v22, %v6284_v1  ;;  %v6540_v22 = vld [vmem:[%s8891_s2 + $0xb8] sm:$0x33]  ;;  %v9216_v4 = vld [vmem:[#allocation23_spill] sm:$0xff]  ;;  %v9217_v55 = vld [vmem:[#allocation32_spill] sm:$0xff] }
 0x111   :  { %v6463_v8 = vadd.f32 %v2312_v41, %v6287_v24  ;;  %v6466_v15 = vadd.f32 %v2317_v17, %v6290_v61  ;;  %v6469_v31 = vadd.f32 %v2322_v34, %v6293_v32  ;;  %v6472_v46 = vadd.f32 %v2327_v44, %v6296_v29  ;;  %9208 = vst [vmem:[#allocation11_spill] sm:$0xff] %v6540_v22 }
 0x112   :  { %v6475_v39 = vadd.f32 %v2332_v33, %v6299_v0  ;;  %v6478_v43 = vadd.f32 %v2337_v52, %v6302_v13  ;;  %v6481_v1 = vadd.f32 %v2342_v16, %v6305_v27  ;;  %v6484_v24 = vadd.f32 %v2347_v40, %v6308_v60  ;;  %v6498_v0 = vld [vmem:[%s8891_s2 + $0x10] sm:$0x33]  ;;  %v6504_v27 = vld [vmem:[%s8891_s2 + $0x28] sm:$0x33] }
 0x113   :  { %v6487_v61 = vadd.f32 %v2352_v19, %v6311_v20  ;;  %v6490_v32 = vadd.f32 %v2357_v23, %v6314_v21  ;;  %v6493_v29 = vadd.f32 %v2362_v62, %v6317_v53  ;;  %v9009_v13 = vunpack.c.l.bf16 %v6498_v0  ;;  %v6510_v20 = vld [vmem:[%s8891_s2 + $0x40] sm:$0x33]  ;;  %v6516_v53 = vld [vmem:[%s8891_s2 + $0x58] sm:$0x33] }
 0x114   :  { %v9007_v60 = vunpack.c.l.bf16 %v6504_v27  ;;  %v9006_v21 = vunpack.c.l.bf16 %v6510_v20  ;;  %v9005_v49 = vunpack.c.l.bf16 %v6516_v53  ;;  %v9004_v9 = vunpack.c.l.bf16 %v6522_v25  ;;  %v9219_v23 = vld [vmem:[#allocation19_spill] sm:$0xff] }
 0x115   :  { %v9008_v57 = vunpack.c.l.bf16 %v6528_v26  ;;  %v9013_v36 = vunpack.c.l.bf16 %v6534_v47  ;;  %v2451_v59 = vunpack.c.l.bf16 %v6540_v22  ;;  %v9209_v41 = vunpack.c.l.bf16 %v6322_v50 }
 0x116   :  { %v2456_v30 = vmul.f32 %v9210_v38, %v5781_v35  ;;  %v2458_v17 = vmul.f32 %v9210_v38, %v9009_v13  ;;  %v9211_v42 = vunpack.c.l.bf16 %v6328_v14  ;;  %v2462_v7 = vmul.f32 %v9210_v38, %v5792_v37 }
 0x117   :  { %v2454_v2 = vmul.f32 %v9210_v38, %v9209_v41  ;;  %v2464_v50 = vmul.f32 %v9210_v38, %v9007_v60  ;;  %v9212_v34 = vunpack.c.l.bf16 %v6334_v11  ;;  %v2468_v48 = vmul.f32 %v9210_v38, %v5803_v3 }
 0x118   :  { %v2460_v63 = vmul.f32 %v9210_v38, %v9211_v42  ;;  %v2470_v14 = vmul.f32 %v9210_v38, %v9006_v21  ;;  %v9213_v5 = vunpack.c.l.bf16 %v6340_v12  ;;  %v2474_v52 = vmul.f32 %v9210_v38, %v5814_v45  ;;  %v9220_v42 = vld [vmem:[#allocation33_spill] sm:$0xff]  ;;  %v9225_v21 = vld [vmem:[#allocation20_spill] sm:$0xff] }
 0x119   :  { %v2466_v44 = vmul.f32 %v9210_v38, %v9212_v34  ;;  %v2476_v11 = vmul.f32 %v9210_v38, %v9005_v49  ;;  %v9215_v28 = vunpack.c.l.bf16 %v9214_v51  ;;  %v2480_v54 = vmul.f32 %v9210_v38, %v9216_v4  ;;  %v9222_v51 = vld [vmem:[#allocation24_spill] sm:$0xff] }
 0x11a   :  { %v2472_v33 = vmul.f32 %v9210_v38, %v9213_v5  ;;  %v2482_v12 = vmul.f32 %v9210_v38, %v9004_v9  ;;  %v9218_v40 = vunpack.c.l.bf16 %v9217_v55  ;;  %v2486_v62 = vmul.f32 %v9210_v38, %v9219_v23  ;;  %v9223_v9 = vld [vmem:[#allocation34_spill] sm:$0xff] }
 0x11b   :  { %v2478_v16 = vmul.f32 %v9210_v38, %v9215_v28  ;;  %v2488_v41 = vmul.f32 %v9210_v38, %v9008_v57  ;;  %v9221_v34 = vunpack.c.l.bf16 %v9220_v42  ;;  %v2492_v28 = vmul.f32 %v9210_v38, %v9222_v51 }
 0x11c   :  { %v2484_v19 = vmul.f32 %v9210_v38, %v9218_v40  ;;  %v2494_v55 = vmul.f32 %v9210_v38, %v9013_v36  ;;  %v9224_v40 = vunpack.c.l.bf16 %v9223_v9  ;;  %v2498_v60 = vmul.f32 %v9210_v38, %v9225_v21 }
 0x11d   :  { %v2490_v5 = vmul.f32 %v9210_v38, %v9221_v34  ;;  %v2500_v42 = vmul.f32 %v9210_v38, %v2451_v59  ;;  %v2550_v57 = vrot.slane %v2454_v2, 3  ;;  %v2551_v34 = vrot.slane %v2456_v30, 3 }
 0x11e   :  { %v2496_v49 = vmul.f32 %v9210_v38, %v9224_v40  ;;  %v2556_v13 = vrot.slane %v2458_v17, 3  ;;  %v2560_v26 = vrot.slane %v2460_v63, 3  ;;  %v2561_v51 = vrot.slane %v2462_v7, 3 }
 0x11f   :  { %v2566_v23 = vrot.slane %v2464_v50, 3  ;;  %v2570_v47 = vrot.slane %v2466_v44, 3  ;;  %v2571_v25 = vrot.slane %v2468_v48, 3  ;;  %v2552_v36 = vsel %vm628_vm2, %v2550_v57, %v2551_v34 }
 0x120   :  { %v2557_v9 = vsel %vm628_vm2, %v2551_v34, %v2556_v13  ;;  %v2576_v40 = vrot.slane %v2470_v14, 3  ;;  %v2580_v4 = vrot.slane %v2472_v33, 3  ;;  %v2562_v21 = vsel %vm628_vm2, %v2560_v26, %v2561_v51  ;;  %v4623_v34 = vld [vmem:[%s8891_s2 + $0x78] sm:$0xcc] }
 0x121   :  { %v2567_v22 = vsel %vm628_vm2, %v2561_v51, %v2566_v23  ;;  %v2572_v38 = vsel %vm628_vm2, %v2570_v47, %v2571_v25  ;;  %v2581_v2 = vrot.slane %v2474_v52, 3  ;;  %v2586_v17 = vrot.slane %v2476_v11, 3 }
 0x122   :  { %v2577_v30 = vsel %vm628_vm2, %v2571_v25, %v2576_v40  ;;  %v2590_v63 = vrot.slane %v2478_v16, 3  ;;  %v2591_v7 = vrot.slane %v2480_v54, 3  ;;  %v2596_v44 = vrot.slane %v2482_v12, 3  ;;  %v4624_v40 = vld [vmem:[%s8891_s2 + $0x90] sm:$0xcc] }
 0x123   :  { %v2582_v50 = vsel %vm628_vm2, %v2580_v4, %v2581_v2  ;;  %v2600_v57 = vrot.slane %v2484_v19, 3  ;;  %v2601_v48 = vrot.slane %v2486_v62, 3  ;;  %v2587_v13 = vsel %vm628_vm2, %v2581_v2, %v2586_v17  ;;  %v4625_v2 = vld [vmem:[%s8891_s2 + $0xa8] sm:$0xcc] }
 0x124   :  { %v2592_v14 = vsel %vm628_vm2, %v2590_v63, %v2591_v7  ;;  %v2606_v26 = vrot.slane %v2488_v41, 3  ;;  %v2610_v33 = vrot.slane %v2490_v5, 3  ;;  %v2597_v23 = vsel %vm628_vm2, %v2591_v7, %v2596_v44  ;;  %v9226_v17 = vld [vmem:[#allocation16_spill] sm:$0xff] }
 0x125   :  { %v2602_v47 = vsel %vm628_vm2, %v2600_v57, %v2601_v48  ;;  %v2611_v52 = vrot.slane %v2492_v28, 3  ;;  %v2616_v25 = vrot.slane %v2494_v55, 3  ;;  %v2620_v16 = vrot.slane %v2496_v49, 3 }
 0x126   :  { %v2607_v11 = vsel %vm628_vm2, %v2601_v48, %v2606_v26  ;;  %v2621_v54 = vrot.slane %v2498_v60, 3  ;;  %v2626_v4 = vrot.slane %v2500_v42, 3  ;;  %v6622_v62 = vadd.f32 %v2552_v36, %v6446_v18 }
 0x127   :  { %v2612_v12 = vsel %vm628_vm2, %v2610_v33, %v2611_v52  ;;  %v2617_v19 = vsel %vm628_vm2, %v2611_v52, %v2616_v25  ;;  %v6625_v41 = vadd.f32 %v2557_v9, %v6449_v58  ;;  %v6630_v28 = vadd.f32 %v2562_v21, %v6454_v6  ;;  %v9231_v25 = vld [vmem:[#allocation23_spill] sm:$0xff] }
 0x128   :  { %v2622_v5 = vsel %vm628_vm2, %v2620_v16, %v2621_v54  ;;  %v2627_v51 = vsel %vm628_vm2, %v2621_v54, %v2626_v4  ;;  %v6633_v60 = vadd.f32 %v2567_v22, %v6457_v10  ;;  %v6636_v49 = vadd.f32 %v2572_v38, %v6460_v56  ;;  %v4622_v22 = vld [vmem:[%s8891_s2 + $0x60] sm:$0xcc]  ;;  %v9232_v16 = vld [vmem:[#allocation13_spill] sm:$0xff] }
 0x129   :  { %v6639_v55 = vadd.f32 %v2577_v30, %v6463_v8  ;;  %v6642_v18 = vadd.f32 %v2582_v50, %v6466_v15  ;;  %v6645_v58 = vadd.f32 %v2587_v13, %v6469_v31  ;;  %v6648_v36 = vadd.f32 %v2592_v14, %v6472_v46  ;;  %v9234_v4 = vld [vmem:[#allocation19_spill] sm:$0xff] }
 0x12a   :  { %v6651_v6 = vadd.f32 %v2597_v23, %v6475_v39  ;;  %v6654_v10 = vadd.f32 %v2602_v47, %v6478_v43  ;;  %v6657_v56 = vadd.f32 %v2607_v11, %v6481_v1  ;;  %v6660_v8 = vadd.f32 %v2612_v12, %v6484_v24  ;;  %v4618_v39 = vld [vmem:[%s8891_s2] sm:$0xcc]  ;;  %v4619_v1 = vld [vmem:[%s8891_s2 + $0x18] sm:$0xcc] }
 0x12b   :  { %v6663_v15 = vadd.f32 %v2617_v19, %v6487_v61  ;;  %v6666_v31 = vadd.f32 %v2622_v5, %v6490_v32  ;;  %v6669_v46 = vadd.f32 %v2627_v51, %v6493_v29  ;;  %v2702_v43 = vunpack.c.l.bf16 %v4618_v39  ;;  %v4620_v61 = vld [vmem:[%s8891_s2 + $0x30] sm:$0xcc]  ;;  %v4621_v32 = vld [vmem:[%s8891_s2 + $0x48] sm:$0xcc]  ;;  %s6822_s2 = sld [smem:[#allocation5]] }
 0x12c   :  { %v2704_v24 = vunpack.c.l.bf16 %v4619_v1  ;;  %v2706_v21 = vunpack.c.l.bf16 %v4620_v61  ;;  %v2708_v29 = vunpack.c.l.bf16 %v4621_v32  ;;  %v2710_v42 = vunpack.c.l.bf16 %v4622_v22  ;;  %v9235_v19 = vld [vmem:[#allocation21_spill] sm:$0xff]  ;;  %v9237_v51 = vld [vmem:[#allocation24_spill] sm:$0xff] }
 0x12d   :  { %v2712_v9 = vunpack.c.l.bf16 %v4623_v34  ;;  %v2714_v38 = vunpack.c.l.bf16 %v4624_v40  ;;  %v2716_v30 = vunpack.c.l.bf16 %v4625_v2  ;;  %v2719_v63 = vmul.f32 %v9226_v17, %v2702_v43  ;;  %v9238_v43 = vld [vmem:[#allocation26_spill] sm:$0xff] }
 0x12e   :  { %v2721_v7 = vmul.f32 %v9226_v17, %v5781_v35  ;;  %v9227_v50 = vunpack.c.l.bf16 %v6498_v0  ;;  %v2725_v57 = vmul.f32 %v9226_v17, %v2704_v24  ;;  %v2727_v48 = vmul.f32 %v9226_v17, %v5792_v37 }
 0x12f   :  { %v9228_v13 = vunpack.c.l.bf16 %v6504_v27  ;;  %v2731_v26 = vmul.f32 %v9226_v17, %v2706_v21  ;;  %v2733_v33 = vmul.f32 %v9226_v17, %v5803_v3  ;;  %v9229_v35 = vunpack.c.l.bf16 %v6510_v20  ;;  %v9240_v21 = vld [vmem:[#allocation20_spill] sm:$0xff] }
 0x130   :  { %v2723_v44 = vmul.f32 %v9226_v17, %v9227_v50  ;;  %v2737_v23 = vmul.f32 %v9226_v17, %v2708_v29  ;;  %v2739_v47 = vmul.f32 %v9226_v17, %v5814_v45  ;;  %v9230_v37 = vunpack.c.l.bf16 %v6516_v53 }
 0x131   :  { %v2729_v14 = vmul.f32 %v9226_v17, %v9228_v13  ;;  %v2735_v0 = vmul.f32 %v9226_v17, %v9229_v35  ;;  %v2743_v52 = vmul.f32 %v9226_v17, %v2710_v42  ;;  %v2745_v11 = vmul.f32 %v9226_v17, %v9231_v25 }
 0x132   :  { %v2741_v27 = vmul.f32 %v9226_v17, %v9230_v37  ;;  %v9233_v3 = vunpack.c.l.bf16 %v9232_v16  ;;  %v2749_v54 = vmul.f32 %v9226_v17, %v2712_v9  ;;  %v2751_v12 = vmul.f32 %v9226_v17, %v9234_v4 }
 0x133   :  { %v9236_v45 = vunpack.c.l.bf16 %v9235_v19  ;;  %v2755_v5 = vmul.f32 %v9226_v17, %v2714_v38  ;;  %v2757_v39 = vmul.f32 %v9226_v17, %v9237_v51  ;;  %v9239_v1 = vunpack.c.l.bf16 %v9238_v43 }
 0x134   :  { %v2747_v20 = vmul.f32 %v9226_v17, %v9233_v3  ;;  %v2761_v61 = vmul.f32 %v9226_v17, %v2716_v30  ;;  %v2763_v32 = vmul.f32 %v9226_v17, %v9240_v21  ;;  %v2765_v22 = vmul.f32 %v9226_v17, %v2451_v59 }
 0x135   :  { %v2753_v53 = vmul.f32 %v9226_v17, %v9236_v45  ;;  %v2759_v24 = vmul.f32 %v9226_v17, %v9239_v1  ;;  %v2815_v42 = vrot.slane %v2719_v63, 4  ;;  %v2816_v34 = vrot.slane %v2721_v7, 4 }
 0x136   :  { %v2821_v9 = vrot.slane %v2723_v44, 4  ;;  %v2825_v40 = vrot.slane %v2725_v57, 4  ;;  %v2826_v38 = vrot.slane %v2727_v48, 4  ;;  %v2831_v2 = vrot.slane %v2729_v14, 4 }
 0x137   :  { %v2835_v50 = vrot.slane %v2731_v26, 4  ;;  %v2836_v13 = vrot.slane %v2733_v33, 4  ;;  %v2817_v35 = vsel %vm830_vm3, %v2815_v42, %v2816_v34  ;;  %v2841_v30 = vrot.slane %v2735_v0, 4 }
 0x138   :  { %v2822_v37 = vsel %vm830_vm3, %v2816_v34, %v2821_v9  ;;  %v2845_v25 = vrot.slane %v2737_v23, 4  ;;  %v2827_v16 = vsel %vm830_vm3, %v2825_v40, %v2826_v38  ;;  %v2832_v3 = vsel %vm830_vm3, %v2826_v38, %v2831_v2  ;;  %v9242_v9 = vld [vmem:[#allocation17_spill] sm:$0xff] }
 0x139   :  { %v2837_v59 = vsel %vm830_vm3, %v2835_v50, %v2836_v13  ;;  %v2846_v17 = vrot.slane %v2739_v47, 4  ;;  %v2842_v63 = vsel %vm830_vm3, %v2836_v13, %v2841_v30  ;;  %v2851_v7 = vrot.slane %v2741_v27, 4 }
 0x13a   :  { %v2855_v44 = vrot.slane %v2743_v52, 4  ;;  %v2856_v57 = vrot.slane %v2745_v11, 4  ;;  %v2861_v14 = vrot.slane %v2747_v20, 4  ;;  %v2865_v26 = vrot.slane %v2749_v54, 4 }
 0x13b   :  { %v2847_v48 = vsel %vm830_vm3, %v2845_v25, %v2846_v17  ;;  %v2866_v33 = vrot.slane %v2751_v12, 4  ;;  %v2852_v0 = vsel %vm830_vm3, %v2846_v17, %v2851_v7  ;;  %v2871_v4 = vrot.slane %v2753_v53, 4 }
 0x13c   :  { %v2857_v23 = vsel %vm830_vm3, %v2855_v44, %v2856_v57  ;;  %v2875_v19 = vrot.slane %v2755_v5, 4  ;;  %v2862_v45 = vsel %vm830_vm3, %v2856_v57, %v2861_v14  ;;  %v2876_v51 = vrot.slane %v2757_v39, 4 }
 0x13d   :  { %v2867_v47 = vsel %vm830_vm3, %v2865_v26, %v2866_v33  ;;  %v2881_v43 = vrot.slane %v2759_v24, 4  ;;  %v2872_v27 = vsel %vm830_vm3, %v2866_v33, %v2871_v4  ;;  %v2885_v52 = vrot.slane %v2761_v61, 4 }
 0x13e   :  { %v2886_v11 = vrot.slane %v2763_v32, 4  ;;  %v2891_v1 = vrot.slane %v2765_v22, 4  ;;  %v2877_v20 = vsel %vm830_vm3, %v2875_v19, %v2876_v51  ;;  %v2927_v12 = vadd.f32 %v2817_v35, %v6622_v62 }
 0x13f   :  { %v2882_v54 = vsel %vm830_vm3, %v2876_v51, %v2881_v43  ;;  %v2929_v53 = vadd.f32 %v2822_v37, %v6625_v41  ;;  %v2931_v39 = vadd.f32 %v2827_v16, %v6630_v28  ;;  %v2933_v24 = vadd.f32 %v2832_v3, %v6633_v60 }
 0x140   :  { %v2887_v5 = vsel %vm830_vm3, %v2885_v52, %v2886_v11  ;;  %v2892_v21 = vsel %vm830_vm3, %v2886_v11, %v2891_v1  ;;  %v2935_v61 = vadd.f32 %v2837_v59, %v6636_v49  ;;  %v2937_v32 = vadd.f32 %v2842_v63, %v6639_v55 }
 0x141   :  { %v2939_v29 = vadd.f32 %v2847_v48, %v6642_v18  ;;  %v2941_v22 = vadd.f32 %v2852_v0, %v6645_v58  ;;  %v2943_v62 = vadd.f32 %v2857_v23, %v6648_v36  ;;  %v2945_v41 = vadd.f32 %v2862_v45, %v6651_v6 }
 0x142   :  { %v2947_v42 = vadd.f32 %v2867_v47, %v6654_v10  ;;  %v2949_v34 = vadd.f32 %v2872_v27, %v6657_v56  ;;  %v2951_v28 = vadd.f32 %v2877_v20, %v6660_v8  ;;  %v2953_v60 = vadd.f32 %v2882_v54, %v6663_v15 }
 0x143   :  { %v2955_v49 = vadd.f32 %v2887_v5, %v6666_v31  ;;  %v2957_v55 = vadd.f32 %v2892_v21, %v6669_v46  ;;  %v2960_v18 = vadd.f32 %v9242_v9, %v2927_v12  ;;  %v2962_v58 = vadd.f32 %v9242_v9, %v2929_v53 }
 0x144   :  { %v2964_v36 = vadd.f32 %v9242_v9, %v2931_v39  ;;  %v2966_v6 = vadd.f32 %v9242_v9, %v2933_v24  ;;  %v2968_v10 = vadd.f32 %v9242_v9, %v2935_v61  ;;  %v2970_v56 = vadd.f32 %v9242_v9, %v2937_v32 }
 0x145   :  { %v2972_v8 = vadd.f32 %v9242_v9, %v2939_v29  ;;  %v2974_v15 = vadd.f32 %v9242_v9, %v2941_v22  ;;  %v6784_v31 = vadd.f32 %v9242_v9, %v2943_v62  ;;  %v6787_v46 = vadd.f32 %v9242_v9, %v2945_v41 }
 0x146   :  { %v6790_v40 = vadd.f32 %v9242_v9, %v2947_v42  ;;  %v6793_v38 = vadd.f32 %v9242_v9, %v2949_v34  ;;  %v6796_v2 = vadd.f32 %v9242_v9, %v2951_v28  ;;  %v6799_v50 = vadd.f32 %v9242_v9, %v2953_v60  ;;  %v6827_v60 = vld [vmem:[%s8890_s1] sm:$0xff] }
 0x147   :  { %v6802_v13 = vadd.f32 %v9242_v9, %v2955_v49  ;;  %v6805_v35 = vadd.f32 %v9242_v9, %v2957_v55  ;;  %v2992_v37 = vmax.f32 %v2960_v18, 0.0  ;;  %v2994_v30 = vmax.f32 %v2962_v58, 0.0  ;;  %v6832_v49 = vld [vmem:[%s8890_s1 + $0x10] sm:$0xff]  ;;  %v6837_v55 = vld [vmem:[%s8890_s1 + $0x20] sm:$0xff] }
 0x148   :  { %v2996_v25 = vmax.f32 %v2964_v36, 0.0  ;;  %v2998_v16 = vmax.f32 %v2966_v6, 0.0  ;;  %v3000_v3 = vmax.f32 %v2968_v10, 0.0  ;;  %v3002_v59 = vmax.f32 %v2970_v56, 0.0  ;;  %v6843_v6 = vld [vmem:[%s8890_s1 + $0x8] sm:$0x33] }
 0x149   :  { %v3004_v17 = vmax.f32 %v2972_v8, 0.0  ;;  %v3006_v63 = vmax.f32 %v2974_v15, 0.0  ;;  %v3008_v7 = vmax.f32 %v6784_v31, 0.0  ;;  %v3010_v44 = vmax.f32 %v6787_v46, 0.0  ;;  %v6848_v10 = vld [vmem:[%s8890_s1 + $0x18] sm:$0x33] }
 0x14a   :  { %v3012_v57 = vmax.f32 %v6790_v40, 0.0  ;;  %v3014_v48 = vmax.f32 %v6793_v38, 0.0  ;;  %v3016_v14 = vmax.f32 %v6796_v2, 0.0  ;;  %v3018_v26 = vmax.f32 %v6799_v50, 0.0  ;;  %v6853_v56 = vld [vmem:[%s8890_s1 + $0x30] sm:$0xff]  ;;  %v6868_v2 = vld [vmem:[%s8890_s1 + $0x40] sm:$0xff] }
 0x14b   :  { %v3020_v33 = vmax.f32 %v6802_v13, 0.0  ;;  %v3022_v0 = vmax.f32 %v6805_v35, 0.0  ;;  %v3056_v23 = vrot.slane %v2992_v37, 1  ;;  %v3057_v4 = vrot.slane %v2994_v30, 1  ;;  %v6858_v40 = vld [vmem:[%s8890_s1 + $0x28] sm:$0x33] }
 0x14c   :  { %v3062_v19 = vrot.slane %v2996_v25, 1  ;;  %v3063_v45 = vrot.slane %v2998_v16, 1  ;;  %v3068_v47 = vrot.slane %v3000_v3, 1  ;;  %v3069_v51 = vrot.slane %v3002_v59, 1  ;;  %v6863_v38 = vld [vmem:[%s8890_s1 + $0x38] sm:$0x33] }
 0x14d   :  { %v3074_v43 = vrot.slane %v3004_v17, 1  ;;  %v3075_v27 = vrot.slane %v3006_v63, 1  ;;  %v3058_v52 = vsel %vm224_vm0, %v3056_v23, %v3057_v4  ;;  %v3080_v1 = vrot.slane %v3008_v7, 1  ;;  %v6920_v23 = vld [vmem:[%s8890_s1 + $0x18] sm:$0x77] }
 0x14e   :  { %v3064_v11 = vsel %vm224_vm0, %v3062_v19, %v3063_v45  ;;  %v3081_v20 = vrot.slane %v3010_v44, 1  ;;  %v3070_v54 = vsel %vm224_vm0, %v3068_v47, %v3069_v51  ;;  %v3086_v53 = vrot.slane %v3012_v57, 1 }
 0x14f   :  { %v3076_v12 = vsel %vm224_vm0, %v3074_v43, %v3075_v27  ;;  %v3087_v5 = vrot.slane %v3014_v48, 1  ;;  %v3092_v39 = vrot.slane %v3016_v14, 1  ;;  %v3093_v24 = vrot.slane %v3018_v26, 1 }
 0x150   :  { %v3082_v21 = vsel %vm224_vm0, %v3080_v1, %v3081_v20  ;;  %v3098_v61 = vrot.slane %v3020_v33, 1  ;;  %v3099_v29 = vrot.slane %v3022_v0, 1  ;;  %v3136_v22 = vmax.f32 %v2992_v37, %v3058_v52 }
 0x151   :  { %v3088_v32 = vsel %vm224_vm0, %v3086_v53, %v3087_v5  ;;  %v3138_v62 = vmax.f32 %v2994_v30, %v3057_v4  ;;  %v3094_v41 = vsel %vm224_vm0, %v3092_v39, %v3093_v24  ;;  %v3140_v42 = vmax.f32 %v2996_v25, %v3064_v11  ;;  %v6873_v30 = vld [vmem:[%s8890_s1 + $0x48] sm:$0x33]  ;;  %v6878_v25 = vld [vmem:[%s8890_s1 + $0x50] sm:$0xff] }
 0x152   :  { %v3142_v34 = vmax.f32 %v2998_v16, %v3063_v45  ;;  %v3144_v28 = vmax.f32 %v3000_v3, %v3070_v54  ;;  %v3100_v9 = vsel %vm224_vm0, %v3098_v61, %v3099_v29  ;;  %v3146_v18 = vmax.f32 %v3002_v59, %v3069_v51  ;;  %3168 = vst [vmem:[#allocation3 + $0x80] sm:$0xff] %v3136_v22  ;;  %v6883_v16 = vld [vmem:[%s8890_s1 + $0x60] sm:$0xff]  ;;  %v6888_v3 = vld [vmem:[%s8890_s1 + $0x58] sm:$0x33]  ;;  %v6893_v59 = vld [vmem:[%s8890_s1 + $0x68] sm:$0x33] }
 0x153   :  { %v3148_v58 = vmax.f32 %v3004_v17, %v3076_v12  ;;  %v3150_v36 = vmax.f32 %v3006_v63, %v3075_v27  ;;  %3170 = vst [vmem:[#allocation3 + $0xe8] sm:$0x7f] %v3138_v62  ;;  %v3152_v8 = vmax.f32 %v3008_v7, %v3082_v21  ;;  %v3154_v15 = vmax.f32 %v3010_v44, %v3081_v20  ;;  %v6898_v17 = vld [vmem:[%s8890_s1 + $0x70] sm:$0xff]  ;;  %v6929_v51 = vld [vmem:[%s8890_s1 + $0x28] sm:$0x77] }
 0x154   :  { %v3156_v31 = vmax.f32 %v3012_v57, %v3088_v32  ;;  %v3158_v46 = vmax.f32 %v3014_v48, %v3087_v5  ;;  %3172 = vst [vmem:[#allocation3 + $0x8] sm:$0xff] %v3140_v42  ;;  %3174 = vst [vmem:[#allocation3 + $0x58] sm:$0x7f] %v3142_v34  ;;  %v3160_v50 = vmax.f32 %v3016_v14, %v3094_v41  ;;  %v9016_v63 = vunpack.c.h.bf16 %v6827_v60  ;;  %v6906_v57 = vld [vmem:[%s8890_s1 + $0x78] sm:$0x33]  ;;  %v9243_v61 = vld [vmem:[#allocation27_spill] sm:$0xff] }
 0x155   :  { %3176 = vst [vmem:[#allocation3 + $0xd0] sm:$0xff] %v3144_v28  ;;  %v3162_v13 = vmax.f32 %v3018_v26, %v3093_v24  ;;  %v3164_v35 = vmax.f32 %v3020_v33, %v3100_v9  ;;  %v3166_v37 = vmax.f32 %v3022_v0, %v3099_v29  ;;  %3178 = vst [vmem:[#allocation3 + $0x38] sm:$0x7f] %v3146_v18  ;;  %v73_v7 = vunpack.c.h.bf16 %v6843_v6  ;;  %v6915_v0 = vld [vmem:[%s8890_s1 + $0x8] sm:$0x77] }
 0x156   :  { %3180 = vst [vmem:[#allocation3 + $0xe0] sm:$0xff] %v3148_v58  ;;  %3182 = vst [vmem:[#allocation3 + $0x18] sm:$0x7f] %v3150_v36  ;;  %v9015_v44 = vunpack.c.h.bf16 %v6832_v49  ;;  %v77_v48 = vunpack.c.h.bf16 %v6848_v10  ;;  %v9017_v14 = vunpack.c.h.bf16 %v6837_v55  ;;  %v81_v26 = vunpack.c.h.bf16 %v6858_v40  ;;  %v9244_v22 = vld [vmem:[#allocation28_spill] sm:$0xff] }
 0x157   :  { %3184 = vst [vmem:[#allocation3 + $0x10] sm:$0xff] %v3152_v8  ;;  %3186 = vst [vmem:[#allocation3 + $0x50] sm:$0x7f] %v3154_v15  ;;  %v6937_v53 = vstv %s6822_s2  ;;  %s7142_s2 = sld [smem:[#allocation5 + $0x1]] }
 0x158   :  { %3188 = vst [vmem:[#allocation3 + $0xd8] sm:$0xff] %v3156_v31  ;;  %3190 = vst [vmem:[#allocation3 + $0x20] sm:$0x7f] %v3158_v46  ;;  %v6957_v6 = vmul.f32 %v6937_v53, %v9016_v63 }
 0x159   :  { %3192 = vst [vmem:[#allocation3 + $0x88] sm:$0xff] %v3160_v50  ;;  %3194 = vst [vmem:[#allocation3 + $0xf8] sm:$0x7f] %v3162_v13  ;;  %v3206_v1 = vld [vmem:[#allocation3 + $0x80] sm:$0x7f]  ;;  %v6965_v13 = vmul.f32 %v6937_v53, %v73_v7 }
 0x15a   :  { %3196 = vst [vmem:[#allocation3 + $0xb8] sm:$0xff] %v3164_v35  ;;  %3198 = vst [vmem:[#allocation3 + $0x28] sm:$0x7f] %v3166_v37  ;;  %v3239_v20 = vld [vmem:[#allocation3 + $0x80] sm:$0xfc]  ;;  %v6942_v32 = vmul.f32 %v9243_v61, %v3206_v1 }
 0x15b   :  { %v3241_v54 = vld [vmem:[#allocation3 + $0xe8] sm:$0x1]  ;;  %v3243_v29 = vld [vmem:[#allocation3 + $0x8] sm:$0xfc]  ;;  %v3272_v62 = vmul.f32 %v9244_v22, %v3239_v20  ;;  %v3245_v18 = vld [vmem:[#allocation3 + $0x58] sm:$0x1] }
 0x15c   :  { %v3208_v39 = vld [vmem:[#allocation3 + $0x8] sm:$0x7f]  ;;  %v3210_v24 = vld [vmem:[#allocation3 + $0xd0] sm:$0x7f]  ;;  %v3274_v41 = vmul.f32 %v9244_v22, %v3241_v54  ;;  %v3276_v36 = vmul.f32 %v9244_v22, %v3243_v29  ;;  %v3249_v31 = vld [vmem:[#allocation3 + $0x38] sm:$0x1]  ;;  %v3278_v46 = vmul.f32 %v9244_v22, %v3245_v18 }
 0x15d   :  { %v3212_v34 = vld [vmem:[#allocation3 + $0xe0] sm:$0x7f]  ;;  %v6948_v28 = vmul.f32 %v9243_v61, %v3208_v39  ;;  %v6951_v9 = vmul.f32 %v9243_v61, %v3210_v24  ;;  %v3247_v58 = vld [vmem:[#allocation3 + $0xd0] sm:$0xfc]  ;;  %v3282_v39 = vmul.f32 %v9244_v22, %v3249_v31  ;;  %v6977_v24 = vmul.f32 %v6937_v53, %v9015_v44 }
 0x15e   :  { %v3214_v10 = vld [vmem:[#allocation3 + $0x10] sm:$0x7f]  ;;  %v6960_v15 = vmul.f32 %v9243_v61, %v3212_v34  ;;  %v3280_v50 = vmul.f32 %v9244_v22, %v3247_v58  ;;  %v3251_v54 = vld [vmem:[#allocation3 + $0xe0] sm:$0xfc]  ;;  %v3253_v34 = vld [vmem:[#allocation3 + $0x18] sm:$0x1] }
 0x15f   :  { %v3216_v8 = vld [vmem:[#allocation3 + $0xd8] sm:$0x7f]  ;;  %v6968_v1 = vmul.f32 %v9243_v61, %v3214_v10  ;;  %v3255_v18 = vld [vmem:[#allocation3 + $0x10] sm:$0xfc]  ;;  %v3257_v58 = vld [vmem:[#allocation3 + $0x50] sm:$0x1]  ;;  %v3284_v10 = vmul.f32 %v9244_v22, %v3251_v54  ;;  %v3286_v21 = vmul.f32 %v9244_v22, %v3253_v34  ;;  %v7003_v34 = vmul.f32 %v6937_v53, %v81_v26 }
 0x160   :  { %v3218_v35 = vld [vmem:[#allocation3 + $0x88] sm:$0x7f]  ;;  %v6971_v20 = vmul.f32 %v9243_v61, %v3216_v8  ;;  %v6987_v8 = vmul.f32 %v6937_v53, %v77_v48  ;;  %v3259_v31 = vld [vmem:[#allocation3 + $0xd8] sm:$0xfc]  ;;  %v3261_v12 = vld [vmem:[#allocation3 + $0x20] sm:$0x1]  ;;  %v3288_v44 = vmul.f32 %v9244_v22, %v3255_v18 }
 0x161   :  { %v3220_v37 = vld [vmem:[#allocation3 + $0xb8] sm:$0x7f]  ;;  %v6980_v29 = vmul.f32 %v9243_v61, %v3218_v35  ;;  %v3263_v42 = vld [vmem:[#allocation3 + $0x88] sm:$0xfc]  ;;  %v3290_v35 = vmul.f32 %v9244_v22, %v3257_v58  ;;  %v3269_v54 = vld [vmem:[#allocation3 + $0x28] sm:$0x1]  ;;  %v3292_v48 = vmul.f32 %v9244_v22, %v3259_v31  ;;  %v3294_v63 = vmul.f32 %v9244_v22, %v3261_v12 }
 0x162   :  { %v6983_v7 = vmul.f32 %v9243_v61, %v3220_v37  ;;  %v6995_v61 = vmul.f32 %v6937_v53, %v9017_v14  ;;  %v3265_v37 = vld [vmem:[#allocation3 + $0xf8] sm:$0x1]  ;;  %v3267_v5 = vld [vmem:[#allocation3 + $0xb8] sm:$0xfc]  ;;  %v3296_v11 = vmul.f32 %v9244_v22, %v3263_v42  ;;  %v3302_v14 = vmul.f32 %v9244_v22, %v3269_v54 }
 0x163   :  { %v3298_v18 = vmul.f32 %v9244_v22, %v3265_v37  ;;  %v3300_v58 = vmul.f32 %v9244_v22, %v3267_v5  ;;  %v3336_v52 = vrot.slane %v3272_v62, 2  ;;  %v3337_v27 = vrot.slane %v3274_v41, 2  ;;  %v3416_v37 = vld [vmem:[#allocation3 + $0x80] sm:$0xf0] }
 0x164   :  { %v3342_v43 = vrot.slane %v3276_v36, 2  ;;  %v3343_v47 = vrot.slane %v3278_v46, 2  ;;  %v3348_v31 = vrot.slane %v3280_v50, 2  ;;  %v3349_v45 = vrot.slane %v3282_v39, 2  ;;  %v3418_v36 = vld [vmem:[#allocation3 + $0xe8] sm:$0x7] }
 0x165   :  { %v3354_v12 = vrot.slane %v3284_v10, 2  ;;  %v3355_v19 = vrot.slane %v3286_v21, 2  ;;  %v3360_v42 = vrot.slane %v3288_v44, 2  ;;  %v3338_v40 = vsel %vm426_vm1, %v3336_v52, %v3337_v27  ;;  %v3420_v46 = vld [vmem:[#allocation3 + $0x8] sm:$0xf0] }
 0x166   :  { %v3344_v26 = vsel %vm426_vm1, %v3342_v43, %v3343_v47  ;;  %v3361_v4 = vrot.slane %v3290_v35, 2  ;;  %v3366_v33 = vrot.slane %v3292_v48, 2  ;;  %v3350_v5 = vsel %vm426_vm1, %v3348_v31, %v3349_v45  ;;  %v3422_v10 = vld [vmem:[#allocation3 + $0x58] sm:$0x7]  ;;  %v3428_v52 = vld [vmem:[#allocation3 + $0xe0] sm:$0xf0] }
 0x167   :  { %v3356_v22 = vsel %vm426_vm1, %v3354_v12, %v3355_v19  ;;  %v3367_v62 = vrot.slane %v3294_v63, 2  ;;  %v3372_v41 = vrot.slane %v3296_v11, 2  ;;  %v3373_v39 = vrot.slane %v3298_v18, 2  ;;  %v3424_v63 = vld [vmem:[#allocation3 + $0xd0] sm:$0xf0] }
 0x168   :  { %v3362_v50 = vsel %vm426_vm1, %v3360_v42, %v3361_v4  ;;  %v3378_v21 = vrot.slane %v3300_v58, 2  ;;  %v3379_v44 = vrot.slane %v3302_v14, 2  ;;  %v7015_v47 = vadd.f32 %v3338_v40, %v6942_v32  ;;  %v3426_v45 = vld [vmem:[#allocation3 + $0x38] sm:$0x7]  ;;  %v3432_v35 = vld [vmem:[#allocation3 + $0x10] sm:$0xf0] }
 0x169   :  { %v3368_v27 = vsel %vm426_vm1, %v3366_v33, %v3367_v62  ;;  %v7018_v43 = vadd.f32 %v3344_v26, %v6948_v28  ;;  %v7021_v19 = vadd.f32 %v3350_v5, %v6951_v9  ;;  %v3374_v4 = vsel %vm426_vm1, %v3372_v41, %v3373_v39  ;;  %v3430_v32 = vld [vmem:[#allocation3 + $0x18] sm:$0x7]  ;;  %v3434_v28 = vld [vmem:[#allocation3 + $0x50] sm:$0x7]  ;;  %v3436_v18 = vld [vmem:[#allocation3 + $0xd8] sm:$0xf0] }
 0x16a   :  { %v3380_v11 = vsel %vm426_vm1, %v3378_v21, %v3379_v44  ;;  %v7026_v14 = vadd.f32 %v3356_v22, %v6960_v15  ;;  %v7029_v33 = vadd.f32 %v3362_v50, %v6968_v1  ;;  %v7032_v54 = vadd.f32 %v3368_v27, %v6971_v20  ;;  %v3438_v58 = vld [vmem:[#allocation3 + $0x20] sm:$0x7]  ;;  %v3440_v31 = vld [vmem:[#allocation3 + $0x88] sm:$0xf0]  ;;  %v9245_v15 = vld [vmem:[#allocation29_spill] sm:$0xff] }
 0x16b   :  { %v7035_v9 = vadd.f32 %v3374_v4, %v6980_v29  ;;  %v7038_v48 = vadd.f32 %v3380_v11, %v6983_v7  ;;  %v3449_v12 = vmul.f32 %v9245_v15, %v3416_v37  ;;  %v3442_v42 = vld [vmem:[#allocation3 + $0xf8] sm:$0x7]  ;;  %v3444_v1 = vld [vmem:[#allocation3 + $0xb8] sm:$0xf0]  ;;  %v3446_v40 = vld [vmem:[#allocation3 + $0x28] sm:$0x7]  ;;  %v3451_v26 = vmul.f32 %v9245_v15, %v3418_v36 }
 0x16c   :  { %v3453_v5 = vmul.f32 %v9245_v15, %v3420_v46  ;;  %v3455_v20 = vmul.f32 %v9245_v15, %v3422_v10  ;;  %v3457_v29 = vmul.f32 %v9245_v15, %v3424_v63  ;;  %v3459_v22 = vmul.f32 %v9245_v15, %v3426_v45 }
 0x16d   :  { %v3461_v7 = vmul.f32 %v9245_v15, %v3428_v52  ;;  %v3463_v62 = vmul.f32 %v9245_v15, %v3430_v32  ;;  %v3465_v41 = vmul.f32 %v9245_v15, %v3432_v35  ;;  %v3467_v37 = vmul.f32 %v9245_v15, %v3434_v28 }
 0x16e   :  { %v3469_v50 = vmul.f32 %v9245_v15, %v3436_v18  ;;  %v3471_v36 = vmul.f32 %v9245_v15, %v3438_v58  ;;  %v3473_v46 = vmul.f32 %v9245_v15, %v3440_v31  ;;  %v3475_v39 = vmul.f32 %v9245_v15, %v3442_v42  ;;  %v3593_v42 = vld [vmem:[#allocation3 + $0x80] sm:$0xc0] }
 0x16f   :  { %v3477_v21 = vmul.f32 %v9245_v15, %v3444_v1  ;;  %v3479_v44 = vmul.f32 %v9245_v15, %v3446_v40  ;;  %v3513_v10 = vrot.slane %v3449_v12, 4  ;;  %v3514_v27 = vrot.slane %v3451_v26, 4  ;;  %v3595_v26 = vld [vmem:[#allocation3 + $0xe8] sm:$0x1f] }
 0x170   :  { %v3519_v63 = vrot.slane %v3453_v5, 4  ;;  %v3520_v45 = vrot.slane %v3455_v20, 4  ;;  %v3525_v52 = vrot.slane %v3457_v29, 4  ;;  %v3526_v4 = vrot.slane %v3459_v22, 4  ;;  %v3597_v5 = vld [vmem:[#allocation3 + $0x8] sm:$0xc0] }
 0x171   :  { %v3531_v11 = vrot.slane %v3461_v7, 4  ;;  %v3532_v32 = vrot.slane %v3463_v62, 4  ;;  %v3537_v35 = vrot.slane %v3465_v41, 4  ;;  %v3515_v28 = vsel %vm830_vm3, %v3513_v10, %v3514_v27  ;;  %v3599_v62 = vld [vmem:[#allocation3 + $0x58] sm:$0x1f] }
 0x172   :  { %v3521_v18 = vsel %vm830_vm3, %v3519_v63, %v3520_v45  ;;  %v3538_v58 = vrot.slane %v3467_v37, 4  ;;  %v3543_v31 = vrot.slane %v3469_v50, 4  ;;  %v3527_v1 = vsel %vm830_vm3, %v3525_v52, %v3526_v4  ;;  %v3601_v27 = vld [vmem:[#allocation3 + $0xd0] sm:$0xc0] }
 0x173   :  { %v3533_v15 = vsel %vm830_vm3, %v3531_v11, %v3532_v32  ;;  %v3544_v12 = vrot.slane %v3471_v36, 4  ;;  %v3549_v40 = vrot.slane %v3473_v46, 4  ;;  %v3550_v29 = vrot.slane %v3475_v39, 4  ;;  %v3603_v36 = vld [vmem:[#allocation3 + $0x38] sm:$0x1f] }
 0x174   :  { %v3539_v20 = vsel %vm830_vm3, %v3537_v35, %v3538_v58  ;;  %v3555_v22 = vrot.slane %v3477_v21, 4  ;;  %v3556_v7 = vrot.slane %v3479_v44, 4  ;;  %v7063_v37 = vadd.f32 %v3515_v28, %v7015_v47  ;;  %v3605_v46 = vld [vmem:[#allocation3 + $0xe0] sm:$0xc0]  ;;  %v3607_v44 = vld [vmem:[#allocation3 + $0x18] sm:$0x1f] }
 0x175   :  { %v3545_v41 = vsel %vm830_vm3, %v3543_v31, %v3544_v12  ;;  %v3579_v50 = vadd.f32 %v3521_v18, %v7018_v43  ;;  %v3581_v10 = vadd.f32 %v3527_v1, %v7021_v19  ;;  %v3551_v63 = vsel %vm830_vm3, %v3549_v40, %v3550_v29  ;;  %v3609_v52 = vld [vmem:[#allocation3 + $0x10] sm:$0xc0]  ;;  %v3611_v47 = vld [vmem:[#allocation3 + $0x50] sm:$0x1f]  ;;  %v3613_v11 = vld [vmem:[#allocation3 + $0xd8] sm:$0xc0] }
 0x176   :  { %v3557_v45 = vsel %vm830_vm3, %v3555_v22, %v3556_v7  ;;  %v7070_v39 = vadd.f32 %v3533_v15, %v7026_v14  ;;  %v3585_v21 = vadd.f32 %v3539_v20, %v7029_v33  ;;  %v3587_v4 = vadd.f32 %v3545_v41, %v7032_v54  ;;  %v3615_v32 = vld [vmem:[#allocation3 + $0x20] sm:$0x1f]  ;;  %v3617_v35 = vld [vmem:[#allocation3 + $0x88] sm:$0xc0]  ;;  %v3619_v58 = vld [vmem:[#allocation3 + $0xf8] sm:$0x1f] }
 0x177   :  { %v3589_v43 = vadd.f32 %v3551_v63, %v7035_v9  ;;  %v3591_v19 = vadd.f32 %v3557_v45, %v7038_v48  ;;  %v9246_v28 = vld [vmem:[#allocation30_spill] sm:$0xff]  ;;  %v3623_v14 = vld [vmem:[#allocation3 + $0x28] sm:$0x1f] }
 0x178   :  { %v3626_v18 = vmul.f32 %v9246_v28, %v3593_v42  ;;  %v3621_v31 = vld [vmem:[#allocation3 + $0xb8] sm:$0xc0]  ;;  %v3628_v1 = vmul.f32 %v9246_v28, %v3595_v26  ;;  %v3630_v33 = vmul.f32 %v9246_v28, %v3597_v5  ;;  %v3632_v15 = vmul.f32 %v9246_v28, %v3599_v62 }
 0x179   :  { %v3634_v54 = vmul.f32 %v9246_v28, %v3601_v27  ;;  %v3636_v9 = vmul.f32 %v9246_v28, %v3603_v36  ;;  %v3638_v48 = vmul.f32 %v9246_v28, %v3605_v46  ;;  %v3640_v12 = vmul.f32 %v9246_v28, %v3607_v44 }
 0x17a   :  { %v3642_v40 = vmul.f32 %v9246_v28, %v3609_v52  ;;  %v3644_v42 = vmul.f32 %v9246_v28, %v3611_v47  ;;  %v3646_v20 = vmul.f32 %v9246_v28, %v3613_v11  ;;  %v3648_v26 = vmul.f32 %v9246_v28, %v3615_v32 }
 0x17b   :  { %v3650_v5 = vmul.f32 %v9246_v28, %v3617_v35  ;;  %v3652_v29 = vmul.f32 %v9246_v28, %v3619_v58  ;;  %v3654_v22 = vmul.f32 %v9246_v28, %v3621_v31  ;;  %v3656_v7 = vmul.f32 %v9246_v28, %v3623_v14  ;;  %v3770_v14 = vld [vmem:[#allocation3 + $0xe8] sm:$0x7f] }
 0x17c   :  { %v3690_v62 = vrot.slane %v3626_v18, 6  ;;  %v3691_v41 = vrot.slane %v3628_v1, 6  ;;  %v3696_v27 = vrot.slane %v3630_v33, 6  ;;  %v3697_v36 = vrot.slane %v3632_v15, 6 }
 0x17d   :  { %v3702_v46 = vrot.slane %v3634_v54, 6  ;;  %v3703_v63 = vrot.slane %v3636_v9, 6  ;;  %v3708_v45 = vrot.slane %v3638_v48, 6  ;;  %v3709_v44 = vrot.slane %v3640_v12, 6  ;;  %v3772_v9 = vld [vmem:[#allocation3 + $0x58] sm:$0x7f] }
 0x17e   :  { %v3714_v52 = vrot.slane %v3642_v40, 6  ;;  %v3692_v47 = vsel %vm1514_vm4, %v3690_v62, %v3691_v41  ;;  %v3698_v11 = vsel %vm1514_vm4, %v3696_v27, %v3697_v36  ;;  %v3715_v32 = vrot.slane %v3644_v42, 6  ;;  %v3776_v62 = vld [vmem:[#allocation3 + $0x18] sm:$0x7f]  ;;  %v3778_v41 = vld [vmem:[#allocation3 + $0x50] sm:$0x7f] }
 0x17f   :  { %v3720_v35 = vrot.slane %v3646_v20, 6  ;;  %v3704_v58 = vsel %vm1514_vm4, %v3702_v46, %v3703_v63  ;;  %v3710_v31 = vsel %vm1514_vm4, %v3708_v45, %v3709_v44  ;;  %v3721_v28 = vrot.slane %v3648_v26, 6  ;;  %v3774_v20 = vld [vmem:[#allocation3 + $0x38] sm:$0x7f] }
 0x180   :  { %v3726_v18 = vrot.slane %v3650_v5, 6  ;;  %v3716_v1 = vsel %vm1514_vm4, %v3714_v52, %v3715_v32  ;;  %v3727_v33 = vrot.slane %v3652_v29, 6  ;;  %v3732_v15 = vrot.slane %v3654_v22, 6  ;;  %v3780_v29 = vld [vmem:[#allocation3 + $0x20] sm:$0x7f] }
 0x181   :  { %v3733_v54 = vrot.slane %v3656_v7, 6  ;;  %v3722_v48 = vsel %vm1514_vm4, %v3720_v35, %v3721_v28  ;;  %v3754_v12 = vadd.f32 %v3692_v47, %v7063_v37  ;;  %v3756_v40 = vadd.f32 %v3698_v11, %v3579_v50  ;;  %v3782_v22 = vld [vmem:[#allocation3 + $0xf8] sm:$0x7f]  ;;  %v3784_v7 = vld [vmem:[#allocation3 + $0x28] sm:$0x7f] }
 0x182   :  { %v3758_v42 = vadd.f32 %v3704_v58, %v3581_v10  ;;  %v3728_v27 = vsel %vm1514_vm4, %v3726_v18, %v3727_v33  ;;  %v3760_v5 = vadd.f32 %v3710_v31, %v7070_v39  ;;  %v3762_v36 = vadd.f32 %v3716_v1, %v3585_v21  ;;  %v9247_v44 = vld [vmem:[#allocation22_spill] sm:$0xff] }
 0x183   :  { %v3734_v26 = vsel %vm1514_vm4, %v3732_v15, %v3733_v54  ;;  %v3764_v46 = vadd.f32 %v3722_v48, %v3587_v4  ;;  %v3766_v63 = vadd.f32 %v3728_v27, %v3589_v43  ;;  %v3787_v37 = vmul.f32 %v9247_v44, %v3770_v14  ;;  %v9248_v18 = vld [vmem:[#allocation18_spill] sm:$0xff] }
 0x184   :  { %v3768_v45 = vadd.f32 %v3734_v26, %v3591_v19  ;;  %v3789_v50 = vmul.f32 %v9247_v44, %v3772_v9  ;;  %v3791_v10 = vmul.f32 %v9247_v44, %v3774_v20  ;;  %v3793_v52 = vmul.f32 %v9247_v44, %v3776_v62 }
 0x185   :  { %v3795_v47 = vmul.f32 %v9247_v44, %v3778_v41  ;;  %v3797_v11 = vmul.f32 %v9247_v44, %v3780_v29  ;;  %v3799_v39 = vmul.f32 %v9247_v44, %v3782_v22  ;;  %v3801_v21 = vmul.f32 %v9247_v44, %v3784_v7 }
 0x186   :  { %v3803_v32 = vadd.f32 %v3787_v37, %v3754_v12  ;;  %v3805_v4 = vadd.f32 %v3789_v50, %v3756_v40  ;;  %v3807_v43 = vadd.f32 %v3791_v10, %v3758_v42  ;;  %v3809_v19 = vadd.f32 %v3793_v52, %v3760_v5 }
 0x187   :  { %v3811_v35 = vadd.f32 %v3795_v47, %v3762_v36  ;;  %v3813_v58 = vadd.f32 %v3797_v11, %v3764_v46  ;;  %v3815_v31 = vadd.f32 %v3799_v39, %v3766_v63  ;;  %v3817_v28 = vadd.f32 %v3801_v21, %v3768_v45 }
 0x188   :  { %v3820_v14 = vadd.f32 %v9248_v18, %v3803_v32  ;;  %v3822_v1 = vadd.f32 %v9248_v18, %v3805_v4  ;;  %v3824_v33 = vadd.f32 %v9248_v18, %v3807_v43  ;;  %v3826_v15 = vadd.f32 %v9248_v18, %v3809_v19 }
 0x189   :  { %v3828_v54 = vadd.f32 %v9248_v18, %v3811_v35  ;;  %v3830_v9 = vadd.f32 %v9248_v18, %v3813_v58  ;;  %v3832_v48 = vadd.f32 %v9248_v18, %v3815_v31  ;;  %v3834_v12 = vadd.f32 %v9248_v18, %v3817_v28 }
 0x18a   :  { %v3836_v40 = vmax.f32 %v3820_v14, 0.0  ;;  %v3838_v42 = vmax.f32 %v3822_v1, 0.0  ;;  %v3840_v20 = vmax.f32 %v3824_v33, 0.0  ;;  %v3842_v62 = vmax.f32 %v3826_v15, 0.0 }
 0x18b   :  { %v3844_v41 = vmax.f32 %v3828_v54, 0.0  ;;  %v3846_v27 = vmax.f32 %v3830_v9, 0.0  ;;  %v3848_v26 = vmax.f32 %v3832_v48, 0.0  ;;  %v3850_v5 = vmax.f32 %v3834_v12, 0.0 }
 0x18c   :  { %v3852_v29 = vsel %vm6017_vm5, %v3836_v40, 0.0  ;;  %v3854_v22 = vsel %vm6017_vm5, %v3838_v42, 0.0  ;;  %v3856_v7 = vsel %vm6017_vm5, %v3840_v20, 0.0  ;;  %v3858_v46 = vsel %vm6017_vm5, %v3842_v62, 0.0 }
 0x18d   :  { %v3860_v63 = vsel %vm6017_vm5, %v3844_v41, 0.0  ;;  %v3862_v45 = vsel %vm6017_vm5, %v3846_v27, 0.0  ;;  %v3864_v44 = vsel %vm6017_vm5, %v3848_v26, 0.0  ;;  %v3866_v37 = vsel %vm6017_vm5, %v3850_v5, 0.0 }
 0x18e   :  { %v3868_v50 = vsel %vm224_vm0, %v3852_v29, -inf  ;;  %v3882_v52 = vsel %vm224_vm0, %v3854_v22, -inf  ;;  %v3896_v47 = vsel %vm224_vm0, %v3856_v7, -inf  ;;  %v3910_v11 = vsel %vm224_vm0, %v3858_v46, -inf }
 0x18f   :  { %v3869_v10 = vrot.slane %v3868_v50, 4  ;;  %v3883_v39 = vrot.slane %v3882_v52, 4  ;;  %v3897_v21 = vrot.slane %v3896_v47, 4  ;;  %v3911_v32 = vrot.slane %v3910_v11, 4 }
 0x190   :  { %v3924_v4 = vsel %vm224_vm0, %v3860_v63, -inf  ;;  %v3938_v35 = vsel %vm224_vm0, %v3862_v45, -inf  ;;  %v3952_v58 = vsel %vm224_vm0, %v3864_v44, -inf  ;;  %v3966_v54 = vsel %vm224_vm0, %v3866_v37, -inf }
 0x191   :  { %v3870_v43 = vmax.f32 %v3868_v50, %v3869_v10  ;;  %v3925_v19 = vrot.slane %v3924_v4, 4  ;;  %v3884_v31 = vmax.f32 %v3882_v52, %v3883_v39  ;;  %v3898_v28 = vmax.f32 %v3896_v47, %v3897_v21 }
 0x192   :  { %v3912_v18 = vmax.f32 %v3910_v11, %v3911_v32  ;;  %v3939_v14 = vrot.slane %v3938_v35, 4  ;;  %v3953_v15 = vrot.slane %v3952_v58, 4  ;;  %v3967_v41 = vrot.slane %v3966_v54, 4 }
 0x193   :  { %v3871_v1 = vrot.slane %v3870_v43, 2  ;;  %v3926_v33 = vmax.f32 %v3924_v4, %v3925_v19  ;;  %v3885_v9 = vrot.slane %v3884_v31, 2  ;;  %v3899_v48 = vrot.slane %v3898_v28, 2 }
 0x194   :  { %v3913_v12 = vrot.slane %v3912_v18, 2  ;;  %v3940_v40 = vmax.f32 %v3938_v35, %v3939_v14  ;;  %v3954_v62 = vmax.f32 %v3952_v58, %v3953_v15  ;;  %v3968_v63 = vmax.f32 %v3966_v54, %v3967_v41  ;;  %v7163_v54 = vld [vmem:[%s8890_s1 + $0x38] sm:$0x77] }
 0x195   :  { %v3872_v42 = vmax.f32 %v3870_v43, %v3871_v1  ;;  %v3927_v20 = vrot.slane %v3926_v33, 2  ;;  %v3886_v27 = vmax.f32 %v3884_v31, %v3885_v9  ;;  %v3900_v26 = vmax.f32 %v3898_v28, %v3899_v48 }
 0x196   :  { %v3914_v5 = vmax.f32 %v3912_v18, %v3913_v12  ;;  %v3941_v29 = vrot.slane %v3940_v40, 2  ;;  %v3955_v46 = vrot.slane %v3954_v62, 2  ;;  %v3969_v11 = vrot.slane %v3968_v63, 2 }
 0x197   :  { %v3873_v22 = vrot.slane %v3872_v42, 1  ;;  %v3928_v7 = vmax.f32 %v3926_v33, %v3927_v20  ;;  %v3887_v45 = vrot.slane %v3886_v27, 1  ;;  %v3901_v44 = vrot.slane %v3900_v26, 1  ;;  %v7179_v20 = vld [vmem:[%s8890_s1 + $0x58] sm:$0x77] }
 0x198   :  { %v3915_v50 = vrot.slane %v3914_v5, 1  ;;  %v3942_v37 = vmax.f32 %v3940_v40, %v3941_v29  ;;  %v3956_v47 = vmax.f32 %v3954_v62, %v3955_v46  ;;  %v3970_v35 = vmax.f32 %v3968_v63, %v3969_v11 }
 0x199   :  { %v3874_v10 = vmax.f32 %v3872_v42, %v3873_v22  ;;  %v3929_v52 = vrot.slane %v3928_v7, 1  ;;  %v3888_v39 = vmax.f32 %v3886_v27, %v3887_v45  ;;  %v3902_v21 = vmax.f32 %v3900_v26, %v3901_v44  ;;  %v7174_v42 = vld [vmem:[%s8890_s1 + $0x48] sm:$0x77] }
 0x19a   :  { %v3916_v32 = vmax.f32 %v3914_v5, %v3915_v50  ;;  %v3943_v4 = vrot.slane %v3942_v37, 1  ;;  %v3957_v19 = vrot.slane %v3956_v47, 1  ;;  %v9250_v58 = vunpack.c.h.bf16 %v6853_v56  ;;  %v7200_v22 = vld [vmem:[%s8890_s1 + $0x68] sm:$0x77] }
 0x19b   :  { %v3930_v43 = vmax.f32 %v3928_v7, %v3929_v52  ;;  %v3997_v18 = vsel %vm3996_vm6, %v3888_v39, %v3874_v10  ;;  %v9251_v14 = vunpack.c.h.bf16 %v6863_v38  ;;  %v9252_v33 = vunpack.c.h.bf16 %v6868_v2  ;;  %v7205_v7 = vld [vmem:[%s8890_s1 + $0x78] sm:$0x77] }
 0x19c   :  { %v7147_v31 = vmul.f32 %v6937_v53, %v9250_v58  ;;  %v3944_v28 = vmax.f32 %v3942_v37, %v3943_v4  ;;  %v3958_v9 = vmax.f32 %v3956_v47, %v3957_v19  ;;  %v3971_v48 = vrot.slane %v3970_v35, 1 }
 0x19d   :  { %v7153_v1 = vmul.f32 %v6937_v53, %v9251_v14  ;;  %v7158_v15 = vmul.f32 %v6937_v53, %v9252_v33  ;;  %v3999_v12 = vsel %vm3998_vm7, %v3902_v21, %v3997_v18  ;;  %v9253_v40 = vunpack.c.h.bf16 %v6873_v30 }
 0x19e   :  { %v4001_v62 = vsel %vm4000_vm8, %v3916_v32, %v3999_v12  ;;  %v9254_v41 = vunpack.c.h.bf16 %v6878_v25  ;;  %v9255_v30 = vunpack.c.h.bf16 %v6888_v3  ;;  %v9256_v5 = vunpack.c.h.bf16 %v6883_v16 }
 0x19f   :  { %v7169_v38 = vmul.f32 %v6937_v53, %v9253_v40  ;;  %v3972_v3 = vmax.f32 %v3970_v35, %v3971_v48  ;;  %v4003_v46 = vsel %vm4002_vm9, %v3930_v43, %v4001_v62  ;;  %v9257_v63 = vunpack.c.h.bf16 %v6893_v59 }
 0x1a0   :  { %v7185_v27 = vmul.f32 %v6937_v53, %v9254_v41  ;;  %v7190_v26 = vmul.f32 %v6937_v53, %v9255_v30  ;;  %v7195_v29 = vmul.f32 %v6937_v53, %v9256_v5  ;;  %v9258_v44 = vunpack.c.h.bf16 %v6898_v17 }
 0x1a1   :  { %v7211_v45 = vmul.f32 %v6937_v53, %v9257_v63  ;;  %v4005_v37 = vsel %vm4004_vm10, %v3944_v28, %v4003_v46  ;;  %v150_v10 = vunpack.c.h.bf16 %v7163_v54  ;;  %v152_v52 = vunpack.c.h.bf16 %v7174_v42 }
 0x1a2   :  { %v7216_v50 = vmul.f32 %v6937_v53, %v9258_v44  ;;  %v154_v47 = vunpack.c.h.bf16 %v7179_v20  ;;  %v4007_v11 = vsel %vm4006_vm11, %v3958_v9, %v4005_v37  ;;  %v156_v59 = vunpack.c.h.bf16 %v7200_v22  ;;  %v7445_v20 = vld [vmem:[%s8890_s1 + $0x18] sm:$0xff] }
 0x1a3   :  { %v158_v39 = vunpack.c.h.bf16 %v7205_v7  ;;  %v7226_v21 = vstv %s7142_s2  ;;  %v4009_v32 = vsel %vm4008_vm12, %v3972_v3, %v4007_v11  ;;  %v9259_v4 = vunpack.c.h.bf16 %v6827_v60 }
 0x1a4   :  { %v9260_v19 = vunpack.c.h.bf16 %v6915_v0  ;;  %v9261_v58 = vunpack.c.h.bf16 %v6832_v49  ;;  %4155 = vmatmul.mubr.f32.vlgmr.msra.gmra.mxu0 %v4009_v32  ;;  %v9262_v18 = vunpack.c.h.bf16 %v6920_v23  ;;  %v9263_v33 = vunpack.c.h.bf16 %v6837_v55 }
 0x1a5   :  { %v161_v43 = vmul.f32 %v7226_v21, %v9259_v4  ;;  %v9264_v60 = vunpack.c.h.bf16 %v6929_v51  ;;  %v9265_v12 = vunpack.c.h.bf16 %v6853_v56  ;;  %v175_v49 = vmul.f32 %v7226_v21, %v150_v10 }
 0x1a6   :  { %v163_v35 = vmul.f32 %v7226_v21, %v9260_v19  ;;  %v165_v28 = vmul.f32 %v7226_v21, %v9261_v58  ;;  %v167_v14 = vmul.f32 %v7226_v21, %v9262_v18  ;;  %v169_v9 = vmul.f32 %v7226_v21, %v9263_v33 }
 0x1a7   :  { %v171_v48 = vmul.f32 %v7226_v21, %v9264_v60  ;;  %v173_v40 = vmul.f32 %v7226_v21, %v9265_v12  ;;  %v9266_v62 = vunpack.c.h.bf16 %v6868_v2  ;;  %v179_v55 = vmul.f32 %v7226_v21, %v152_v52 }
 0x1a8   :  { %v9267_v30 = vunpack.c.h.bf16 %v6878_v25  ;;  %v183_v56 = vmul.f32 %v7226_v21, %v154_v47  ;;  %v9268_v3 = vunpack.c.h.bf16 %v6883_v16  ;;  %v187_v2 = vmul.f32 %v7226_v21, %v156_v59 }
 0x1a9   :  { %v177_v41 = vmul.f32 %v7226_v21, %v9266_v62  ;;  %v9269_v63 = vmov %v9258_v44  ;;  %v191_v25 = vmul.f32 %v7226_v21, %v158_v39  ;;  %v228_v37 = vrot.slane %v161_v43, 1 }
 0x1aa   :  { %v181_v5 = vmul.f32 %v7226_v21, %v9267_v30  ;;  %v185_v46 = vmul.f32 %v7226_v21, %v9268_v3  ;;  %v189_v44 = vmul.f32 %v7226_v21, %v9269_v63  ;;  %v229_v11 = vrot.slane %v163_v35, 1 }
 0x1ab   :  { %v234_v32 = vrot.slane %v165_v28, 1  ;;  %v235_v4 = vrot.slane %v167_v14, 1  ;;  %v240_v19 = vrot.slane %v169_v9, 1  ;;  %v241_v16 = vrot.slane %v171_v48, 1 }
 0x1ac   :  { %v246_v58 = vrot.slane %v173_v40, 1  ;;  %v9270_v18 = vunpack.c.h.bf16 %v6906_v57  ;;  %v247_v60 = vrot.slane %v175_v49, 1  ;;  %v252_v12 = vrot.slane %v177_v41, 1 }
 0x1ad   :  { %v253_v17 = vrot.slane %v179_v55, 1  ;;  %v230_v62 = vsel %vm224_vm0, %v228_v37, %v229_v11  ;;  %v236_v30 = vsel %vm224_vm0, %v234_v32, %v235_v4  ;;  %v258_v3 = vrot.slane %v181_v5, 1  ;;  %v7338_v37 = vld [vmem:[%s8890_s1 + $0x30] sm:$0xee] }
 0x1ae   :  { %v134_v33 = vmul.f32 %v6937_v53, %v9270_v18  ;;  %v259_v63 = vrot.slane %v183_v56, 1  ;;  %v242_v43 = vsel %vm224_vm0, %v240_v19, %v241_v16  ;;  %v248_v35 = vsel %vm224_vm0, %v246_v58, %v247_v60 }
 0x1af   :  { %v264_v28 = vrot.slane %v185_v46, 1  ;;  %v265_v14 = vrot.slane %v187_v2, 1  ;;  %v254_v57 = vsel %vm224_vm0, %v252_v12, %v253_v17  ;;  %v270_v48 = vrot.slane %v189_v44, 1 }
 0x1b0   :  { %v260_v9 = vsel %vm224_vm0, %v258_v3, %v259_v63  ;;  %v271_v40 = vrot.slane %v191_v25, 1  ;;  %v7290_v41 = vadd.f32 %v230_v62, %v6957_v6  ;;  %v7293_v55 = vadd.f32 %v229_v11, %v6965_v13  ;;  %v7311_v6 = vld [vmem:[%s8890_s1] sm:$0xee]  ;;  %v7316_v13 = vld [vmem:[%s8890_s1 + $0x10] sm:$0xee] }
 0x1b1   :  { %v266_v49 = vsel %vm224_vm0, %v264_v28, %v265_v14  ;;  %v7296_v5 = vadd.f32 %v236_v30, %v6977_v24  ;;  %v7300_v46 = vadd.f32 %v235_v4, %v6987_v8  ;;  %v7303_v2 = vadd.f32 %v242_v43, %v6995_v61  ;;  %v7321_v24 = vld [vmem:[%s8890_s1 + $0x20] sm:$0xee] }
 0x1b2   :  { %v272_v56 = vsel %vm224_vm0, %v270_v48, %v271_v40  ;;  %v7306_v44 = vadd.f32 %v241_v16, %v7003_v34  ;;  %v7324_v8 = vadd.f32 %v248_v35, %v7147_v31  ;;  %v7327_v61 = vadd.f32 %v247_v60, %v7153_v1  ;;  %v7343_v11 = vld [vmem:[%s8890_s1 + $0x40] sm:$0xee]  ;;  %v7348_v31 = vld [vmem:[%s8890_s1 + $0x50] sm:$0xee] }
 0x1b3   :  { %v7330_v34 = vadd.f32 %v254_v57, %v7158_v15  ;;  %v7333_v25 = vadd.f32 %v253_v17, %v7169_v38  ;;  %v7351_v1 = vadd.f32 %v260_v9, %v7185_v27  ;;  %v7354_v15 = vadd.f32 %v259_v63, %v7190_v26  ;;  %v7365_v4 = vld [vmem:[%s8890_s1 + $0x60] sm:$0xee]  ;;  %v7370_v27 = vld [vmem:[%s8890_s1 + $0x70] sm:$0xee]  ;;  %v7375_v26 = vld [vmem:[%s8890_s1 + $0x8] sm:$0xff] }
 0x1b4   :  { %v7357_v38 = vadd.f32 %v266_v49, %v7195_v29  ;;  %v7360_v32 = vadd.f32 %v265_v14, %v7211_v45  ;;  %v7378_v29 = vadd.f32 %v272_v56, %v7216_v50  ;;  %v346_v45 = vunpack.c.h.bf16 %v7311_v6 }
 0x1b5   :  { %v348_v19 = vunpack.c.h.bf16 %v7316_v13  ;;  %v350_v16 = vunpack.c.h.bf16 %v7321_v24  ;;  %v7383_v58 = vadd.f32 %v271_v40, %v134_v33  ;;  %v9022_v18 = vunpack.c.h.bf16 %v7338_v37 }
 0x1b6   :  { %v9021_v60 = vunpack.c.h.bf16 %v7343_v11  ;;  %v9019_v12 = vunpack.c.h.bf16 %v7348_v31  ;;  %v9018_v17 = vunpack.c.h.bf16 %v7365_v4  ;;  %v9020_v62 = vunpack.c.h.bf16 %v7370_v27 }
 0x1b7   :  { %v7391_v50 = vstv %s7282_s25  ;;  %v548_v30 = vunpack.c.h.bf16 %v7375_v26  ;;  %v9272_v33 = vunpack.c.h.bf16 %v6915_v0  ;;  %v9273_v35 = vunpack.c.h.bf16 %v6920_v23 }
 0x1b8   :  { %9271 = vst [vmem:[#allocation31_spill] sm:$0xff] %v7391_v50  ;;  %v363_v3 = vmul.f32 %v7391_v50, %v346_v45  ;;  %v367_v43 = vmul.f32 %v7391_v50, %v348_v19  ;;  %v371_v14 = vmul.f32 %v7391_v50, %v350_v16  ;;  %v9274_v57 = vunpack.c.h.bf16 %v6929_v51 }
 0x1b9   :  { %v365_v63 = vmul.f32 %v7391_v50, %v9272_v33  ;;  %v369_v28 = vmul.f32 %v7391_v50, %v9273_v35  ;;  %v375_v0 = vmul.f32 %v7391_v50, %v9022_v18  ;;  %v377_v48 = vmul.f32 %v7391_v50, %v150_v10 }
 0x1ba   :  { %v373_v9 = vmul.f32 %v7391_v50, %v9274_v57  ;;  %v379_v23 = vmul.f32 %v7391_v50, %v9021_v60  ;;  %v381_v40 = vmul.f32 %v7391_v50, %v152_v52  ;;  %v383_v51 = vmul.f32 %v7391_v50, %v9019_v12 }
 0x1bb   :  { %v385_v49 = vmul.f32 %v7391_v50, %v154_v47  ;;  %v387_v54 = vmul.f32 %v7391_v50, %v9018_v17  ;;  %v389_v10 = vmul.f32 %v7391_v50, %v156_v59  ;;  %v391_v42 = vmul.f32 %v7391_v50, %v9020_v62 }
 0x1bc   :  { %v393_v52 = vmul.f32 %v7391_v50, %v158_v39  ;;  %v430_v47 = vrot.slane %v363_v3, 2  ;;  %v431_v56 = vrot.slane %v365_v63, 2  ;;  %v436_v33 = vrot.slane %v367_v43, 2 }
 0x1bd   :  { %v437_v35 = vrot.slane %v369_v28, 2  ;;  %v442_v22 = vrot.slane %v371_v14, 2  ;;  %v443_v57 = vrot.slane %v373_v9, 2  ;;  %v448_v59 = vrot.slane %v375_v0, 2 }
 0x1be   :  { %v449_v17 = vrot.slane %v377_v48, 2  ;;  %v432_v12 = vsel %vm426_vm1, %v430_v47, %v431_v56  ;;  %v454_v62 = vrot.slane %v379_v23, 2  ;;  %v455_v60 = vrot.slane %v381_v40, 2 }
 0x1bf   :  { %v550_v7 = vunpack.c.h.bf16 %v7445_v20  ;;  %v438_v39 = vsel %vm426_vm1, %v436_v33, %v437_v35  ;;  %v444_v18 = vsel %vm426_vm1, %v442_v22, %v443_v57  ;;  %v460_v3 = vrot.slane %v383_v51, 2 }
 0x1c0   :  { %v461_v63 = vrot.slane %v385_v49, 2  ;;  %v450_v43 = vsel %vm426_vm1, %v448_v59, %v449_v17  ;;  %v466_v28 = vrot.slane %v387_v54, 2  ;;  %v467_v14 = vrot.slane %v389_v10, 2 }
 0x1c1   :  { %v472_v9 = vrot.slane %v391_v42, 2  ;;  %v456_v0 = vsel %vm426_vm1, %v454_v62, %v455_v60  ;;  %v473_v23 = vrot.slane %v393_v52, 2  ;;  %v7457_v40 = vadd.f32 %v432_v12, %v7290_v41  ;;  %v7472_v62 = vld [vmem:[%s8890_s1 + $0x28] sm:$0xff] }
 0x1c2   :  { %v462_v48 = vsel %vm426_vm1, %v460_v3, %v461_v63  ;;  %v468_v47 = vsel %vm426_vm1, %v466_v28, %v467_v14  ;;  %v7461_v33 = vadd.f32 %v431_v56, %v7293_v55  ;;  %v7464_v51 = vadd.f32 %v438_v39, %v7296_v5  ;;  %v7487_v5 = vld [vmem:[%s8890_s1 + $0x38] sm:$0xff]  ;;  %v7514_v42 = vld [vmem:[%s8890_s1 + $0x68] sm:$0xff] }
 0x1c3   :  { %v7467_v49 = vadd.f32 %v437_v35, %v7300_v46  ;;  %v474_v54 = vsel %vm426_vm1, %v472_v9, %v473_v23  ;;  %v7476_v41 = vadd.f32 %v444_v18, %v7303_v2  ;;  %v7479_v12 = vadd.f32 %v443_v57, %v7306_v44  ;;  %v7492_v46 = vld [vmem:[%s8890_s1 + $0x48] sm:$0xff]  ;;  %v7497_v2 = vld [vmem:[%s8890_s1 + $0x58] sm:$0xff] }
 0x1c4   :  { %v7482_v55 = vadd.f32 %v450_v43, %v7324_v8  ;;  %v7500_v44 = vadd.f32 %v449_v17, %v7327_v61  ;;  %v7503_v8 = vadd.f32 %v456_v0, %v7330_v34  ;;  %v7506_v18 = vadd.f32 %v455_v60, %v7333_v25  ;;  %v7519_v61 = vld [vmem:[%s8890_s1 + $0x78] sm:$0xff] }
 0x1c5   :  { %v7509_v10 = vadd.f32 %v462_v48, %v7351_v1  ;;  %v7522_v34 = vadd.f32 %v461_v63, %v7354_v15  ;;  %v7525_v17 = vadd.f32 %v468_v47, %v7357_v38  ;;  %v7528_v25 = vadd.f32 %v467_v14, %v7360_v32  ;;  %v741_v48 = vld [vmem:[%s8890_s1] sm:$0xcc] }
 0x1c6   :  { %v7531_v1 = vadd.f32 %v474_v54, %v7378_v29  ;;  %v552_v60 = vunpack.c.h.bf16 %v7472_v62  ;;  %v9027_v52 = vunpack.c.h.bf16 %v7487_v5  ;;  %v9026_v56 = vunpack.c.h.bf16 %v7492_v46 }
 0x1c7   :  { %v9024_v35 = vunpack.c.h.bf16 %v7497_v2  ;;  %v7538_v15 = vadd.f32 %v473_v23, %v7383_v58  ;;  %v9023_v38 = vunpack.c.h.bf16 %v7514_v42  ;;  %v9025_v22 = vunpack.c.h.bf16 %v7519_v61 }
 0x1c8   :  { %v7543_v32 = vstv %s7449_s21  ;;  %v9279_v28 = vunpack.c.h.bf16 %v7365_v4  ;;  %v9280_v9 = vunpack.c.h.bf16 %v7370_v27 }
 0x1c9   :  { %9275 = vst [vmem:[#allocation15_spill] sm:$0xff] %v7543_v32  ;;  %v565_v29 = vmul.f32 %v7543_v32, %v346_v45  ;;  %v567_v57 = vmul.f32 %v7543_v32, %v548_v30  ;;  %v569_v59 = vmul.f32 %v7543_v32, %v348_v19  ;;  %v571_v58 = vmul.f32 %v7543_v32, %v550_v7 }
 0x1ca   :  { %v573_v39 = vmul.f32 %v7543_v32, %v350_v16  ;;  %v575_v6 = vmul.f32 %v7543_v32, %v552_v60  ;;  %v9276_v45 = vunpack.c.h.bf16 %v7338_v37  ;;  %v579_v13 = vmul.f32 %v7543_v32, %v9027_v52 }
 0x1cb   :  { %v9277_v19 = vunpack.c.h.bf16 %v7343_v11  ;;  %v583_v24 = vmul.f32 %v7543_v32, %v9026_v56  ;;  %v9278_v16 = vunpack.c.h.bf16 %v7348_v31  ;;  %v587_v37 = vmul.f32 %v7543_v32, %v9024_v35 }
 0x1cc   :  { %v577_v3 = vmul.f32 %v7543_v32, %v9276_v45  ;;  %v589_v14 = vmul.f32 %v7543_v32, %v9279_v28  ;;  %v591_v11 = vmul.f32 %v7543_v32, %v9023_v38  ;;  %v593_v0 = vmul.f32 %v7543_v32, %v9280_v9 }
 0x1cd   :  { %v581_v63 = vmul.f32 %v7543_v32, %v9277_v19  ;;  %v585_v43 = vmul.f32 %v7543_v32, %v9278_v16  ;;  %v7593_v31 = vmul.f32 %v7543_v32, %v9025_v22  ;;  %v632_v4 = vrot.slane %v565_v29, 3 }
 0x1ce   :  { %v633_v23 = vrot.slane %v567_v57, 3  ;;  %v638_v47 = vrot.slane %v569_v59, 3  ;;  %v639_v54 = vrot.slane %v571_v58, 3  ;;  %v644_v45 = vrot.slane %v573_v39, 3 }
 0x1cf   :  { %v645_v19 = vrot.slane %v575_v6, 3  ;;  %v650_v16 = vrot.slane %v577_v3, 3  ;;  %v651_v28 = vrot.slane %v579_v13, 3  ;;  %v656_v9 = vrot.slane %v581_v63, 3 }
 0x1d0   :  { %v634_v27 = vsel %vm628_vm2, %v632_v4, %v633_v23  ;;  %v657_v38 = vrot.slane %v583_v24, 3  ;;  %v750_v35 = vunpack.c.h.bf16 %v741_v48  ;;  %v640_v22 = vsel %vm628_vm2, %v638_v47, %v639_v54 }
 0x1d1   :  { %v646_v56 = vsel %vm628_vm2, %v644_v45, %v645_v19  ;;  %v662_v52 = vrot.slane %v585_v43, 3  ;;  %v663_v29 = vrot.slane %v587_v37, 3  ;;  %v652_v57 = vsel %vm628_vm2, %v650_v16, %v651_v28 }
 0x1d2   :  { %v668_v59 = vrot.slane %v589_v14, 3  ;;  %v669_v58 = vrot.slane %v591_v11, 3  ;;  %v674_v39 = vrot.slane %v593_v0, 3  ;;  %v658_v6 = vsel %vm628_vm2, %v656_v9, %v657_v38  ;;  %v746_v0 = vld [vmem:[%s8890_s1 + $0x50] sm:$0xcc] }
 0x1d3   :  { %v664_v3 = vsel %vm628_vm2, %v662_v52, %v663_v29  ;;  %v675_v13 = vrot.slane %v7593_v31, 3  ;;  %v7608_v63 = vadd.f32 %v634_v27, %v7457_v40  ;;  %v7612_v48 = vadd.f32 %v633_v23, %v7461_v33  ;;  %v742_v52 = vld [vmem:[%s8890_s1 + $0x10] sm:$0xcc]  ;;  %v747_v31 = vld [vmem:[%s8890_s1 + $0x60] sm:$0xcc] }
 0x1d4   :  { %v670_v24 = vsel %vm628_vm2, %v668_v59, %v669_v58  ;;  %v7615_v43 = vadd.f32 %v640_v22, %v7464_v51  ;;  %v7618_v37 = vadd.f32 %v639_v54, %v7467_v49  ;;  %v7625_v40 = vadd.f32 %v646_v56, %v7476_v41  ;;  %v743_v51 = vld [vmem:[%s8890_s1 + $0x20] sm:$0xcc]  ;;  %v744_v49 = vld [vmem:[%s8890_s1 + $0x30] sm:$0xcc] }
 0x1d5   :  { %v676_v14 = vsel %vm628_vm2, %v674_v39, %v675_v13  ;;  %v7628_v11 = vadd.f32 %v645_v19, %v7479_v12  ;;  %v7631_v33 = vadd.f32 %v652_v57, %v7482_v55  ;;  %v745_v22 = vld [vmem:[%s8890_s1 + $0x40] sm:$0xcc]  ;;  %v7643_v41 = vadd.f32 %v651_v28, %v7500_v44  ;;  %v748_v44 = vld [vmem:[%s8890_s1 + $0x70] sm:$0xcc] }
 0x1d6   :  { %v7646_v12 = vadd.f32 %v658_v6, %v7503_v8  ;;  %v7649_v55 = vadd.f32 %v657_v38, %v7506_v18  ;;  %v7652_v56 = vadd.f32 %v664_v3, %v7509_v10  ;;  %v7664_v8 = vadd.f32 %v663_v29, %v7522_v34 }
 0x1d7   :  { %v7667_v18 = vadd.f32 %v670_v24, %v7525_v17  ;;  %v7670_v10 = vadd.f32 %v669_v58, %v7528_v25  ;;  %v7673_v38 = vadd.f32 %v676_v14, %v7531_v1  ;;  %v752_v4 = vunpack.c.h.bf16 %v742_v52 }
 0x1d8   :  { %v754_v23 = vunpack.c.h.bf16 %v743_v51  ;;  %v756_v47 = vunpack.c.h.bf16 %v744_v49  ;;  %v758_v54 = vunpack.c.h.bf16 %v745_v22  ;;  %v760_v45 = vunpack.c.h.bf16 %v746_v0 }
 0x1d9   :  { %v762_v19 = vunpack.c.h.bf16 %v747_v31  ;;  %v764_v16 = vunpack.c.h.bf16 %v748_v44  ;;  %v7676_v28 = vstv %s7599_s17  ;;  %v9283_v57 = vunpack.c.h.bf16 %v7492_v46 }
 0x1da   :  { %9281 = vst [vmem:[#allocation12_spill] sm:$0xff] %v7676_v28  ;;  %v767_v34 = vmul.f32 %v7676_v28, %v750_v35  ;;  %v769_v17 = vmul.f32 %v7676_v28, %v548_v30  ;;  %v771_v25 = vmul.f32 %v7676_v28, %v752_v4  ;;  %v773_v1 = vmul.f32 %v7676_v28, %v550_v7 }
 0x1db   :  { %v775_v27 = vmul.f32 %v7676_v28, %v754_v23  ;;  %v777_v9 = vmul.f32 %v7676_v28, %v552_v60  ;;  %v779_v29 = vmul.f32 %v7676_v28, %v756_v47  ;;  %v9282_v35 = vunpack.c.h.bf16 %v7487_v5 }
 0x1dc   :  { %v783_v30 = vmul.f32 %v7676_v28, %v758_v54  ;;  %v785_v20 = vmul.f32 %v7676_v28, %v9283_v57  ;;  %v787_v7 = vmul.f32 %v7676_v28, %v760_v45  ;;  %v9284_v59 = vunpack.c.h.bf16 %v7497_v2 }
 0x1dd   :  { %v781_v26 = vmul.f32 %v7676_v28, %v9282_v35  ;;  %v791_v60 = vmul.f32 %v7676_v28, %v762_v19  ;;  %v9285_v58 = vunpack.c.h.bf16 %v7514_v42  ;;  %v795_v39 = vmul.f32 %v7676_v28, %v764_v16 }
 0x1de   :  { %v789_v62 = vmul.f32 %v7676_v28, %v9284_v59  ;;  %v9286_v6 = vunpack.c.h.bf16 %v7519_v61  ;;  %v834_v3 = vrot.slane %v767_v34, 4  ;;  %v835_v24 = vrot.slane %v769_v17, 4 }
 0x1df   :  { %v793_v5 = vmul.f32 %v7676_v28, %v9285_v58  ;;  %v840_v52 = vrot.slane %v771_v25, 4  ;;  %v841_v2 = vrot.slane %v773_v1, 4  ;;  %v846_v14 = vrot.slane %v775_v27, 4 }
 0x1e0   :  { %v797_v46 = vmul.f32 %v7676_v28, %v9286_v6  ;;  %v847_v51 = vrot.slane %v777_v9, 4  ;;  %v852_v49 = vrot.slane %v779_v29, 4  ;;  %v853_v22 = vrot.slane %v781_v26, 4 }
 0x1e1   :  { %v740_v42 = vadd.f32 %v675_v13, %v7538_v15  ;;  %v836_v0 = vsel %vm830_vm3, %v834_v3, %v835_v24  ;;  %v858_v31 = vrot.slane %v783_v30, 4  ;;  %v859_v61 = vrot.slane %v785_v20, 4 }
 0x1e2   :  { %v842_v44 = vsel %vm830_vm3, %v840_v52, %v841_v2  ;;  %v848_v4 = vsel %vm830_vm3, %v846_v14, %v847_v51  ;;  %v864_v23 = vrot.slane %v787_v7, 4  ;;  %v865_v47 = vrot.slane %v789_v62, 4 }
 0x1e3   :  { %v854_v54 = vsel %vm830_vm3, %v852_v49, %v853_v22  ;;  %v870_v45 = vrot.slane %v791_v60, 4  ;;  %v871_v19 = vrot.slane %v793_v5, 4  ;;  %v876_v16 = vrot.slane %v795_v39, 4 }
 0x1e4   :  { %v860_v34 = vsel %vm830_vm3, %v858_v31, %v859_v61  ;;  %v866_v15 = vsel %vm830_vm3, %v864_v23, %v865_v47  ;;  %v877_v13 = vrot.slane %v797_v46, 4  ;;  %v912_v17 = vadd.f32 %v836_v0, %v7608_v63 }
 0x1e5   :  { %v872_v25 = vsel %vm830_vm3, %v870_v45, %v871_v19  ;;  %v914_v1 = vadd.f32 %v835_v24, %v7612_v48  ;;  %v916_v27 = vadd.f32 %v842_v44, %v7615_v43  ;;  %v918_v9 = vadd.f32 %v841_v2, %v7618_v37 }
 0x1e6   :  { %v878_v29 = vsel %vm830_vm3, %v876_v16, %v877_v13  ;;  %v920_v35 = vadd.f32 %v848_v4, %v7625_v40  ;;  %v922_v26 = vadd.f32 %v847_v51, %v7628_v11  ;;  %v924_v30 = vadd.f32 %v854_v54, %v7631_v33 }
 0x1e7   :  { %v926_v63 = vadd.f32 %v853_v22, %v7643_v41  ;;  %v928_v57 = vadd.f32 %v860_v34, %v7646_v12  ;;  %v930_v48 = vadd.f32 %v859_v61, %v7649_v55  ;;  %v932_v43 = vadd.f32 %v866_v15, %v7652_v56 }
 0x1e8   :  { %v934_v20 = vadd.f32 %v865_v47, %v7664_v8  ;;  %v936_v37 = vadd.f32 %v872_v25, %v7667_v18  ;;  %v938_v7 = vadd.f32 %v871_v19, %v7670_v10  ;;  %v940_v40 = vadd.f32 %v878_v29, %v7673_v38 }
 0x1e9   :  { %v942_v59 = vadd.f32 %v877_v13, %v740_v42  ;;  %v7741_v11 = vstv %s7710_s26  ;;  %v7744_v33 = vstv %s7712_s28  ;;  %v7747_v41 = vstv %s7716_s29 }
 0x1ea   :  { %9287 = vst [vmem:[#allocation32_spill] sm:$0xff] %v7741_v11  ;;  %9288 = vst [vmem:[#allocation33_spill] sm:$0xff] %v7744_v33  ;;  %v945_v12 = vadd.f32 %v7741_v11, %v912_v17  ;;  %v947_v55 = vadd.f32 %v7741_v11, %v914_v1  ;;  %v949_v56 = vadd.f32 %v7741_v11, %v916_v27 }
 0x1eb   :  { %9289 = vst [vmem:[#allocation34_spill] sm:$0xff] %v7747_v41  ;;  %v951_v8 = vadd.f32 %v7741_v11, %v918_v9  ;;  %v953_v18 = vadd.f32 %v7741_v11, %v920_v35  ;;  %v955_v10 = vadd.f32 %v7741_v11, %v922_v26  ;;  %v957_v38 = vadd.f32 %v7741_v11, %v924_v30 }
 0x1ec   :  { %v959_v62 = vadd.f32 %v7741_v11, %v926_v63  ;;  %v7758_v60 = vadd.f32 %v7741_v11, %v928_v57  ;;  %v7761_v58 = vadd.f32 %v7741_v11, %v930_v48  ;;  %v7764_v5 = vadd.f32 %v7741_v11, %v932_v43 }
 0x1ed   :  { %v7767_v39 = vadd.f32 %v7741_v11, %v934_v20  ;;  %v7770_v6 = vadd.f32 %v7741_v11, %v936_v37  ;;  %v7773_v46 = vadd.f32 %v7741_v11, %v938_v7  ;;  %v7776_v3 = vadd.f32 %v7741_v11, %v940_v40 }
 0x1ee   :  { %v7779_v24 = vadd.f32 %v7741_v11, %v942_v59  ;;  %v977_v52 = vmax.f32 %v945_v12, 0.0  ;;  %v979_v2 = vmax.f32 %v947_v55, 0.0  ;;  %v981_v14 = vmax.f32 %v949_v56, 0.0 }
 0x1ef   :  { %v983_v51 = vmax.f32 %v951_v8, 0.0  ;;  %v985_v49 = vmax.f32 %v953_v18, 0.0  ;;  %v987_v22 = vmax.f32 %v955_v10, 0.0  ;;  %v989_v42 = vmax.f32 %v957_v38, 0.0 }
 0x1f0   :  { %v991_v0 = vmax.f32 %v959_v62, 0.0  ;;  %v993_v31 = vmax.f32 %v7758_v60, 0.0  ;;  %v995_v61 = vmax.f32 %v7761_v58, 0.0  ;;  %v997_v44 = vmax.f32 %v7764_v5, 0.0 }
 0x1f1   :  { %v999_v4 = vmax.f32 %v7767_v39, 0.0  ;;  %v1001_v23 = vmax.f32 %v7770_v6, 0.0  ;;  %v1003_v47 = vmax.f32 %v7773_v46, 0.0  ;;  %v1005_v54 = vmax.f32 %v7776_v3, 0.0 }
 0x1f2   :  { %v1007_v45 = vmax.f32 %v7779_v24, 0.0  ;;  %v1043_v19 = vrot.slane %v977_v52, 1  ;;  %v1044_v16 = vrot.slane %v979_v2, 1  ;;  %v1049_v34 = vrot.slane %v981_v14, 1 }
 0x1f3   :  { %v1050_v15 = vrot.slane %v983_v51, 1  ;;  %v1055_v13 = vrot.slane %v985_v49, 1  ;;  %v1056_v17 = vrot.slane %v987_v22, 1  ;;  %v1061_v25 = vrot.slane %v989_v42, 1 }
 0x1f4   :  { %v1062_v1 = vrot.slane %v991_v0, 1  ;;  %v1045_v27 = vsel %vm224_vm0, %v1043_v19, %v1044_v16  ;;  %v1067_v29 = vrot.slane %v993_v31, 1  ;;  %v1068_v35 = vrot.slane %v995_v61, 1 }
 0x1f5   :  { %v1051_v9 = vsel %vm224_vm0, %v1049_v34, %v1050_v15  ;;  %v1057_v26 = vsel %vm224_vm0, %v1055_v13, %v1056_v17  ;;  %v1073_v63 = vrot.slane %v997_v44, 1  ;;  %v1074_v57 = vrot.slane %v999_v4, 1 }
 0x1f6   :  { %v1063_v30 = vsel %vm224_vm0, %v1061_v25, %v1062_v1  ;;  %v1069_v48 = vsel %vm224_vm0, %v1067_v29, %v1068_v35  ;;  %v1079_v43 = vrot.slane %v1001_v23, 1  ;;  %v1080_v20 = vrot.slane %v1003_v47, 1 }
 0x1f7   :  { %v1085_v37 = vrot.slane %v1005_v54, 1  ;;  %v1075_v7 = vsel %vm224_vm0, %v1073_v63, %v1074_v57  ;;  %v1086_v40 = vrot.slane %v1007_v45, 1  ;;  %v1121_v59 = vmax.f32 %v977_v52, %v1045_v27 }
 0x1f8   :  { %v1123_v12 = vmax.f32 %v979_v2, %v1044_v16  ;;  %v1081_v55 = vsel %vm224_vm0, %v1079_v43, %v1080_v20  ;;  %v1125_v56 = vmax.f32 %v981_v14, %v1051_v9  ;;  %v1127_v8 = vmax.f32 %v983_v51, %v1050_v15  ;;  %v7850_v16 = vld [vmem:[%s8890_s1 + $0x30] sm:$0xff]  ;;  %v7856_v15 = vld [vmem:[%s8890_s1 + $0x38] sm:$0x33] }
 0x1f9   :  { %v1129_v18 = vmax.f32 %v985_v49, %v1057_v26  ;;  %v1087_v10 = vsel %vm224_vm0, %v1085_v37, %v1086_v40  ;;  %v1131_v38 = vmax.f32 %v987_v22, %v1056_v17  ;;  %v1133_v62 = vmax.f32 %v989_v42, %v1063_v30  ;;  %1153 = vst [vmem:[#allocation2] sm:$0xff] %v1121_v59  ;;  %v7820_v22 = vld [vmem:[%s8890_s1] sm:$0xff]  ;;  %v7874_v9 = vld [vmem:[%s8890_s1 + $0x50] sm:$0xff]  ;;  %v7904_v59 = vld [vmem:[%s8890_s1 + $0x78] sm:$0x33] }
 0x1fa   :  { %v1135_v60 = vmax.f32 %v991_v0, %v1062_v1  ;;  %1155 = vst [vmem:[#allocation2 + $0x18] sm:$0x7] %v1123_v12  ;;  %v1137_v58 = vmax.f32 %v993_v31, %v1069_v48  ;;  %v1139_v5 = vmax.f32 %v995_v61, %v1068_v35  ;;  %v1141_v39 = vmax.f32 %v997_v44, %v1075_v7  ;;  %v4627_v0 = vld [vmem:[%s8890_s1 + $0x8] sm:$0x33]  ;;  %v7829_v61 = vld [vmem:[%s8890_s1 + $0x10] sm:$0xff]  ;;  %v7862_v17 = vld [vmem:[%s8890_s1 + $0x40] sm:$0xff] }
 0x1fb   :  { %v1143_v6 = vmax.f32 %v999_v4, %v1074_v57  ;;  %1157 = vst [vmem:[#allocation2 + $0x68] sm:$0xff] %v1125_v56  ;;  %1159 = vst [vmem:[#allocation2 + $0x48] sm:$0x7] %v1127_v8  ;;  %v1145_v46 = vmax.f32 %v1001_v23, %v1081_v55  ;;  %v1147_v3 = vmax.f32 %v1003_v47, %v1080_v20  ;;  %v7806_v2 = vstv %s7789_s10  ;;  %v4629_v4 = vld [vmem:[%s8890_s1 + $0x18] sm:$0x33]  ;;  %v7838_v47 = vld [vmem:[%s8890_s1 + $0x20] sm:$0xff] }
 0x1fc   :  { %1161 = vst [vmem:[#allocation2 + $0x88] sm:$0xff] %v1129_v18  ;;  %v1149_v24 = vmax.f32 %v1005_v54, %v1087_v10  ;;  %v1151_v52 = vmax.f32 %v1007_v45, %v1086_v40  ;;  %1163 = vst [vmem:[#allocation2 + $0xb8] sm:$0x7] %v1131_v38  ;;  %v7809_v14 = vstv %s7791_s11  ;;  %v7812_v51 = vstv %s7793_s13  ;;  %v7844_v45 = vld [vmem:[%s8890_s1 + $0x28] sm:$0x33]  ;;  %v7886_v48 = vld [vmem:[%s8890_s1 + $0x60] sm:$0xff] }
 0x1fd   :  { %1165 = vst [vmem:[#allocation2 + $0xf0] sm:$0xff] %v1133_v62  ;;  %1167 = vst [vmem:[#allocation2 + $0x78] sm:$0x7] %v1135_v60  ;;  %v7815_v49 = vstv %s7797_s12  ;;  %v9028_v42 = vunpack.c.l.bf16 %v7820_v22  ;;  %v72_v31 = vunpack.c.l.bf16 %v4627_v0  ;;  %v9029_v44 = vunpack.c.l.bf16 %v7829_v61  ;;  %v7868_v1 = vld [vmem:[%s8890_s1 + $0x48] sm:$0x33]  ;;  %v7898_v7 = vld [vmem:[%s8890_s1 + $0x70] sm:$0xff] }
 0x1fe   :  { %1169 = vst [vmem:[#allocation2 + $0x58] sm:$0xff] %v1137_v58  ;;  %1171 = vst [vmem:[#allocation2 + $0xc8] sm:$0x7] %v1139_v5  ;;  %v76_v23 = vunpack.c.l.bf16 %v4629_v4  ;;  %v7880_v35 = vld [vmem:[%s8890_s1 + $0x58] sm:$0x33] }
 0x1ff   :  { %1173 = vst [vmem:[#allocation2 + $0x90] sm:$0xff] %v1141_v39  ;;  %1175 = vst [vmem:[#allocation2 + $0xc0] sm:$0x7] %v1143_v6  ;;  %v7892_v20 = vld [vmem:[%s8890_s1 + $0x68] sm:$0x33]  ;;  %v7915_v62 = vmul.f32 %v6937_v53, %v9028_v42 }
 0x200   :  { %9290 = vst [vmem:[#allocation16_spill] sm:$0xff] %v7806_v2  ;;  %1177 = vst [vmem:[#allocation2 + $0xd0] sm:$0xff] %v1145_v46  ;;  %v1191_v30 = vld [vmem:[#allocation2] sm:$0x7]  ;;  %v1321_v57 = vld [vmem:[#allocation2] sm:$0x70] }
 0x201   :  { %1179 = vst [vmem:[#allocation2 + $0x28] sm:$0x7] %v1147_v3  ;;  %1181 = vst [vmem:[#allocation2 + $0xf8] sm:$0xff] %v1149_v24  ;;  %v1224_v63 = vld [vmem:[#allocation2] sm:$0x1c]  ;;  %v1208_v8 = vmul.f32 %v7744_v33, %v1191_v30  ;;  %v7910_v38 = vmul.f32 %v7806_v2, %v1321_v57  ;;  %v7921_v3 = vmul.f32 %v6937_v53, %v72_v31 }
 0x202   :  { %1183 = vst [vmem:[#allocation2 + $0x98] sm:$0x7] %v1151_v52  ;;  %v1193_v55 = vld [vmem:[#allocation2 + $0x68] sm:$0x7]  ;;  %v1241_v10 = vmul.f32 %v7747_v41, %v1224_v63  ;;  %v7929_v57 = vmul.f32 %v6937_v53, %v9029_v44  ;;  %v1323_v27 = vld [vmem:[#allocation2 + $0x68] sm:$0x70] }
 0x203   :  { %v1195_v56 = vld [vmem:[#allocation2 + $0x88] sm:$0x7]  ;;  %v1210_v58 = vmul.f32 %v7744_v33, %v1193_v55 }
 0x204   :  { %v1226_v18 = vld [vmem:[#allocation2 + $0x68] sm:$0x1c]  ;;  %v1197_v60 = vld [vmem:[#allocation2 + $0xf0] sm:$0x7]  ;;  %v1212_v5 = vmul.f32 %v7744_v33, %v1195_v56  ;;  %v1273_v43 = vrot.slane %v1241_v10, 2 }
 0x205   :  { %v1228_v39 = vld [vmem:[#allocation2 + $0x88] sm:$0x1c]  ;;  %v1230_v6 = vld [vmem:[#allocation2 + $0xf0] sm:$0x1c]  ;;  %v1243_v46 = vmul.f32 %v7747_v41, %v1226_v18  ;;  %v1199_v24 = vld [vmem:[#allocation2 + $0x58] sm:$0x7]  ;;  %v1214_v0 = vmul.f32 %v7744_v33, %v1197_v60  ;;  %v7935_v60 = vmul.f32 %v6937_v53, %v76_v23 }
 0x206   :  { %v1201_v52 = vld [vmem:[#allocation2 + $0x90] sm:$0x7]  ;;  %v1232_v4 = vld [vmem:[#allocation2 + $0x58] sm:$0x1c]  ;;  %v1245_v30 = vmul.f32 %v7747_v41, %v1228_v39  ;;  %v1247_v63 = vmul.f32 %v7747_v41, %v1230_v6  ;;  %v1216_v18 = vmul.f32 %v7744_v33, %v1199_v24  ;;  %v1305_v34 = vadd.f32 %v1273_v43, %v1208_v8  ;;  %v1418_v8 = vld [vmem:[#allocation2] sm:$0xc0] }
 0x207   :  { %v1203_v55 = vld [vmem:[#allocation2 + $0xd0] sm:$0x7]  ;;  %v1218_v31 = vmul.f32 %v7744_v33, %v1201_v52  ;;  %v1249_v12 = vmul.f32 %v7747_v41, %v1232_v4  ;;  %v1275_v52 = vrot.slane %v1243_v46, 2  ;;  %v1325_v4 = vld [vmem:[#allocation2 + $0x88] sm:$0x70]  ;;  %v1340_v46 = vmul.f32 %v7806_v2, %v1323_v27 }
 0x208   :  { %v1205_v56 = vld [vmem:[#allocation2 + $0xf8] sm:$0x7]  ;;  %v1234_v42 = vld [vmem:[#allocation2 + $0x90] sm:$0x1c]  ;;  %v1220_v39 = vmul.f32 %v7744_v33, %v1203_v55  ;;  %v1277_v29 = vrot.slane %v1245_v30, 2  ;;  %v1279_v25 = vrot.slane %v1247_v63, 2 }
 0x209   :  { %v1222_v6 = vmul.f32 %v7744_v33, %v1205_v56  ;;  %v1236_v40 = vld [vmem:[#allocation2 + $0xd0] sm:$0x1c]  ;;  %v1238_v37 = vld [vmem:[#allocation2 + $0xf8] sm:$0x1c]  ;;  %v1251_v44 = vmul.f32 %v7747_v41, %v1234_v42  ;;  %v1281_v23 = vrot.slane %v1249_v12, 2  ;;  %v1307_v54 = vadd.f32 %v1275_v52, %v1210_v58 }
 0x20a   :  { %v1253_v26 = vmul.f32 %v7747_v41, %v1236_v40  ;;  %v1255_v24 = vmul.f32 %v7747_v41, %v1238_v37  ;;  %v1327_v55 = vld [vmem:[#allocation2 + $0xf0] sm:$0x70]  ;;  %v1309_v33 = vadd.f32 %v1277_v29, %v1212_v5  ;;  %v1329_v11 = vld [vmem:[#allocation2 + $0x58] sm:$0x70]  ;;  %v1311_v10 = vadd.f32 %v1279_v25, %v1214_v0  ;;  %v1422_v58 = vld [vmem:[#allocation2 + $0x68] sm:$0xc0] }
 0x20b   :  { %v1283_v13 = vrot.slane %v1251_v44, 2  ;;  %v1331_v42 = vld [vmem:[#allocation2 + $0x90] sm:$0x70]  ;;  %v1313_v28 = vadd.f32 %v1281_v23, %v1216_v18  ;;  %v1335_v37 = vld [vmem:[#allocation2 + $0xf8] sm:$0x70]  ;;  %v1342_v12 = vmul.f32 %v7806_v2, %v1325_v4  ;;  %v1344_v44 = vmul.f32 %v7806_v2, %v1327_v55 }
 0x20c   :  { %v1285_v19 = vrot.slane %v1253_v26, 2  ;;  %v1287_v56 = vrot.slane %v1255_v24, 2  ;;  %v1333_v32 = vld [vmem:[#allocation2 + $0xd0] sm:$0x70]  ;;  %v1346_v26 = vmul.f32 %v7806_v2, %v1329_v11  ;;  %v1348_v43 = vmul.f32 %v7806_v2, %v1331_v42  ;;  %v1424_v5 = vld [vmem:[#allocation2 + $0x48] sm:$0x1] }
 0x20d   :  { %v1315_v40 = vadd.f32 %v1283_v13, %v1218_v31  ;;  %v1350_v29 = vmul.f32 %v7806_v2, %v1333_v32  ;;  %v1352_v25 = vmul.f32 %v7806_v2, %v1335_v37  ;;  %v1420_v13 = vld [vmem:[#allocation2 + $0x18] sm:$0x1]  ;;  %v1370_v27 = vrot.slane %v7910_v38, 4  ;;  %v1426_v18 = vld [vmem:[#allocation2 + $0x88] sm:$0xc0] }
 0x20e   :  { %v1317_v30 = vadd.f32 %v1285_v19, %v1220_v39  ;;  %v1319_v41 = vadd.f32 %v1287_v56, %v1222_v6  ;;  %v1372_v19 = vrot.slane %v1340_v46, 4  ;;  %v1374_v0 = vrot.slane %v1342_v12, 4  ;;  %v1428_v31 = vld [vmem:[#allocation2 + $0xb8] sm:$0x1]  ;;  %v1430_v52 = vld [vmem:[#allocation2 + $0xf0] sm:$0xc0] }
 0x20f   :  { %v1376_v63 = vrot.slane %v1344_v44, 4  ;;  %v1378_v39 = vrot.slane %v1346_v26, 4  ;;  %v1380_v6 = vrot.slane %v1348_v43, 4  ;;  %v1382_v11 = vrot.slane %v1350_v29, 4  ;;  %v1432_v56 = vld [vmem:[#allocation2 + $0x78] sm:$0x1] }
 0x210   :  { %v1384_v24 = vrot.slane %v1352_v25, 4  ;;  %v1402_v4 = vadd.f32 %v1370_v27, %v1305_v34  ;;  %v1404_v32 = vadd.f32 %v1372_v19, %v1307_v54  ;;  %v1406_v23 = vadd.f32 %v1374_v0, %v1309_v33  ;;  %v1434_v42 = vld [vmem:[#allocation2 + $0x58] sm:$0xc0]  ;;  %v1436_v37 = vld [vmem:[#allocation2 + $0xc8] sm:$0x1] }
 0x211   :  { %v1408_v55 = vadd.f32 %v1376_v63, %v1311_v10  ;;  %v1410_v2 = vadd.f32 %v1378_v39, %v1313_v28  ;;  %v7950_v50 = vadd.f32 %v1380_v6, %v1315_v40  ;;  %v1414_v38 = vadd.f32 %v1382_v11, %v1317_v30  ;;  %v1438_v12 = vld [vmem:[#allocation2 + $0x90] sm:$0xc0]  ;;  %v1440_v44 = vld [vmem:[#allocation2 + $0xc0] sm:$0x1]  ;;  %v1444_v43 = vld [vmem:[#allocation2 + $0x28] sm:$0x1] }
 0x212   :  { %v7952_v46 = vadd.f32 %v1384_v24, %v1319_v41  ;;  %v1442_v26 = vld [vmem:[#allocation2 + $0xd0] sm:$0xc0]  ;;  %v1446_v29 = vld [vmem:[#allocation2 + $0xf8] sm:$0xc0]  ;;  %v1448_v25 = vld [vmem:[#allocation2 + $0x98] sm:$0x1]  ;;  %v1451_v34 = vmul.f32 %v7809_v14, %v1418_v8  ;;  %v1453_v33 = vmul.f32 %v7809_v14, %v1420_v13  ;;  %v1455_v54 = vmul.f32 %v7809_v14, %v1422_v58 }
 0x213   :  { %v1457_v10 = vmul.f32 %v7809_v14, %v1424_v5  ;;  %v1459_v28 = vmul.f32 %v7809_v14, %v1426_v18  ;;  %v1461_v40 = vmul.f32 %v7809_v14, %v1428_v31  ;;  %v1463_v41 = vmul.f32 %v7809_v14, %v1430_v52 }
 0x214   :  { %v1465_v30 = vmul.f32 %v7809_v14, %v1432_v56  ;;  %v1467_v27 = vmul.f32 %v7809_v14, %v1434_v42  ;;  %v1469_v19 = vmul.f32 %v7809_v14, %v1436_v37  ;;  %v1471_v8 = vmul.f32 %v7809_v14, %v1438_v12 }
 0x215   :  { %v1473_v13 = vmul.f32 %v7809_v14, %v1440_v44  ;;  %v1475_v58 = vmul.f32 %v7809_v14, %v1442_v26  ;;  %v1477_v5 = vmul.f32 %v7809_v14, %v1444_v43  ;;  %v1479_v0 = vmul.f32 %v7809_v14, %v1446_v29 }
 0x216   :  { %v1481_v63 = vmul.f32 %v7809_v14, %v1448_v25  ;;  %v1518_v18 = vrot.slane %v1451_v34, 6  ;;  %v1519_v31 = vrot.slane %v1453_v33, 6  ;;  %v1524_v39 = vrot.slane %v1455_v54, 6  ;;  %v1596_v34 = vld [vmem:[#allocation2 + $0x18] sm:$0x7] }
 0x217   :  { %v1525_v6 = vrot.slane %v1457_v10, 6  ;;  %v1530_v11 = vrot.slane %v1459_v28, 6  ;;  %v1531_v24 = vrot.slane %v1461_v40, 6  ;;  %v1536_v52 = vrot.slane %v1463_v41, 6  ;;  %v1598_v33 = vld [vmem:[#allocation2 + $0x48] sm:$0x7] }
 0x218   :  { %v1537_v56 = vrot.slane %v1465_v30, 6  ;;  %v1520_v42 = vsel %vm1514_vm4, %v1518_v18, %v1519_v31  ;;  %v1542_v12 = vrot.slane %v1467_v27, 6  ;;  %v1543_v44 = vrot.slane %v1469_v19, 6  ;;  %v1600_v41 = vld [vmem:[#allocation2 + $0xb8] sm:$0x7] }
 0x219   :  { %v1526_v37 = vsel %vm1514_vm4, %v1524_v39, %v1525_v6  ;;  %v1532_v26 = vsel %vm1514_vm4, %v1530_v11, %v1531_v24  ;;  %v1548_v29 = vrot.slane %v1471_v8, 6  ;;  %v1549_v25 = vrot.slane %v1473_v13, 6  ;;  %v1602_v19 = vld [vmem:[#allocation2 + $0x78] sm:$0x7]  ;;  %v1604_v39 = vld [vmem:[#allocation2 + $0xc8] sm:$0x7] }
 0x21a   :  { %v1538_v43 = vsel %vm1514_vm4, %v1536_v52, %v1537_v56  ;;  %v1544_v54 = vsel %vm1514_vm4, %v1542_v12, %v1543_v44  ;;  %v1554_v10 = vrot.slane %v1475_v58, 6  ;;  %v1555_v28 = vrot.slane %v1477_v5, 6  ;;  %v1606_v24 = vld [vmem:[#allocation2 + $0xc0] sm:$0x7]  ;;  %v1608_v52 = vld [vmem:[#allocation2 + $0x28] sm:$0x7] }
 0x21b   :  { %v1560_v40 = vrot.slane %v1479_v0, 6  ;;  %v1550_v30 = vsel %vm1514_vm4, %v1548_v29, %v1549_v25  ;;  %v1561_v18 = vrot.slane %v1481_v63, 6  ;;  %v1580_v31 = vadd.f32 %v1520_v42, %v1402_v4  ;;  %v1610_v56 = vld [vmem:[#allocation2 + $0x98] sm:$0x7] }
 0x21c   :  { %v1582_v27 = vadd.f32 %v1526_v37, %v1404_v32  ;;  %v1556_v6 = vsel %vm1514_vm4, %v1554_v10, %v1555_v28  ;;  %v1584_v11 = vadd.f32 %v1532_v26, %v1406_v23  ;;  %v1586_v8 = vadd.f32 %v1538_v43, %v1408_v55 }
 0x21d   :  { %v1588_v13 = vadd.f32 %v1544_v54, %v1410_v2  ;;  %v1562_v58 = vsel %vm1514_vm4, %v1560_v40, %v1561_v18  ;;  %v1590_v5 = vadd.f32 %v1550_v30, %v7950_v50  ;;  %v1592_v0 = vadd.f32 %v1556_v6, %v1414_v38 }
 0x21e   :  { %v1613_v12 = vmul.f32 %v7812_v51, %v1596_v34  ;;  %v1594_v4 = vadd.f32 %v1562_v58, %v7952_v46  ;;  %v1615_v32 = vmul.f32 %v7812_v51, %v1598_v33  ;;  %v1617_v63 = vmul.f32 %v7812_v51, %v1600_v41 }
 0x21f   :  { %v1619_v23 = vmul.f32 %v7812_v51, %v1602_v19  ;;  %v1621_v2 = vmul.f32 %v7812_v51, %v1604_v39  ;;  %v1623_v55 = vmul.f32 %v7812_v51, %v1606_v24  ;;  %v1625_v42 = vmul.f32 %v7812_v51, %v1608_v52 }
 0x220   :  { %v1627_v50 = vmul.f32 %v7812_v51, %v1610_v56  ;;  %v1629_v38 = vadd.f32 %v1613_v12, %v1580_v31  ;;  %v1631_v37 = vadd.f32 %v1615_v32, %v1582_v27  ;;  %v1633_v44 = vadd.f32 %v1617_v63, %v1584_v11 }
 0x221   :  { %v1635_v26 = vadd.f32 %v1619_v23, %v1586_v8  ;;  %v1637_v43 = vadd.f32 %v1621_v2, %v1588_v13  ;;  %v1639_v46 = vadd.f32 %v1623_v55, %v1590_v5  ;;  %v1641_v29 = vadd.f32 %v1625_v42, %v1592_v0 }
 0x222   :  { %v1643_v25 = vadd.f32 %v1627_v50, %v1594_v4  ;;  %v1646_v34 = vadd.f32 %v7815_v49, %v1629_v38  ;;  %v1648_v33 = vadd.f32 %v7815_v49, %v1631_v37  ;;  %v1650_v54 = vadd.f32 %v7815_v49, %v1633_v44 }
 0x223   :  { %v1652_v10 = vadd.f32 %v7815_v49, %v1635_v26  ;;  %v1654_v28 = vadd.f32 %v7815_v49, %v1637_v43  ;;  %v1656_v40 = vadd.f32 %v7815_v49, %v1639_v46  ;;  %v1658_v41 = vadd.f32 %v7815_v49, %v1641_v29 }
 0x224   :  { %v1660_v30 = vadd.f32 %v7815_v49, %v1643_v25  ;;  %v1662_v18 = vmax.f32 %v1646_v34, 0.0  ;;  %v1664_v31 = vmax.f32 %v1648_v33, 0.0  ;;  %v1666_v27 = vmax.f32 %v1650_v54, 0.0 }
 0x225   :  { %v1668_v19 = vmax.f32 %v1652_v10, 0.0  ;;  %v1670_v39 = vmax.f32 %v1654_v28, 0.0  ;;  %v1672_v6 = vmax.f32 %v1656_v40, 0.0  ;;  %v1674_v11 = vmax.f32 %v1658_v41, 0.0 }
 0x226   :  { %v1676_v8 = vmax.f32 %v1660_v30, 0.0  ;;  %v1684_v13 = vsel %vm6017_vm5, %v1662_v18, 0.0  ;;  %v1686_v24 = vsel %vm6017_vm5, %v1664_v31, 0.0  ;;  %v1688_v52 = vsel %vm6017_vm5, %v1666_v27, 0.0 }
 0x227   :  { %v1690_v56 = vsel %vm6017_vm5, %v1668_v19, 0.0  ;;  %v1692_v58 = vsel %vm6017_vm5, %v1670_v39, 0.0  ;;  %v1694_v5 = vsel %vm6017_vm5, %v1672_v6, 0.0  ;;  %v1696_v0 = vsel %vm6017_vm5, %v1674_v11, 0.0 }
 0x228   :  { %v1698_v12 = vsel %vm6017_vm5, %v1676_v8, 0.0  ;;  %v1707_v4 = vsel %vm1699_vm13, %v1684_v13, -inf  ;;  %v1721_v32 = vsel %vm1699_vm13, %v1686_v24, -inf  ;;  %v1735_v63 = vsel %vm1699_vm13, %v1688_v52, -inf }
 0x229   :  { %v1749_v23 = vsel %vm1699_vm13, %v1690_v56, -inf  ;;  %v1708_v2 = vrot.slane %v1707_v4, 4  ;;  %v1722_v55 = vrot.slane %v1721_v32, 4  ;;  %v1736_v42 = vrot.slane %v1735_v63, 4 }
 0x22a   :  { %v1750_v50 = vrot.slane %v1749_v23, 4  ;;  %v1763_v38 = vsel %vm1699_vm13, %v1692_v58, -inf  ;;  %v1777_v37 = vsel %vm1699_vm13, %v1694_v5, -inf  ;;  %v1791_v44 = vsel %vm1699_vm13, %v1696_v0, -inf }
 0x22b   :  { %v1805_v26 = vsel %vm1699_vm13, %v1698_v12, -inf  ;;  %v1709_v43 = vmax.f32 %v1707_v4, %v1708_v2  ;;  %v1723_v46 = vmax.f32 %v1721_v32, %v1722_v55  ;;  %v1737_v29 = vmax.f32 %v1735_v63, %v1736_v42 }
 0x22c   :  { %v1751_v25 = vmax.f32 %v1749_v23, %v1750_v50  ;;  %v1764_v34 = vrot.slane %v1763_v38, 4  ;;  %v1778_v33 = vrot.slane %v1777_v37, 4  ;;  %v1792_v54 = vrot.slane %v1791_v44, 4 }
 0x22d   :  { %v1806_v10 = vrot.slane %v1805_v26, 4  ;;  %v1710_v28 = vrot.slane %v1709_v43, 2  ;;  %v1724_v40 = vrot.slane %v1723_v46, 2  ;;  %v1738_v41 = vrot.slane %v1737_v29, 2 }
 0x22e   :  { %v1752_v30 = vrot.slane %v1751_v25, 2  ;;  %v1765_v18 = vmax.f32 %v1763_v38, %v1764_v34  ;;  %v1779_v31 = vmax.f32 %v1777_v37, %v1778_v33  ;;  %v1793_v27 = vmax.f32 %v1791_v44, %v1792_v54 }
 0x22f   :  { %v1807_v19 = vmax.f32 %v1805_v26, %v1806_v10  ;;  %v1711_v39 = vmax.f32 %v1709_v43, %v1710_v28  ;;  %v1725_v6 = vmax.f32 %v1723_v46, %v1724_v40  ;;  %v1739_v11 = vmax.f32 %v1737_v29, %v1738_v41 }
 0x230   :  { %v1753_v8 = vmax.f32 %v1751_v25, %v1752_v30  ;;  %v1766_v13 = vrot.slane %v1765_v18, 2  ;;  %v1780_v24 = vrot.slane %v1779_v31, 2  ;;  %v1794_v52 = vrot.slane %v1793_v27, 2 }
 0x231   :  { %v1808_v56 = vrot.slane %v1807_v19, 2  ;;  %v1712_v58 = vrot.slane %v1711_v39, 1  ;;  %v1726_v5 = vrot.slane %v1725_v6, 1  ;;  %v1740_v0 = vrot.slane %v1739_v11, 1 }
 0x232   :  { %v1754_v12 = vrot.slane %v1753_v8, 1  ;;  %v1767_v4 = vmax.f32 %v1765_v18, %v1766_v13  ;;  %v1781_v32 = vmax.f32 %v1779_v31, %v1780_v24  ;;  %v1795_v63 = vmax.f32 %v1793_v27, %v1794_v52 }
 0x233   :  { %v1809_v23 = vmax.f32 %v1807_v19, %v1808_v56  ;;  %v1713_v2 = vmax.f32 %v1711_v39, %v1712_v58  ;;  %v1727_v55 = vmax.f32 %v1725_v6, %v1726_v5  ;;  %v1741_v42 = vmax.f32 %v1739_v11, %v1740_v0 }
 0x234   :  { %v1755_v50 = vmax.f32 %v1753_v8, %v1754_v12  ;;  %v1768_v38 = vrot.slane %v1767_v4, 1  ;;  %v1782_v37 = vrot.slane %v1781_v32, 1  ;;  %v1796_v44 = vrot.slane %v1795_v63, 1 }
 0x235   :  { %v1810_v26 = vrot.slane %v1809_v23, 1  ;;  %v4042_v43 = vsel %vm3996_vm6, %v1727_v55, %v1713_v2  ;;  %v9291_v46 = vunpack.c.l.bf16 %v7838_v47  ;;  %v9292_v25 = vunpack.c.l.bf16 %v7844_v45  ;;  %v8107_v55 = vld [vmem:[%s8890_s1 + $0x38] sm:$0x77] }
 0x236   :  { %v9293_v33 = vunpack.c.l.bf16 %v7850_v16  ;;  %v1769_v10 = vmax.f32 %v1767_v4, %v1768_v38  ;;  %v1783_v28 = vmax.f32 %v1781_v32, %v1782_v37  ;;  %v1797_v40 = vmax.f32 %v1795_v63, %v1796_v44  ;;  %v8088_v32 = vld [vmem:[%s8890_s1 + $0x8] sm:$0x77]  ;;  %v8094_v63 = vld [vmem:[%s8890_s1 + $0x18] sm:$0x77] }
 0x237   :  { %v8024_v29 = vmul.f32 %v6937_v53, %v9291_v46  ;;  %v8029_v34 = vmul.f32 %v6937_v53, %v9292_v25  ;;  %v1811_v41 = vmax.f32 %v1809_v23, %v1810_v26  ;;  %v4043_v30 = vsel %vm3998_vm7, %v1741_v42, %v4042_v43  ;;  %v8119_v37 = vld [vmem:[%s8890_s1 + $0x58] sm:$0x77]  ;;  %v8126_v43 = vld [vmem:[%s8890_s1 + $0x68] sm:$0x77] }
 0x238   :  { %v8034_v54 = vmul.f32 %v6937_v53, %v9293_v33  ;;  %v9294_v18 = vunpack.c.l.bf16 %v7856_v15  ;;  %v9295_v45 = vunpack.c.l.bf16 %v7862_v17  ;;  %v9296_v19 = vunpack.c.l.bf16 %v7868_v1  ;;  %v8132_v25 = vld [vmem:[%s8890_s1 + $0x78] sm:$0x77] }
 0x239   :  { %v4044_v6 = vsel %vm4000_vm8, %v1755_v50, %v4043_v30  ;;  %v9297_v11 = vunpack.c.l.bf16 %v7874_v9  ;;  %v9298_v15 = vunpack.c.l.bf16 %v7880_v35  ;;  %v9299_v24 = vunpack.c.l.bf16 %v7886_v48  ;;  %v8113_v50 = vld [vmem:[%s8890_s1 + $0x48] sm:$0x77] }
 0x23a   :  { %v8040_v31 = vmul.f32 %v6937_v53, %v9294_v18  ;;  %v8045_v27 = vmul.f32 %v6937_v53, %v9295_v45  ;;  %v8050_v39 = vmul.f32 %v6937_v53, %v9296_v19  ;;  %v4045_v1 = vsel %vm4002_vm9, %v1769_v10, %v4044_v6 }
 0x23b   :  { %v8056_v8 = vmul.f32 %v6937_v53, %v9297_v11  ;;  %v8061_v13 = vmul.f32 %v6937_v53, %v9298_v15  ;;  %v8066_v52 = vmul.f32 %v6937_v53, %v9299_v24  ;;  %v9300_v56 = vunpack.c.l.bf16 %v7892_v20 }
 0x23c   :  { %v9301_v5 = vunpack.c.l.bf16 %v7898_v7  ;;  %v9302_v35 = vunpack.c.l.bf16 %v7904_v59  ;;  %v4046_v4 = vsel %vm4004_vm10, %v1783_v28, %v4045_v1  ;;  %v143_v20 = vunpack.c.l.bf16 %v8088_v32 }
 0x23d   :  { %v8072_v58 = vmul.f32 %v6937_v53, %v9300_v56  ;;  %v145_v23 = vunpack.c.l.bf16 %v8094_v63  ;;  %v4047_v2 = vsel %vm4006_vm11, %v1797_v40, %v4046_v4  ;;  %v9047_v42 = vunpack.c.l.bf16 %v8107_v55 }
 0x23e   :  { %v8077_v0 = vmul.f32 %v6937_v53, %v9301_v5  ;;  %v8082_v12 = vmul.f32 %v6937_v53, %v9302_v35  ;;  %v8100_v53 = vld [vmem:[%s8890_s1 + $0x28] sm:$0x77]  ;;  %v9046_v38 = vunpack.c.l.bf16 %v8113_v50  ;;  %v9044_v44 = vunpack.c.l.bf16 %v8119_v37 }
 0x23f   :  { %v147_v59 = vunpack.c.l.bf16 %v8100_v53  ;;  %v4048_v26 = vsel %vm4008_vm12, %v1811_v41, %v4047_v2  ;;  %v9045_v46 = vunpack.c.l.bf16 %v8126_v43  ;;  %v157_v33 = vunpack.c.l.bf16 %v8132_v25 }
 0x240   :  { %v9303_v10 = vunpack.c.l.bf16 %v7820_v22  ;;  %4159 = vmatprep.mubr.f32.mxu0 %v4048_v26  ;;  %v162_v40 = vmul.f32 %v7226_v21, %v143_v20  ;;  %v9304_v41 = vunpack.c.l.bf16 %v7829_v61  ;;  %v166_v18 = vmul.f32 %v7226_v21, %v145_v23 }
 0x241   :  { %v9305_v45 = vunpack.c.l.bf16 %v7838_v47  ;;  %v170_v22 = vmul.f32 %v7226_v21, %v147_v59  ;;  %v9306_v6 = vunpack.c.l.bf16 %v7850_v16  ;;  %v174_v61 = vmul.f32 %v7226_v21, %v9047_v42 }
 0x242   :  { %v160_v28 = vmul.f32 %v7226_v21, %v9303_v10  ;;  %v164_v30 = vmul.f32 %v7226_v21, %v9304_v41  ;;  %v9307_v15 = vunpack.c.l.bf16 %v7862_v17  ;;  %v178_v47 = vmul.f32 %v7226_v21, %v9046_v38 }
 0x243   :  { %v168_v19 = vmul.f32 %v7226_v21, %v9305_v45  ;;  %v172_v11 = vmul.f32 %v7226_v21, %v9306_v6  ;;  %v9308_v1 = vunpack.c.l.bf16 %v7874_v9  ;;  %v182_v16 = vmul.f32 %v7226_v21, %v9044_v44 }
 0x244   :  { %v176_v24 = vmul.f32 %v7226_v21, %v9307_v15  ;;  %v9309_v5 = vunpack.c.l.bf16 %v7886_v48  ;;  %v186_v17 = vmul.f32 %v7226_v21, %v9045_v46  ;;  %v9310_v4 = vunpack.c.l.bf16 %v7898_v7 }
 0x245   :  { %v180_v56 = vmul.f32 %v7226_v21, %v9308_v1  ;;  %v190_v9 = vmul.f32 %v7226_v21, %v157_v33  ;;  %v225_v26 = vrot.slane %v160_v28, 1  ;;  %v226_v10 = vrot.slane %v162_v40, 1 }
 0x246   :  { %v184_v35 = vmul.f32 %v7226_v21, %v9309_v5  ;;  %v188_v2 = vmul.f32 %v7226_v21, %v9310_v4  ;;  %v231_v41 = vrot.slane %v164_v30, 1  ;;  %v232_v45 = vrot.slane %v166_v18, 1 }
 0x247   :  { %v237_v6 = vrot.slane %v168_v19, 1  ;;  %v238_v48 = vrot.slane %v170_v22, 1  ;;  %v243_v15 = vrot.slane %v172_v11, 1  ;;  %v244_v1 = vrot.slane %v174_v61, 1 }
 0x248   :  { %v249_v5 = vrot.slane %v176_v24, 1  ;;  %v227_v44 = vsel %vm224_vm0, %v225_v26, %v226_v10  ;;  %v233_v46 = vsel %vm224_vm0, %v231_v41, %v232_v45  ;;  %v250_v7 = vrot.slane %v178_v47, 1  ;;  %v8278_v26 = vld [vmem:[%s8890_s1 + $0x60] sm:$0xee]  ;;  %v8284_v41 = vld [vmem:[%s8890_s1 + $0x70] sm:$0xee] }
 0x249   :  { %v255_v38 = vrot.slane %v180_v56, 1  ;;  %v239_v4 = vsel %vm224_vm0, %v237_v6, %v238_v48  ;;  %v245_v42 = vsel %vm224_vm0, %v243_v15, %v244_v1  ;;  %v256_v21 = vrot.slane %v182_v16, 1  ;;  %v9311_v6 = vld [vmem:[#allocation31_spill] sm:$0xff] }
 0x24a   :  { %v261_v28 = vrot.slane %v184_v35, 1  ;;  %v251_v40 = vsel %vm224_vm0, %v249_v5, %v250_v7  ;;  %v262_v30 = vrot.slane %v186_v17, 1  ;;  %v267_v18 = vrot.slane %v188_v2, 1  ;;  %v8272_v2 = vld [vmem:[%s8890_s1 + $0x50] sm:$0xee] }
 0x24b   :  { %v268_v19 = vrot.slane %v190_v9, 1  ;;  %v257_v22 = vsel %vm224_vm0, %v255_v38, %v256_v21  ;;  %v8190_v11 = vadd.f32 %v227_v44, %v7915_v62  ;;  %v8193_v61 = vadd.f32 %v226_v10, %v7921_v3 }
 0x24c   :  { %v8196_v24 = vadd.f32 %v233_v46, %v7929_v57  ;;  %v263_v47 = vsel %vm224_vm0, %v261_v28, %v262_v30  ;;  %v8201_v16 = vadd.f32 %v232_v45, %v7935_v60  ;;  %v8204_v35 = vadd.f32 %v239_v4, %v8024_v29  ;;  %v8266_v46 = vld [vmem:[%s8890_s1 + $0x40] sm:$0xee] }
 0x24d   :  { %v269_v56 = vsel %vm224_vm0, %v267_v18, %v268_v19  ;;  %v8207_v38 = vadd.f32 %v238_v48, %v8029_v34  ;;  %v8210_v62 = vadd.f32 %v245_v42, %v8034_v54  ;;  %v8213_v3 = vadd.f32 %v244_v1, %v8040_v31 }
 0x24e   :  { %v8216_v57 = vadd.f32 %v251_v40, %v8045_v27  ;;  %v8219_v44 = vadd.f32 %v250_v7, %v8050_v39  ;;  %v8222_v60 = vadd.f32 %v257_v22, %v8056_v8  ;;  %v8225_v29 = vadd.f32 %v256_v21, %v8061_v13  ;;  %v8242_v39 = vld [vmem:[%s8890_s1] sm:$0xee]  ;;  %v8248_v13 = vld [vmem:[%s8890_s1 + $0x10] sm:$0xee] }
 0x24f   :  { %v8228_v34 = vadd.f32 %v263_v47, %v8066_v52  ;;  %v8231_v54 = vadd.f32 %v262_v30, %v8072_v58  ;;  %v8234_v31 = vadd.f32 %v269_v56, %v8077_v0  ;;  %v8237_v27 = vadd.f32 %v268_v19, %v8082_v12  ;;  %v8254_v58 = vld [vmem:[%s8890_s1 + $0x20] sm:$0xee]  ;;  %v8260_v12 = vld [vmem:[%s8890_s1 + $0x30] sm:$0xee] }
 0x250   :  { %v345_v8 = vunpack.c.l.bf16 %v8242_v39  ;;  %v347_v52 = vunpack.c.l.bf16 %v8248_v13  ;;  %v349_v0 = vunpack.c.l.bf16 %v8254_v58  ;;  %v9051_v42 = vunpack.c.l.bf16 %v8260_v12 }
 0x251   :  { %v9050_v17 = vunpack.c.l.bf16 %v8266_v46  ;;  %v9049_v9 = vunpack.c.l.bf16 %v8272_v2  ;;  %v9048_v10 = vunpack.c.l.bf16 %v8278_v26  ;;  %v9052_v45 = vunpack.c.l.bf16 %v8284_v41 }
 0x252   :  { %v362_v48 = vmul.f32 %v9311_v6, %v345_v8  ;;  %v364_v15 = vmul.f32 %v9311_v6, %v143_v20  ;;  %v366_v1 = vmul.f32 %v9311_v6, %v347_v52  ;;  %v368_v5 = vmul.f32 %v9311_v6, %v145_v23 }
 0x253   :  { %v370_v7 = vmul.f32 %v9311_v6, %v349_v0  ;;  %v372_v4 = vmul.f32 %v9311_v6, %v147_v59  ;;  %v374_v32 = vmul.f32 %v9311_v6, %v9051_v42  ;;  %v9312_v20 = vunpack.c.l.bf16 %v8107_v55 }
 0x254   :  { %v378_v63 = vmul.f32 %v9311_v6, %v9050_v17  ;;  %v9313_v23 = vunpack.c.l.bf16 %v8113_v50  ;;  %v382_v53 = vmul.f32 %v9311_v6, %v9049_v9  ;;  %v9314_v59 = vunpack.c.l.bf16 %v8119_v37 }
 0x255   :  { %v376_v21 = vmul.f32 %v9311_v6, %v9312_v20  ;;  %v386_v55 = vmul.f32 %v9311_v6, %v9048_v10  ;;  %v9315_v30 = vunpack.c.l.bf16 %v8126_v43  ;;  %v390_v50 = vmul.f32 %v9311_v6, %v9052_v45 }
 0x256   :  { %v380_v28 = vmul.f32 %v9311_v6, %v9313_v23  ;;  %v384_v40 = vmul.f32 %v9311_v6, %v9314_v59  ;;  %v392_v19 = vmul.f32 %v9311_v6, %v157_v33  ;;  %v427_v22 = vrot.slane %v362_v48, 2 }
 0x257   :  { %v388_v18 = vmul.f32 %v9311_v6, %v9315_v30  ;;  %v428_v37 = vrot.slane %v364_v15, 2  ;;  %v433_v47 = vrot.slane %v366_v1, 2  ;;  %v434_v56 = vrot.slane %v368_v5, 2 }
 0x258   :  { %v439_v20 = vrot.slane %v370_v7, 2  ;;  %v440_v23 = vrot.slane %v372_v4, 2  ;;  %v445_v59 = vrot.slane %v374_v32, 2  ;;  %v446_v10 = vrot.slane %v376_v21, 2 }
 0x259   :  { %v451_v9 = vrot.slane %v378_v63, 2  ;;  %v429_v43 = vsel %vm426_vm1, %v427_v22, %v428_v37  ;;  %v435_v30 = vsel %vm426_vm1, %v433_v47, %v434_v56  ;;  %v452_v17 = vrot.slane %v380_v28, 2  ;;  %v8436_v22 = vld [vmem:[%s8890_s1 + $0x78] sm:$0xff]  ;;  %v9316_v47 = vld [vmem:[#allocation15_spill] sm:$0xff] }
 0x25a   :  { %v457_v42 = vrot.slane %v382_v53, 2  ;;  %v441_v45 = vsel %vm426_vm1, %v439_v20, %v440_v23  ;;  %v447_v25 = vsel %vm426_vm1, %v445_v59, %v446_v10  ;;  %v458_v33 = vrot.slane %v384_v40, 2 }
 0x25b   :  { %v463_v6 = vrot.slane %v386_v55, 2  ;;  %v453_v48 = vsel %vm426_vm1, %v451_v9, %v452_v17  ;;  %v464_v15 = vrot.slane %v388_v18, 2  ;;  %v469_v1 = vrot.slane %v390_v50, 2  ;;  %v8424_v55 = vld [vmem:[%s8890_s1 + $0x58] sm:$0xff]  ;;  %v8430_v50 = vld [vmem:[%s8890_s1 + $0x68] sm:$0xff] }
 0x25c   :  { %v470_v5 = vrot.slane %v392_v19, 2  ;;  %v459_v7 = vsel %vm426_vm1, %v457_v42, %v458_v33  ;;  %v8342_v4 = vadd.f32 %v429_v43, %v8190_v11  ;;  %v8345_v32 = vadd.f32 %v428_v37, %v8193_v61 }
 0x25d   :  { %v8348_v21 = vadd.f32 %v435_v30, %v8196_v24  ;;  %v465_v63 = vsel %vm426_vm1, %v463_v6, %v464_v15  ;;  %v8353_v9 = vadd.f32 %v434_v56, %v8201_v16  ;;  %v8356_v53 = vadd.f32 %v441_v45, %v8204_v35 }
 0x25e   :  { %v471_v28 = vsel %vm426_vm1, %v469_v1, %v470_v5  ;;  %v8359_v42 = vadd.f32 %v440_v23, %v8207_v38  ;;  %v8362_v11 = vadd.f32 %v447_v25, %v8210_v62  ;;  %v8365_v61 = vadd.f32 %v446_v10, %v8213_v3  ;;  %v8418_v10 = vld [vmem:[%s8890_s1 + $0x48] sm:$0xff] }
 0x25f   :  { %v8368_v24 = vadd.f32 %v453_v48, %v8216_v57  ;;  %v8371_v40 = vadd.f32 %v452_v17, %v8219_v44  ;;  %v8374_v16 = vadd.f32 %v459_v7, %v8222_v60  ;;  %v8377_v35 = vadd.f32 %v458_v33, %v8225_v29  ;;  %v8394_v44 = vld [vmem:[%s8890_s1 + $0x8] sm:$0xff]  ;;  %v8400_v29 = vld [vmem:[%s8890_s1 + $0x18] sm:$0xff] }
 0x260   :  { %v8380_v38 = vadd.f32 %v465_v63, %v8228_v34  ;;  %v8383_v62 = vadd.f32 %v464_v15, %v8231_v54  ;;  %v8386_v3 = vadd.f32 %v471_v28, %v8234_v31  ;;  %v8389_v57 = vadd.f32 %v470_v5, %v8237_v27  ;;  %v8406_v54 = vld [vmem:[%s8890_s1 + $0x28] sm:$0xff]  ;;  %v8412_v27 = vld [vmem:[%s8890_s1 + $0x38] sm:$0xff] }
 0x261   :  { %v547_v60 = vunpack.c.l.bf16 %v8394_v44  ;;  %v549_v34 = vunpack.c.l.bf16 %v8400_v29  ;;  %v551_v31 = vunpack.c.l.bf16 %v8406_v54  ;;  %v9056_v17 = vunpack.c.l.bf16 %v8412_v27 }
 0x262   :  { %v9055_v45 = vunpack.c.l.bf16 %v8418_v10  ;;  %v9053_v18 = vunpack.c.l.bf16 %v8424_v55  ;;  %v9054_v19 = vunpack.c.l.bf16 %v8430_v50  ;;  %v561_v37 = vunpack.c.l.bf16 %v8436_v22 }
 0x263   :  { %v564_v56 = vmul.f32 %v9316_v47, %v345_v8  ;;  %v566_v20 = vmul.f32 %v9316_v47, %v547_v60  ;;  %v568_v23 = vmul.f32 %v9316_v47, %v347_v52  ;;  %v570_v59 = vmul.f32 %v9316_v47, %v549_v34 }
 0x264   :  { %v572_v43 = vmul.f32 %v9316_v47, %v349_v0  ;;  %v574_v39 = vmul.f32 %v9316_v47, %v551_v31  ;;  %v9317_v8 = vunpack.c.l.bf16 %v8260_v12  ;;  %v578_v13 = vmul.f32 %v9316_v47, %v9056_v17 }
 0x265   :  { %v9318_v52 = vunpack.c.l.bf16 %v8266_v46  ;;  %v582_v58 = vmul.f32 %v9316_v47, %v9055_v45  ;;  %v9319_v0 = vunpack.c.l.bf16 %v8272_v2  ;;  %v586_v12 = vmul.f32 %v9316_v47, %v9053_v18 }
 0x266   :  { %v576_v30 = vmul.f32 %v9316_v47, %v9317_v8  ;;  %v9320_v6 = vunpack.c.l.bf16 %v8278_v26  ;;  %v590_v46 = vmul.f32 %v9316_v47, %v9054_v19  ;;  %v9321_v15 = vunpack.c.l.bf16 %v8284_v41 }
 0x267   :  { %v580_v25 = vmul.f32 %v9316_v47, %v9318_v52  ;;  %v584_v33 = vmul.f32 %v9316_v47, %v9319_v0  ;;  %v594_v2 = vmul.f32 %v9316_v47, %v561_v37  ;;  %v629_v5 = vrot.slane %v564_v56, 3 }
 0x268   :  { %v588_v48 = vmul.f32 %v9316_v47, %v9320_v6  ;;  %v592_v1 = vmul.f32 %v9316_v47, %v9321_v15  ;;  %v630_v7 = vrot.slane %v566_v20, 3  ;;  %v635_v63 = vrot.slane %v568_v23, 3 }
 0x269   :  { %v636_v28 = vrot.slane %v570_v59, 3  ;;  %v641_v8 = vrot.slane %v572_v43, 3  ;;  %v642_v26 = vrot.slane %v574_v39, 3  ;;  %v647_v52 = vrot.slane %v576_v30, 3 }
 0x26a   :  { %v648_v0 = vrot.slane %v578_v13, 3  ;;  %v653_v6 = vrot.slane %v580_v25, 3  ;;  %v631_v18 = vsel %vm628_vm2, %v629_v5, %v630_v7  ;;  %v654_v41 = vrot.slane %v582_v58, 3  ;;  %v4672_v5 = vld [vmem:[%s8890_s1 + $0x60] sm:$0xcc] }
 0x26b   :  { %v637_v19 = vsel %vm628_vm2, %v635_v63, %v636_v28  ;;  %v659_v45 = vrot.slane %v584_v33, 3  ;;  %v643_v15 = vsel %vm628_vm2, %v641_v8, %v642_v26  ;;  %v660_v47 = vrot.slane %v586_v12, 3  ;;  %v4673_v63 = vld [vmem:[%s8890_s1 + $0x70] sm:$0xcc] }
 0x26c   :  { %v649_v17 = vsel %vm628_vm2, %v647_v52, %v648_v0  ;;  %v665_v56 = vrot.slane %v588_v48, 3  ;;  %v655_v20 = vsel %vm628_vm2, %v653_v6, %v654_v41  ;;  %v666_v23 = vrot.slane %v590_v46, 3  ;;  %v9322_v8 = vld [vmem:[#allocation12_spill] sm:$0xff] }
 0x26d   :  { %v671_v59 = vrot.slane %v592_v1, 3  ;;  %v672_v43 = vrot.slane %v594_v2, 3  ;;  %v661_v39 = vsel %vm628_vm2, %v659_v45, %v660_v47  ;;  %v8494_v30 = vadd.f32 %v631_v18, %v8342_v4  ;;  %v4671_v1 = vld [vmem:[%s8890_s1 + $0x50] sm:$0xcc] }
 0x26e   :  { %v8497_v13 = vadd.f32 %v630_v7, %v8345_v32  ;;  %v8500_v25 = vadd.f32 %v637_v19, %v8348_v21  ;;  %v667_v58 = vsel %vm628_vm2, %v665_v56, %v666_v23  ;;  %v8505_v12 = vadd.f32 %v636_v28, %v8353_v9  ;;  %v4670_v19 = vld [vmem:[%s8890_s1 + $0x40] sm:$0xcc] }
 0x26f   :  { %v673_v33 = vsel %vm628_vm2, %v671_v59, %v672_v43  ;;  %v8508_v48 = vadd.f32 %v643_v15, %v8356_v53  ;;  %v8511_v45 = vadd.f32 %v642_v26, %v8359_v42  ;;  %v8514_v4 = vadd.f32 %v649_v17, %v8362_v11 }
 0x270   :  { %v8517_v32 = vadd.f32 %v648_v0, %v8365_v61  ;;  %v8520_v21 = vadd.f32 %v655_v20, %v8368_v24  ;;  %v8523_v18 = vadd.f32 %v654_v41, %v8371_v40  ;;  %v8526_v9 = vadd.f32 %v661_v39, %v8374_v16  ;;  %v4666_v40 = vld [vmem:[%s8890_s1] sm:$0xcc] }
 0x271   :  { %v8529_v53 = vadd.f32 %v660_v47, %v8377_v35  ;;  %v8532_v42 = vadd.f32 %v667_v58, %v8380_v38  ;;  %v8535_v11 = vadd.f32 %v666_v23, %v8383_v62  ;;  %v8538_v61 = vadd.f32 %v673_v33, %v8386_v3  ;;  %v4667_v35 = vld [vmem:[%s8890_s1 + $0x10] sm:$0xcc]  ;;  %v4668_v62 = vld [vmem:[%s8890_s1 + $0x20] sm:$0xcc] }
 0x272   :  { %v8541_v24 = vadd.f32 %v672_v43, %v8389_v57  ;;  %v749_v16 = vunpack.c.l.bf16 %v4666_v40  ;;  %v751_v38 = vunpack.c.l.bf16 %v4667_v35  ;;  %v753_v17 = vunpack.c.l.bf16 %v4668_v62  ;;  %v4669_v3 = vld [vmem:[%s8890_s1 + $0x30] sm:$0xcc] }
 0x273   :  { %v755_v57 = vunpack.c.l.bf16 %v4669_v3  ;;  %v757_v46 = vunpack.c.l.bf16 %v4670_v19  ;;  %v759_v2 = vunpack.c.l.bf16 %v4671_v1  ;;  %v761_v7 = vunpack.c.l.bf16 %v4672_v5 }
 0x274   :  { %v763_v28 = vunpack.c.l.bf16 %v4673_v63  ;;  %v766_v26 = vmul.f32 %v9322_v8, %v749_v16  ;;  %v768_v52 = vmul.f32 %v9322_v8, %v547_v60  ;;  %v770_v0 = vmul.f32 %v9322_v8, %v751_v38 }
 0x275   :  { %v772_v6 = vmul.f32 %v9322_v8, %v549_v34  ;;  %v774_v41 = vmul.f32 %v9322_v8, %v753_v17  ;;  %v776_v15 = vmul.f32 %v9322_v8, %v551_v31  ;;  %v778_v47 = vmul.f32 %v9322_v8, %v755_v57 }
 0x276   :  { %v9323_v56 = vunpack.c.l.bf16 %v8412_v27  ;;  %v782_v60 = vmul.f32 %v9322_v8, %v757_v46  ;;  %v9324_v20 = vunpack.c.l.bf16 %v8418_v10  ;;  %v786_v34 = vmul.f32 %v9322_v8, %v759_v2 }
 0x277   :  { %v9325_v23 = vunpack.c.l.bf16 %v8424_v55  ;;  %v790_v31 = vmul.f32 %v9322_v8, %v761_v7  ;;  %v9326_v59 = vunpack.c.l.bf16 %v8430_v50  ;;  %v794_v43 = vmul.f32 %v9322_v8, %v763_v28 }
 0x278   :  { %v780_v44 = vmul.f32 %v9322_v8, %v9323_v56  ;;  %v784_v29 = vmul.f32 %v9322_v8, %v9324_v20  ;;  %v796_v10 = vmul.f32 %v9322_v8, %v561_v37  ;;  %v831_v39 = vrot.slane %v766_v26, 4  ;;  %v9327_v20 = vld [vmem:[#allocation32_spill] sm:$0xff] }
 0x279   :  { %v788_v54 = vmul.f32 %v9322_v8, %v9325_v23  ;;  %v792_v27 = vmul.f32 %v9322_v8, %v9326_v59  ;;  %v832_v58 = vrot.slane %v768_v52, 4  ;;  %v837_v33 = vrot.slane %v770_v0, 4 }
 0x27a   :  { %v838_v40 = vrot.slane %v772_v6, 4  ;;  %v843_v16 = vrot.slane %v774_v41, 4  ;;  %v844_v55 = vrot.slane %v776_v15, 4  ;;  %v849_v35 = vrot.slane %v778_v47, 4 }
 0x27b   :  { %v850_v38 = vrot.slane %v780_v44, 4  ;;  %v855_v62 = vrot.slane %v782_v60, 4  ;;  %v833_v17 = vsel %vm830_vm3, %v831_v39, %v832_v58  ;;  %v856_v3 = vrot.slane %v784_v29, 4 }
 0x27c   :  { %v839_v50 = vsel %vm830_vm3, %v837_v33, %v838_v40  ;;  %v861_v57 = vrot.slane %v786_v34, 4  ;;  %v845_v19 = vsel %vm830_vm3, %v843_v16, %v844_v55  ;;  %v862_v37 = vrot.slane %v788_v54, 4 }
 0x27d   :  { %v851_v22 = vsel %vm830_vm3, %v849_v35, %v850_v38  ;;  %v867_v46 = vrot.slane %v790_v31, 4  ;;  %v857_v1 = vsel %vm830_vm3, %v855_v62, %v856_v3  ;;  %v868_v2 = vrot.slane %v792_v27, 4 }
 0x27e   :  { %v873_v5 = vrot.slane %v794_v43, 4  ;;  %v874_v7 = vrot.slane %v796_v10, 4  ;;  %v863_v63 = vsel %vm830_vm3, %v861_v57, %v862_v37  ;;  %v911_v28 = vadd.f32 %v833_v17, %v8494_v30 }
 0x27f   :  { %v913_v8 = vadd.f32 %v832_v58, %v8497_v13  ;;  %v915_v26 = vadd.f32 %v839_v50, %v8500_v25  ;;  %v869_v52 = vsel %vm830_vm3, %v867_v46, %v868_v2  ;;  %v917_v6 = vadd.f32 %v838_v40, %v8505_v12 }
 0x280   :  { %v875_v0 = vsel %vm830_vm3, %v873_v5, %v874_v7  ;;  %v919_v41 = vadd.f32 %v845_v19, %v8508_v48  ;;  %v921_v15 = vadd.f32 %v844_v55, %v8511_v45  ;;  %v923_v47 = vadd.f32 %v851_v22, %v8514_v4 }
 0x281   :  { %v925_v56 = vadd.f32 %v850_v38, %v8517_v32  ;;  %v927_v30 = vadd.f32 %v857_v1, %v8520_v21  ;;  %v929_v13 = vadd.f32 %v856_v3, %v8523_v18  ;;  %v931_v25 = vadd.f32 %v863_v63, %v8526_v9 }
 0x282   :  { %v933_v44 = vadd.f32 %v862_v37, %v8529_v53  ;;  %v935_v60 = vadd.f32 %v869_v52, %v8532_v42  ;;  %v937_v12 = vadd.f32 %v868_v2, %v8535_v11  ;;  %v939_v48 = vadd.f32 %v875_v0, %v8538_v61 }
 0x283   :  { %v941_v45 = vadd.f32 %v874_v7, %v8541_v24  ;;  %v944_v4 = vadd.f32 %v9327_v20, %v911_v28  ;;  %v946_v32 = vadd.f32 %v9327_v20, %v913_v8  ;;  %v948_v21 = vadd.f32 %v9327_v20, %v915_v26 }
 0x284   :  { %v950_v18 = vadd.f32 %v9327_v20, %v917_v6  ;;  %v952_v9 = vadd.f32 %v9327_v20, %v919_v41  ;;  %v954_v53 = vadd.f32 %v9327_v20, %v921_v15  ;;  %v956_v42 = vadd.f32 %v9327_v20, %v923_v47 }
 0x285   :  { %v958_v11 = vadd.f32 %v9327_v20, %v925_v56  ;;  %v960_v61 = vadd.f32 %v9327_v20, %v927_v30  ;;  %v962_v24 = vadd.f32 %v9327_v20, %v929_v13  ;;  %v964_v29 = vadd.f32 %v9327_v20, %v931_v25 }
 0x286   :  { %v966_v34 = vadd.f32 %v9327_v20, %v933_v44  ;;  %v968_v23 = vadd.f32 %v9327_v20, %v935_v60  ;;  %v970_v54 = vadd.f32 %v9327_v20, %v937_v12  ;;  %v972_v31 = vadd.f32 %v9327_v20, %v939_v48 }
 0x287   :  { %v974_v59 = vadd.f32 %v9327_v20, %v941_v45  ;;  %v976_v27 = vmax.f32 %v944_v4, 0.0  ;;  %v978_v43 = vmax.f32 %v946_v32, 0.0  ;;  %v980_v10 = vmax.f32 %v948_v21, 0.0 }
 0x288   :  { %v982_v39 = vmax.f32 %v950_v18, 0.0  ;;  %v984_v58 = vmax.f32 %v952_v9, 0.0  ;;  %v986_v33 = vmax.f32 %v954_v53, 0.0  ;;  %v988_v40 = vmax.f32 %v956_v42, 0.0 }
 0x289   :  { %v990_v16 = vmax.f32 %v958_v11, 0.0  ;;  %v992_v55 = vmax.f32 %v960_v61, 0.0  ;;  %v994_v35 = vmax.f32 %v962_v24, 0.0  ;;  %v996_v38 = vmax.f32 %v964_v29, 0.0 }
 0x28a   :  { %v998_v62 = vmax.f32 %v966_v34, 0.0  ;;  %v1000_v17 = vmax.f32 %v968_v23, 0.0  ;;  %v1002_v50 = vmax.f32 %v970_v54, 0.0  ;;  %v1004_v3 = vmax.f32 %v972_v31, 0.0 }
 0x28b   :  { %v1006_v57 = vmax.f32 %v974_v59, 0.0  ;;  %v1040_v19 = vrot.slane %v976_v27, 1  ;;  %v1041_v22 = vrot.slane %v978_v43, 1  ;;  %v1046_v37 = vrot.slane %v980_v10, 1 }
 0x28c   :  { %v1047_v46 = vrot.slane %v982_v39, 1  ;;  %v1052_v1 = vrot.slane %v984_v58, 1  ;;  %v1053_v2 = vrot.slane %v986_v33, 1  ;;  %v1058_v5 = vrot.slane %v988_v40, 1 }
 0x28d   :  { %v1059_v7 = vrot.slane %v990_v16, 1  ;;  %v1064_v63 = vrot.slane %v992_v55, 1  ;;  %v1042_v28 = vsel %vm224_vm0, %v1040_v19, %v1041_v22  ;;  %v1065_v26 = vrot.slane %v994_v35, 1 }
 0x28e   :  { %v1048_v8 = vsel %vm224_vm0, %v1046_v37, %v1047_v46  ;;  %v1070_v52 = vrot.slane %v996_v38, 1  ;;  %v1054_v0 = vsel %vm224_vm0, %v1052_v1, %v1053_v2  ;;  %v1071_v41 = vrot.slane %v998_v62, 1 }
 0x28f   :  { %v1060_v6 = vsel %vm224_vm0, %v1058_v5, %v1059_v7  ;;  %v1076_v15 = vrot.slane %v1000_v17, 1  ;;  %v1066_v47 = vsel %vm224_vm0, %v1064_v63, %v1065_v26  ;;  %v1077_v56 = vrot.slane %v1002_v50, 1 }
 0x290   :  { %v1082_v30 = vrot.slane %v1004_v3, 1  ;;  %v1083_v13 = vrot.slane %v1006_v57, 1  ;;  %v1072_v25 = vsel %vm224_vm0, %v1070_v52, %v1071_v41  ;;  %v1120_v44 = vmax.f32 %v976_v27, %v1042_v28 }
 0x291   :  { %v1122_v60 = vmax.f32 %v978_v43, %v1041_v22  ;;  %v1124_v12 = vmax.f32 %v980_v10, %v1048_v8  ;;  %v1078_v48 = vsel %vm224_vm0, %v1076_v15, %v1077_v56  ;;  %v1126_v20 = vmax.f32 %v982_v39, %v1047_v46  ;;  %v9328_v10 = vld [vmem:[#allocation34_spill] sm:$0xff] }
 0x292   :  { %v1084_v45 = vsel %vm224_vm0, %v1082_v30, %v1083_v13  ;;  %v1128_v4 = vmax.f32 %v984_v58, %v1054_v0  ;;  %v1130_v32 = vmax.f32 %v986_v33, %v1053_v2  ;;  %v1132_v21 = vmax.f32 %v988_v40, %v1060_v6  ;;  %1152 = vst [vmem:[#allocation2 + $0xb0] sm:$0xff] %v1120_v44  ;;  %v9329_v40 = vld [vmem:[#allocation33_spill] sm:$0xff] }
 0x293   :  { %v1134_v18 = vmax.f32 %v990_v16, %v1059_v7  ;;  %v1136_v9 = vmax.f32 %v992_v55, %v1066_v47  ;;  %1154 = vst [vmem:[#allocation2 + $0xd8] sm:$0x7] %v1122_v60  ;;  %1156 = vst [vmem:[#allocation2 + $0x50] sm:$0xff] %v1124_v12  ;;  %v1138_v53 = vmax.f32 %v994_v35, %v1065_v26  ;;  %vm4373_vm1 = vcmask 64512  }
 0x294   :  { %v1140_v42 = vmax.f32 %v996_v38, %v1072_v25  ;;  %v1142_v11 = vmax.f32 %v998_v62, %v1071_v41  ;;  %v1144_v61 = vmax.f32 %v1000_v17, %v1078_v48  ;;  %1158 = vst [vmem:[#allocation2 + $0x30] sm:$0x7] %v1126_v20  ;;  %1160 = vst [vmem:[#allocation2 + $0x80] sm:$0xff] %v1128_v4  ;;  %vm4381_vm2 = vcmask 57344  }
 0x295   :  { %v1146_v24 = vmax.f32 %v1002_v50, %v1077_v56  ;;  %v1148_v29 = vmax.f32 %v1004_v3, %v1084_v45  ;;  %v1150_v34 = vmax.f32 %v1006_v57, %v1083_v13  ;;  %1162 = vst [vmem:[#allocation2 + $0xe8] sm:$0x7] %v1130_v32  ;;  %1164 = vst [vmem:[#allocation2 + $0x60] sm:$0xff] %v1132_v21 }
 0x296   :  { %1166 = vst [vmem:[#allocation2 + $0x8] sm:$0x7] %v1134_v18  ;;  %1168 = vst [vmem:[#allocation2 + $0x38] sm:$0xff] %v1136_v9 }
 0x297   :  { %1170 = vst [vmem:[#allocation2 + $0x40] sm:$0x7] %v1138_v53  ;;  %1172 = vst [vmem:[#allocation2 + $0xe0] sm:$0xff] %v1140_v42 }
 0x298   :  { %1174 = vst [vmem:[#allocation2 + $0x70] sm:$0x7] %v1142_v11  ;;  %1176 = vst [vmem:[#allocation2 + $0xa8] sm:$0xff] %v1144_v61 }
 0x299   :  { %1178 = vst [vmem:[#allocation2 + $0x10] sm:$0x7] %v1146_v24  ;;  %1180 = vst [vmem:[#allocation2 + $0xa0] sm:$0xff] %v1148_v29  ;;  %v1190_v23 = vld [vmem:[#allocation2 + $0xb0] sm:$0x7] }
 0x29a   :  { %1182 = vst [vmem:[#allocation2 + $0x20] sm:$0x7] %v1150_v34  ;;  %v1192_v54 = vld [vmem:[#allocation2 + $0x50] sm:$0x7]  ;;  %v1207_v16 = vmul.f32 %v9329_v40, %v1190_v23  ;;  %v1320_v6 = vld [vmem:[#allocation2 + $0xb0] sm:$0x70] }
 0x29b   :  { %v1223_v31 = vld [vmem:[#allocation2 + $0xb0] sm:$0x1c]  ;;  %v1194_v59 = vld [vmem:[#allocation2 + $0x80] sm:$0x7]  ;;  %v1209_v50 = vmul.f32 %v9329_v40, %v1192_v54  ;;  %v1324_v12 = vld [vmem:[#allocation2 + $0x80] sm:$0x70] }
 0x29c   :  { %v1225_v27 = vld [vmem:[#allocation2 + $0x50] sm:$0x1c]  ;;  %v1227_v43 = vld [vmem:[#allocation2 + $0x80] sm:$0x1c]  ;;  %v1240_v39 = vmul.f32 %v9328_v10, %v1223_v31  ;;  %v1211_v3 = vmul.f32 %v9329_v40, %v1194_v59 }
 0x29d   :  { %v1196_v58 = vld [vmem:[#allocation2 + $0x60] sm:$0x7]  ;;  %v1198_v33 = vld [vmem:[#allocation2 + $0x38] sm:$0x7]  ;;  %v1242_v35 = vmul.f32 %v9328_v10, %v1225_v27  ;;  %v1244_v38 = vmul.f32 %v9328_v10, %v1227_v43  ;;  %v1322_v30 = vld [vmem:[#allocation2 + $0x50] sm:$0x70] }
 0x29e   :  { %v1229_v55 = vld [vmem:[#allocation2 + $0x60] sm:$0x1c]  ;;  %v1213_v57 = vmul.f32 %v9329_v40, %v1196_v58  ;;  %v1231_v19 = vld [vmem:[#allocation2 + $0x38] sm:$0x1c]  ;;  %v1215_v46 = vmul.f32 %v9329_v40, %v1198_v33  ;;  %v1272_v0 = vrot.slane %v1240_v39, 2  ;;  %v9330_v24 = vld [vmem:[#allocation16_spill] sm:$0xff] }
 0x29f   :  { %v1200_v62 = vld [vmem:[#allocation2 + $0xe0] sm:$0x7]  ;;  %v1202_v17 = vld [vmem:[#allocation2 + $0xa8] sm:$0x7]  ;;  %v1246_v22 = vmul.f32 %v9328_v10, %v1229_v55  ;;  %v1248_v63 = vmul.f32 %v9328_v10, %v1231_v19  ;;  %v1274_v15 = vrot.slane %v1242_v35, 2  ;;  %v1276_v47 = vrot.slane %v1244_v38, 2 }
 0x2a0   :  { %v1204_v37 = vld [vmem:[#allocation2 + $0xa0] sm:$0x7]  ;;  %v1217_v1 = vmul.f32 %v9329_v40, %v1200_v62  ;;  %v1219_v2 = vmul.f32 %v9329_v40, %v1202_v17  ;;  %v1235_v7 = vld [vmem:[#allocation2 + $0xa8] sm:$0x1c]  ;;  %v1304_v60 = vadd.f32 %v1272_v0, %v1207_v16  ;;  %v1326_v32 = vld [vmem:[#allocation2 + $0x60] sm:$0x70]  ;;  %v1337_v29 = vmul.f32 %v9330_v24, %v1320_v6 }
 0x2a1   :  { %v1233_v5 = vld [vmem:[#allocation2 + $0xe0] sm:$0x1c]  ;;  %v1221_v28 = vmul.f32 %v9329_v40, %v1204_v37  ;;  %v1252_v52 = vmul.f32 %v9328_v10, %v1235_v7  ;;  %v1278_v56 = vrot.slane %v1246_v22, 2  ;;  %v1280_v13 = vrot.slane %v1248_v63, 2  ;;  %v1328_v21 = vld [vmem:[#allocation2 + $0x38] sm:$0x70] }
 0x2a2   :  { %v1237_v8 = vld [vmem:[#allocation2 + $0xa0] sm:$0x1c]  ;;  %v1250_v26 = vmul.f32 %v9328_v10, %v1233_v5  ;;  %v1306_v45 = vadd.f32 %v1274_v15, %v1209_v50  ;;  %v1308_v20 = vadd.f32 %v1276_v47, %v1211_v3  ;;  %v1332_v11 = vld [vmem:[#allocation2 + $0xa8] sm:$0x70]  ;;  %v1339_v23 = vmul.f32 %v9330_v24, %v1322_v30  ;;  %v1417_v39 = vld [vmem:[#allocation2 + $0xb0] sm:$0xc0] }
 0x2a3   :  { %v1254_v41 = vmul.f32 %v9328_v10, %v1237_v8  ;;  %v1284_v44 = vrot.slane %v1252_v52, 2  ;;  %v1310_v4 = vadd.f32 %v1278_v56, %v1213_v57  ;;  %v1312_v18 = vadd.f32 %v1280_v13, %v1215_v46  ;;  %v1330_v42 = vld [vmem:[#allocation2 + $0xe0] sm:$0x70]  ;;  %v1419_v58 = vld [vmem:[#allocation2 + $0xd8] sm:$0x1] }
 0x2a4   :  { %v1282_v25 = vrot.slane %v1250_v26, 2  ;;  %v1334_v61 = vld [vmem:[#allocation2 + $0xa0] sm:$0x70]  ;;  %v1341_v54 = vmul.f32 %v9330_v24, %v1324_v12  ;;  %v1343_v31 = vmul.f32 %v9330_v24, %v1326_v32  ;;  %v1345_v59 = vmul.f32 %v9330_v24, %v1328_v21  ;;  %v1421_v33 = vld [vmem:[#allocation2 + $0x50] sm:$0xc0] }
 0x2a5   :  { %v1286_v48 = vrot.slane %v1254_v41, 2  ;;  %v1316_v53 = vadd.f32 %v1284_v44, %v1219_v2  ;;  %v1347_v27 = vmul.f32 %v9330_v24, %v1330_v42  ;;  %v1349_v43 = vmul.f32 %v9330_v24, %v1332_v11  ;;  %v1423_v40 = vld [vmem:[#allocation2 + $0x30] sm:$0x1]  ;;  %v1425_v62 = vld [vmem:[#allocation2 + $0x80] sm:$0xc0] }
 0x2a6   :  { %v1314_v9 = vadd.f32 %v1282_v25, %v1217_v1  ;;  %v1351_v10 = vmul.f32 %v9330_v24, %v1334_v61  ;;  %v1369_v16 = vrot.slane %v1337_v29, 4  ;;  %v1371_v55 = vrot.slane %v1339_v23, 4  ;;  %v1427_v17 = vld [vmem:[#allocation2 + $0xe8] sm:$0x1]  ;;  %v1429_v22 = vld [vmem:[#allocation2 + $0x60] sm:$0xc0] }
 0x2a7   :  { %v1318_v34 = vadd.f32 %v1286_v48, %v1221_v28  ;;  %v1373_v35 = vrot.slane %v1341_v54, 4  ;;  %v1375_v38 = vrot.slane %v1343_v31, 4  ;;  %v1377_v50 = vrot.slane %v1345_v59, 4  ;;  %v1431_v5 = vld [vmem:[#allocation2 + $0x8] sm:$0x1] }
 0x2a8   :  { %v1379_v3 = vrot.slane %v1347_v27, 4  ;;  %v1381_v57 = vrot.slane %v1349_v43, 4  ;;  %v1383_v19 = vrot.slane %v1351_v10, 4  ;;  %v1401_v37 = vadd.f32 %v1369_v16, %v1304_v60  ;;  %v1433_v7 = vld [vmem:[#allocation2 + $0x38] sm:$0xc0] }
 0x2a9   :  { %v1403_v46 = vadd.f32 %v1371_v55, %v1306_v45  ;;  %v1405_v1 = vadd.f32 %v1373_v35, %v1308_v20  ;;  %v1407_v2 = vadd.f32 %v1375_v38, %v1310_v4  ;;  %v1435_v63 = vld [vmem:[#allocation2 + $0x40] sm:$0x1]  ;;  %v1409_v28 = vadd.f32 %v1377_v50, %v1312_v18  ;;  %v1437_v0 = vld [vmem:[#allocation2 + $0xe0] sm:$0xc0]  ;;  %v1439_v6 = vld [vmem:[#allocation2 + $0x70] sm:$0x1] }
 0x2aa   :  { %v8671_v8 = vadd.f32 %v1379_v3, %v1314_v9  ;;  %v1413_v26 = vadd.f32 %v1381_v57, %v1316_v53  ;;  %v8673_v52 = vadd.f32 %v1383_v19, %v1318_v34  ;;  %v1441_v41 = vld [vmem:[#allocation2 + $0xa8] sm:$0xc0]  ;;  %v1443_v15 = vld [vmem:[#allocation2 + $0x10] sm:$0x1]  ;;  %v1445_v47 = vld [vmem:[#allocation2 + $0xa0] sm:$0xc0]  ;;  %v1450_v30 = vmul.f32 %v7809_v14, %v1417_v39 }
 0x2ab   :  { %v1447_v56 = vld [vmem:[#allocation2 + $0x20] sm:$0x1]  ;;  %v1452_v13 = vmul.f32 %v7809_v14, %v1419_v58  ;;  %v1454_v25 = vmul.f32 %v7809_v14, %v1421_v33  ;;  %v1456_v44 = vmul.f32 %v7809_v14, %v1423_v40  ;;  %v1458_v60 = vmul.f32 %v7809_v14, %v1425_v62  ;;  %v1595_v40 = vld [vmem:[#allocation2 + $0xd8] sm:$0x7]  ;;  %v1597_v16 = vld [vmem:[#allocation2 + $0x30] sm:$0x7] }
 0x2ac   :  { %v1460_v12 = vmul.f32 %v7809_v14, %v1427_v17  ;;  %v1462_v48 = vmul.f32 %v7809_v14, %v1429_v22  ;;  %v1464_v45 = vmul.f32 %v7809_v14, %v1431_v5  ;;  %v1466_v20 = vmul.f32 %v7809_v14, %v1433_v7  ;;  %v1599_v17 = vld [vmem:[#allocation2 + $0xe8] sm:$0x7]  ;;  %v1603_v5 = vld [vmem:[#allocation2 + $0x40] sm:$0x7] }
 0x2ad   :  { %v1468_v4 = vmul.f32 %v7809_v14, %v1435_v63  ;;  %v1470_v32 = vmul.f32 %v7809_v14, %v1437_v0  ;;  %v1472_v21 = vmul.f32 %v7809_v14, %v1439_v6  ;;  %v1474_v18 = vmul.f32 %v7809_v14, %v1441_v41  ;;  %v1601_v22 = vld [vmem:[#allocation2 + $0x8] sm:$0x7]  ;;  %v1605_v41 = vld [vmem:[#allocation2 + $0x70] sm:$0x7] }
 0x2ae   :  { %v1476_v9 = vmul.f32 %v7809_v14, %v1443_v15  ;;  %v1478_v53 = vmul.f32 %v7809_v14, %v1445_v47  ;;  %v1480_v42 = vmul.f32 %v7809_v14, %v1447_v56  ;;  %v1515_v11 = vrot.slane %v1450_v30, 6  ;;  %v1607_v15 = vld [vmem:[#allocation2 + $0x10] sm:$0x7]  ;;  %v1609_v47 = vld [vmem:[#allocation2 + $0x20] sm:$0x7] }
 0x2af   :  { %v1516_v61 = vrot.slane %v1452_v13, 6  ;;  %v1521_v24 = vrot.slane %v1454_v25, 6  ;;  %v1522_v29 = vrot.slane %v1456_v44, 6  ;;  %v1527_v34 = vrot.slane %v1458_v60, 6 }
 0x2b0   :  { %v1528_v23 = vrot.slane %v1460_v12, 6  ;;  %v1533_v54 = vrot.slane %v1462_v48, 6  ;;  %v1534_v31 = vrot.slane %v1464_v45, 6  ;;  %v1539_v43 = vrot.slane %v1466_v20, 6 }
 0x2b1   :  { %v1517_v59 = vsel %vm1514_vm4, %v1515_v11, %v1516_v61  ;;  %v1523_v27 = vsel %vm1514_vm4, %v1521_v24, %v1522_v29  ;;  %v1540_v10 = vrot.slane %v1468_v4, 6  ;;  %v1545_v33 = vrot.slane %v1470_v32, 6 }
 0x2b2   :  { %v1529_v39 = vsel %vm1514_vm4, %v1527_v34, %v1528_v23  ;;  %v1535_v58 = vsel %vm1514_vm4, %v1533_v54, %v1534_v31  ;;  %v1546_v14 = vrot.slane %v1472_v21, 6  ;;  %v1551_v35 = vrot.slane %v1474_v18, 6 }
 0x2b3   :  { %v1541_v55 = vsel %vm1514_vm4, %v1539_v43, %v1540_v10  ;;  %v1552_v38 = vrot.slane %v1476_v9, 6  ;;  %v1557_v62 = vrot.slane %v1478_v53, 6  ;;  %v1558_v3 = vrot.slane %v1480_v42, 6 }
 0x2b4   :  { %v1547_v50 = vsel %vm1514_vm4, %v1545_v33, %v1546_v14  ;;  %v1579_v57 = vadd.f32 %v1517_v59, %v1401_v37  ;;  %v1581_v19 = vadd.f32 %v1523_v27, %v1403_v46  ;;  %v1583_v63 = vadd.f32 %v1529_v39, %v1405_v1 }
 0x2b5   :  { %v1553_v7 = vsel %vm1514_vm4, %v1551_v35, %v1552_v38  ;;  %v1585_v0 = vadd.f32 %v1535_v58, %v1407_v2  ;;  %v1587_v6 = vadd.f32 %v1541_v55, %v1409_v28  ;;  %v1559_v56 = vsel %vm1514_vm4, %v1557_v62, %v1558_v3 }
 0x2b6   :  { %v1589_v30 = vadd.f32 %v1547_v50, %v8671_v8  ;;  %v1591_v13 = vadd.f32 %v1553_v7, %v1413_v26  ;;  %v1612_v25 = vmul.f32 %v7812_v51, %v1595_v40  ;;  %v1593_v37 = vadd.f32 %v1559_v56, %v8673_v52 }
 0x2b7   :  { %v1614_v46 = vmul.f32 %v7812_v51, %v1597_v16  ;;  %v1616_v44 = vmul.f32 %v7812_v51, %v1599_v17  ;;  %v1618_v1 = vmul.f32 %v7812_v51, %v1601_v22  ;;  %v1620_v2 = vmul.f32 %v7812_v51, %v1603_v5 }
 0x2b8   :  { %v1622_v28 = vmul.f32 %v7812_v51, %v1605_v41  ;;  %v1624_v60 = vmul.f32 %v7812_v51, %v1607_v15  ;;  %v1626_v12 = vmul.f32 %v7812_v51, %v1609_v47  ;;  %v1628_v8 = vadd.f32 %v1612_v25, %v1579_v57 }
 0x2b9   :  { %v1630_v26 = vadd.f32 %v1614_v46, %v1581_v19  ;;  %v1632_v48 = vadd.f32 %v1616_v44, %v1583_v63  ;;  %v1634_v45 = vadd.f32 %v1618_v1, %v1585_v0  ;;  %v1636_v20 = vadd.f32 %v1620_v2, %v1587_v6 }
 0x2ba   :  { %v1638_v52 = vadd.f32 %v1622_v28, %v1589_v30  ;;  %v1640_v4 = vadd.f32 %v1624_v60, %v1591_v13  ;;  %v1642_v32 = vadd.f32 %v1626_v12, %v1593_v37  ;;  %v1645_v21 = vadd.f32 %v7815_v49, %v1628_v8 }
 0x2bb   :  { %v1647_v18 = vadd.f32 %v7815_v49, %v1630_v26  ;;  %v1649_v9 = vadd.f32 %v7815_v49, %v1632_v48  ;;  %v1651_v53 = vadd.f32 %v7815_v49, %v1634_v45  ;;  %v1653_v42 = vadd.f32 %v7815_v49, %v1636_v20 }
 0x2bc   :  { %v1655_v51 = vadd.f32 %v7815_v49, %v1638_v52  ;;  %v1657_v11 = vadd.f32 %v7815_v49, %v1640_v4  ;;  %v1659_v61 = vadd.f32 %v7815_v49, %v1642_v32  ;;  %v1661_v24 = vmax.f32 %v1645_v21, 0.0 }
 0x2bd   :  { %v1663_v29 = vmax.f32 %v1647_v18, 0.0  ;;  %v1665_v34 = vmax.f32 %v1649_v9, 0.0  ;;  %v1667_v23 = vmax.f32 %v1651_v53, 0.0  ;;  %v1669_v54 = vmax.f32 %v1653_v42, 0.0 }
 0x2be   :  { %v1671_v31 = vmax.f32 %v1655_v51, 0.0  ;;  %v1673_v59 = vmax.f32 %v1657_v11, 0.0  ;;  %v1675_v27 = vmax.f32 %v1659_v61, 0.0  ;;  %v1683_v43 = vsel %vm6017_vm5, %v1661_v24, 0.0 }
 0x2bf   :  { %v1685_v10 = vsel %vm6017_vm5, %v1663_v29, 0.0  ;;  %v1687_v39 = vsel %vm6017_vm5, %v1665_v34, 0.0  ;;  %v1689_v49 = vsel %vm6017_vm5, %v1667_v23, 0.0  ;;  %v1691_v58 = vsel %vm6017_vm5, %v1669_v54, 0.0 }
 0x2c0   :  { %v1693_v33 = vsel %vm6017_vm5, %v1671_v31, 0.0  ;;  %v1695_v14 = vsel %vm6017_vm5, %v1673_v59, 0.0  ;;  %v1697_v40 = vsel %vm6017_vm5, %v1675_v27, 0.0  ;;  %v1700_v16 = vsel %vm1699_vm13, %v1683_v43, -inf }
 0x2c1   :  { %v1714_v55 = vsel %vm1699_vm13, %v1685_v10, -inf  ;;  %v1728_v35 = vsel %vm1699_vm13, %v1687_v39, -inf  ;;  %v1742_v38 = vsel %vm1699_vm13, %v1689_v49, -inf  ;;  %v1701_v62 = vrot.slane %v1700_v16, 4 }
 0x2c2   :  { %v1715_v17 = vrot.slane %v1714_v55, 4  ;;  %v1729_v50 = vrot.slane %v1728_v35, 4  ;;  %v1743_v3 = vrot.slane %v1742_v38, 4  ;;  %v1756_v57 = vsel %vm1699_vm13, %v1691_v58, -inf }
 0x2c3   :  { %v1770_v19 = vsel %vm1699_vm13, %v1693_v33, -inf  ;;  %v1784_v22 = vsel %vm1699_vm13, %v1695_v14, -inf  ;;  %v1798_v36 = vsel %vm1699_vm13, %v1697_v40, -inf  ;;  %v1702_v5 = vmax.f32 %v1700_v16, %v1701_v62  ;;  %v4186_v40 = vld [vmem:[%s8894_s5 + $0x78] sm:$0xff] }
 0x2c4   :  { %v1716_v7 = vmax.f32 %v1714_v55, %v1715_v17  ;;  %v1730_v63 = vmax.f32 %v1728_v35, %v1729_v50  ;;  %v1744_v0 = vmax.f32 %v1742_v38, %v1743_v3  ;;  %v1757_v6 = vrot.slane %v1756_v57, 4  ;;  %v4185_v55 = vld [vmem:[%s8894_s5 + $0x70] sm:$0xff]  ;;  %v4184_v35 = vld [vmem:[%s8894_s5 + $0x68] sm:$0xff]  ;;  %v4183_v38 = vld [vmem:[%s8894_s5 + $0x60] sm:$0xff] }
 0x2c5   :  { %v1771_v41 = vrot.slane %v1770_v19, 4  ;;  %v1785_v15 = vrot.slane %v1784_v22, 4  ;;  %v1799_v47 = vrot.slane %v1798_v36, 4  ;;  %v1703_v56 = vrot.slane %v1702_v5, 2  ;;  %v4182_v62 = vld [vmem:[%s8894_s5 + $0x58] sm:$0xff]  ;;  %v4181_v17 = vld [vmem:[%s8894_s5 + $0x50] sm:$0xff] }
 0x2c6   :  { %v1717_v30 = vrot.slane %v1716_v7, 2  ;;  %v1731_v13 = vrot.slane %v1730_v63, 2  ;;  %v1745_v25 = vrot.slane %v1744_v0, 2  ;;  %v1758_v37 = vmax.f32 %v1756_v57, %v1757_v6  ;;  %v4180_v50 = vld [vmem:[%s8894_s5 + $0x48] sm:$0xff]  ;;  %v4179_v3 = vld [vmem:[%s8894_s5 + $0x40] sm:$0xff]  ;;  %v4178_v57 = vld [vmem:[%s8894_s5 + $0x38] sm:$0xff] }
 0x2c7   :  { %v1772_v46 = vmax.f32 %v1770_v19, %v1771_v41  ;;  %v1786_v44 = vmax.f32 %v1784_v22, %v1785_v15  ;;  %v1800_v1 = vmax.f32 %v1798_v36, %v1799_v47  ;;  %v1704_v2 = vmax.f32 %v1702_v5, %v1703_v56  ;;  %v4177_v19 = vld [vmem:[%s8894_s5 + $0x30] sm:$0xff]  ;;  %v4176_v22 = vld [vmem:[%s8894_s5 + $0x28] sm:$0xff]  ;;  %v4175_v36 = vld [vmem:[%s8894_s5 + $0x20] sm:$0xff] }
 0x2c8   :  { %v1718_v28 = vmax.f32 %v1716_v7, %v1717_v30  ;;  %v1732_v60 = vmax.f32 %v1730_v63, %v1731_v13  ;;  %v1746_v12 = vmax.f32 %v1744_v0, %v1745_v25  ;;  %v1759_v8 = vrot.slane %v1758_v37, 2  ;;  %v4174_v5 = vld [vmem:[%s8894_s5 + $0x18] sm:$0xff]  ;;  %v4173_v7 = vld [vmem:[%s8894_s5 + $0x10] sm:$0xff]  ;;  %v4172_v63 = vld [vmem:[%s8894_s5 + $0x8] sm:$0xff]  ;;  %v4457_v0 = vpop.f32.mrf.mxu0 }
 0x2c9   :  { %v1773_v26 = vrot.slane %v1772_v46, 2  ;;  %v1787_v48 = vrot.slane %v1786_v44, 2  ;;  %v1801_v45 = vrot.slane %v1800_v1, 2  ;;  %v1705_v20 = vrot.slane %v1704_v2, 1  ;;  %v4171_v6 = vld [vmem:[%s8894_s5] sm:$0xff]  ;;  %v4280_v41 = vld [vmem:[%s8896_s7 + $0x78] sm:$0xff] }
 0x2ca   :  { %v1719_v52 = vrot.slane %v1718_v28, 1  ;;  %v1733_v4 = vrot.slane %v1732_v60, 1  ;;  %v1747_v32 = vrot.slane %v1746_v12, 1  ;;  %v1760_v21 = vmax.f32 %v1758_v37, %v1759_v8  ;;  %v4279_v15 = vld [vmem:[%s8896_s7 + $0x70] sm:$0xff]  ;;  %v4458_v47 = vpop.f32.mrf.mxu0  ;;  %v4278_v56 = vld [vmem:[%s8896_s7 + $0x68] sm:$0xff]  ;;  %v4277_v30 = vld [vmem:[%s8896_s7 + $0x60] sm:$0xff] }
 0x2cb   :  { %v1774_v18 = vmax.f32 %v1772_v46, %v1773_v26  ;;  %v1788_v9 = vmax.f32 %v1786_v44, %v1787_v48  ;;  %v1802_v53 = vmax.f32 %v1800_v1, %v1801_v45  ;;  %v1706_v42 = vmax.f32 %v1704_v2, %v1705_v20  ;;  %v4276_v25 = vld [vmem:[%s8896_s7 + $0x58] sm:$0xff]  ;;  %v4275_v44 = vld [vmem:[%s8896_s7 + $0x50] sm:$0xff]  ;;  %v4421_v1 = vld [vmem:[%s8893_s4] ss:$0 sm:$0xff] }
 0x2cc   :  { %v1720_v51 = vmax.f32 %v1718_v28, %v1719_v52  ;;  %v1734_v11 = vmax.f32 %v1732_v60, %v1733_v4  ;;  %v1748_v61 = vmax.f32 %v1746_v12, %v1747_v32  ;;  %v1761_v24 = vrot.slane %v1760_v21, 1  ;;  %v4274_v28 = vld [vmem:[%s8896_s7 + $0x48] sm:$0xff]  ;;  %v4273_v60 = vld [vmem:[%s8896_s7 + $0x40] sm:$0xff]  ;;  %v4272_v12 = vld [vmem:[%s8896_s7 + $0x38] sm:$0xff] }
 0x2cd   :  { %v1775_v29 = vrot.slane %v1774_v18, 1  ;;  %v1789_v34 = vrot.slane %v1788_v9, 1  ;;  %v1803_v23 = vrot.slane %v1802_v53, 1  ;;  %v4711_v16 = vmov 0.0   ;;  %v4271_v8 = vld [vmem:[%s8896_s7 + $0x30] sm:$0xff]  ;;  %v4270_v26 = vld [vmem:[%s8896_s7 + $0x28] sm:$0xff] }
 0x2ce   :  { %v4035_v54 = vsel %vm3996_vm6, %v1720_v51, %v1706_v42  ;;  %v1762_v31 = vmax.f32 %v1760_v21, %v1761_v24  ;;  %4497 = vmatprep.subr.mxu1 %v4711_v16  ;;  %4532 = vmatprep.subr.mxu0 %v4711_v16  ;;  %v4269_v48 = vld [vmem:[%s8896_s7 + $0x20] sm:$0xff]  ;;  %v4268_v45 = vld [vmem:[%s8896_s7 + $0x18] sm:$0xff]  ;;  %v4459_v20 = vadd.f32 %v4458_v47, %v4457_v0  ;;  %v4267_v21 = vld [vmem:[%s8896_s7 + $0x10] sm:$0xff]  ;;  %v4714_v24 = vmov 0  }
 0x2cf   :  { %v1776_v59 = vmax.f32 %v1774_v18, %v1775_v29  ;;  %v1790_v27 = vmax.f32 %v1788_v9, %v1789_v34  ;;  %v4036_v43 = vsel %vm3998_vm7, %v1734_v11, %v4035_v54  ;;  %v1804_v10 = vmax.f32 %v1802_v53, %v1803_v23  ;;  %4498 = vmatpush3.msra.mxu1 %v4186_v40  ;;  %v4266_v18 = vld [vmem:[%s8896_s7 + $0x8] sm:$0xff]  ;;  %v4265_v9 = vld [vmem:[%s8896_s7] sm:$0xff] }
 0x2d0   :  { %v4037_v39 = vsel %vm4000_vm8, %v1748_v61, %v4036_v43  ;;  %4499 = vmatprep.subr.mxu1 %v4711_v16  ;;  %4529 = vmatprep.mubr.msk.f32.mxu1 %vm4712_vm14, %v4711_v16  ;;  %v4157_v52 = vadd.f32 %v4459_v20, %v4421_v1  ;;  %v4422_v53 = vld [vmem:[%s8895_s6] ss:$0 sm:$0xff]  ;;  %s4715_s6 = smov [#allocation8]  }
 0x2d1   :  { %v4038_v49 = vsel %vm4002_vm9, %v1762_v31, %v4037_v39  ;;  %4500 = vmatpush3.msra.mxu1 %v4185_v55  ;;  %4533 = vmatpush3.msra.mxu0 %v4280_v41  ;;  %v4423_v29 = vld [vmem:[#allocation4] ss:$0 sm:$0xff]  ;;  %s4389_s7 = sshll.u32 %s4715_s6, 4  ;;  %s4390_s7 = int_to_ptr.vmem [resolvable:$true] %s4389_s7 }
 0x2d2   :  { %v4039_v58 = vsel %vm4004_vm10, %v1776_v59, %v4038_v49  ;;  %4501 = vmatprep.subr.mxu1 %v4711_v16  ;;  %4534 = vmatprep.subr.mxu0 %v4711_v16  ;;  %v9332_v49 = vld [vmem:[#allocation14_spill] sm:$0xff]  ;;  %s4686_s0 = scalar_lea.vmem %s4390_s7, 16  ;;  %s4690_s3 = scalar_lea.vmem %s4390_s7, 32 }
 0x2d3   :  { %v4040_v33 = vsel %vm4006_vm11, %v1790_v27, %v4039_v58  ;;  %4502 = vmatpush3.msra.mxu1 %v4184_v35  ;;  %4535 = vmatpush3.msra.mxu0 %v4279_v15  ;;  %p4687_p5 = scmp.ne.s32.totalorder %s4390_s7, %s4686_s0  ;;  %p4691_p6 = scmp.lt.s32.totalorder %s4390_s7, %s4390_s7 }
 0x2d4   :  { %v4041_v14 = vsel %vm4008_vm12, %v1804_v10, %v4040_v33  ;;  %4503 = vmatprep.subr.mxu1 %v4711_v16  ;;  %4536 = vmatprep.subr.mxu0 %v4711_v16  ;;  %v9331_v10 = vlaneseq  ;;  %p4692_p7 = scmp.lt.s32.totalorder %s4690_s3, %s4686_s0 }
 0x2d5   :  { %4160 = vmatmul.mubr.f32.gmra.mxu0 %v4041_v14  ;;  %4504 = vmatpush3.msra.mxu1 %v4183_v38 }
 0x2d6   :  { %4505 = vmatprep.subr.mxu1 %v4711_v16  ;;  %4564 = vmatprep.mubr.msk.f32.mxu0 %vm4712_vm14, %v4711_v16  ;;  %v4365_v39 = vand.u32 127, %v9331_v10  ;;  %p4693_p8 = por %p4692_p7, %p4691_p6 }
 0x2d7   :  { %4506 = vmatpush3.msra.mxu1 %v4182_v62  ;;  %4537 = vmatpush3.msra.mxu0 %v4278_v56 }
 0x2d8   :  { %4507 = vmatprep.subr.mxu1 %v4711_v16  ;;  %4538 = vmatprep.subr.mxu0 %v4711_v16  ;;  %vm4366_vm0 = vcmp.eq.s32.totalorder %v9332_v49, %v4365_v39  ;;  %p4694_p9 = pnand %p4693_p8, %p4687_p5 }
 0x2d9   :  { %4508 = vmatpush3.msra.mxu1 %v4181_v17  ;;  %4539 = vmatpush3.msra.mxu0 %v4277_v30 }
 0x2da   :  { %4509 = vmatprep.subr.mxu1 %v4711_v16  ;;  %4540 = vmatprep.subr.mxu0 %v4711_v16 }
 0x2db   :  { %4510 = vmatpush3.msra.mxu1 %v4180_v50  ;;  %4541 = vmatpush3.msra.mxu0 %v4276_v25 }
 0x2dc   :  { %4511 = vmatprep.subr.mxu1 %v4711_v16  ;;  %4542 = vmatprep.subr.mxu0 %v4711_v16 }
 0x2dd   :  { %4512 = vmatpush3.msra.mxu1 %v4179_v3  ;;  %4543 = vmatpush3.msra.mxu0 %v4275_v44 }
 0x2de   :  { %4513 = vmatprep.subr.mxu1 %v4711_v16  ;;  %4544 = vmatprep.subr.mxu0 %v4711_v16 }
 0x2df   :  { %4514 = vmatpush3.msra.mxu1 %v4178_v57  ;;  %4545 = vmatpush3.msra.mxu0 %v4274_v28 }
 0x2e0   :  { %4515 = vmatprep.subr.mxu1 %v4711_v16  ;;  %4546 = vmatprep.subr.mxu0 %v4711_v16 }
 0x2e1   :  { %4516 = vmatpush3.msra.mxu1 %v4177_v19  ;;  %4547 = vmatpush3.msra.mxu0 %v4273_v60 }
 0x2e2   :  { %4517 = vmatprep.subr.mxu1 %v4711_v16  ;;  %4548 = vmatprep.subr.mxu0 %v4711_v16 }
 0x2e3   :  { %4518 = vmatpush3.msra.mxu1 %v4176_v22  ;;  %4549 = vmatpush3.msra.mxu0 %v4272_v12 }
 0x2e4   :  { %4519 = vmatprep.subr.mxu1 %v4711_v16  ;;  %4550 = vmatprep.subr.mxu0 %v4711_v16 }
 0x2e5   :  { %4520 = vmatpush3.msra.mxu1 %v4175_v36  ;;  %4551 = vmatpush3.msra.mxu0 %v4271_v8 }
 0x2e6   :  { %4521 = vmatprep.subr.mxu1 %v4711_v16  ;;  %4552 = vmatprep.subr.mxu0 %v4711_v16 }
 0x2e7   :  { %4522 = vmatpush3.msra.mxu1 %v4174_v5  ;;  %4553 = vmatpush3.msra.mxu0 %v4270_v26 }
 0x2e8   :  { %4523 = vmatprep.subr.mxu1 %v4711_v16  ;;  %4554 = vmatprep.subr.mxu0 %v4711_v16 }
 0x2e9   :  { %4524 = vmatpush3.msra.mxu1 %v4173_v7  ;;  %4555 = vmatpush3.msra.mxu0 %v4269_v48 }
 0x2ea   :  { %4525 = vmatprep.subr.mxu1 %v4711_v16  ;;  %4556 = vmatprep.subr.mxu0 %v4711_v16 }
 0x2eb   :  { %4526 = vmatpush3.msra.mxu1 %v4172_v63  ;;  %4557 = vmatpush3.msra.mxu0 %v4268_v45 }
 0x2ec   :  { %4527 = vmatprep.subr.mxu1 %v4711_v16  ;;  %4558 = vmatprep.subr.mxu0 %v4711_v16 }
 0x2ed   :  { %4528 = vmatpush3.msra.mxu1 %v4171_v6  ;;  %4559 = vmatpush3.msra.mxu0 %v4267_v21 }
 0x2ee   :  { %4560 = vmatprep.subr.mxu0 %v4711_v16  ;;  %4573 = vset.pattern.permute.xlu0 %v4714_v24 }
 0x2ef   :  { %4561 = vmatpush3.msra.mxu0 %v4266_v18 }
 0x2f0   :  { %4562 = vmatprep.subr.mxu0 %v4711_v16 }
 0x2f1   :  { %4563 = vmatpush3.msra.mxu0 %v4265_v9 }
 0x395   :  { %v4460_v13 = vpop.f32.mrf.mxu0 }
 0x397   :  { %v4461_v37 = vpop.f32.mrf.mxu0 }
 0x398   :  { %v4462_v46 = vadd.f32 %v4461_v37, %v4460_v13 }
 0x39a   :  { %v4162_v2 = vadd.f32 %v4462_v46, %v4421_v1 }
 0x39c   :  { %4166 = vrot.lane.b32.xlu0 %v4162_v2, %s4713_s23 }
 0x40e   :  { %v4167_v4 = vpop.permute.xlu0 %4166 }
 0x40f   :  { %v4170_v32 = vsel %vm4169_vm15, %v4157_v52, %v4167_v4 }
 0x410   :  { %4530 = vmatmul.mubr.f32.vlgmr.msra.gmra.mxu1 %v4170_v32 }
 0x4d0   :  { %v4260_v42 = vpop.f32.mrf.mxu1 }
 0x4d1   :  { %v4261_v51 = vadd.f32 %v4422_v53, %v4260_v42 }
 0x4d2   :  { %v4531_v11 = vpop.f32.mrf.mxu1 }
 0x4d3   :  { %v4264_v61 = vmax.f32 %v4261_v51, 0.0 }
 0x4d5   :  { %4565 = vmatmul.mubr.f32.vlgmr.msra.gmra.mxu0 %v4264_v61 }
 0x595   :  { %v4354_v34 = vpop.f32.mrf.mxu0 }
 0x596   :  { %v4355_v23 = vadd.f32 %v4423_v29, %v4354_v34 }
 0x597   :  { %v4566_v54 = vpop.f32.mrf.mxu0 }
 0x598   :  { %v4424_v31 = vmul.f32 -1.442695, %v4355_v23 }
 0x59a   :  { %4574 = vpow2.f32 %v4424_v31 }
 0x5a7   :  { %v4575_v59 = vpop.eup %4574 }
 0x5a8   :  { %v4361_v27 = vadd.f32 1.0, %v4575_v59 }
 0x5aa   :  { %4576 = vrcp.f32 %v4361_v27 }
 0x5b7   :  { %v4577_v43 = vpop.eup %4576 }
 0x5b8   :  { %4369 = vperm.xlu0 %4573, %v4577_v43  }
 0x633   :  { %v4370_v58 = vpop.permute.xlu0 %4369 }
 0x634   :  { %v4372_v33 = vsel %vm4366_vm0, %v4370_v58, 0.0 }
 0x635   :  { %v4374_v14 = vsel %vm4373_vm1, %v4372_v33, 0.0 }
 0x636   :  { %v4375_v40 = vrot.slane %v4374_v14, 4 }
 0x638   :  { %v4376_v16 = vadd.f32 %v4375_v40, %v4374_v14 }
 0x63a   :  { %v4377_v55 = vrot.slane %v4376_v16, 2 }
 0x63c   :  { %v4378_v35 = vadd.f32 %v4377_v55, %v4376_v16 }
 0x63e   :  { %v4379_v38 = vrot.slane %v4378_v35, 1 }
 0x640   :  { %v4380_v62 = vadd.f32 %v4379_v38, %v4378_v35 }
 0x642   :  { %4382 = vst.msk [vmem:[#allocation8] sm:$0x1] %vm4381_vm2, %v4380_v62 }
 0x643   :  { %4697 = shalt.err (!%p4694_p9)
}
 0x644   :  { %4392 = dma.vmem_to_hbm [thread:$0]  %s4390_s7, 16, %s8898_s9, [#allocation6]  }
 0x645   :  { %4708 = dma.done.wait [#allocation6], 16  }
 0x646   :  { %4709 = vsyncadd [#allocation6], 4294967280 }
 0x647   :  { %4396 = vsyncpa [#allocation6], 1 }
 0x648   :  { %4397 = vsyncpa [#allocation7], 1 }

</bundles_post_ra>
